<compile_context>
chip_gen: v7x
topology: tpu7x:2x2x1
jax: 0.10.0
libtpu: 0.0.40
codegen_flags: <defaults>
</compile_context>

<pallas_src>
import functools

import jax
import jax.numpy as jnp
from jax import lax
from jax.experimental import pallas as pl
from jax.experimental.pallas import tpu as pltpu


# --------------------------------------------------------------------------- #
# Kernel A: LayerNorm + QKV projection
#   q, v : head-major (H, TN, dh)            (bf16)
#   k    : head-major, pre-transposed (H, dh, TN) -- lane-dense token dim
# --------------------------------------------------------------------------- #
def _qkv_kernel(x_ref, gamma_ref, beta_ref, wqv_ref, wkt_ref,
                q_ref, k_ref, v_ref, *, heads, dim_head, eps):
    # LayerNorm over features, f32 statistics.
    x = x_ref[...].astype(jnp.float32)                        # (TN, D)
    mean = jnp.mean(x, axis=-1, keepdims=True)
    var = jnp.mean(jnp.square(x - mean), axis=-1, keepdims=True)
    xn = (x - mean) * lax.rsqrt(var + eps)
    xn = xn * gamma_ref[...] + beta_ref[...]                   # (TN, D) f32
    xn_b = xn.astype(jnp.bfloat16)                             # bf16 MXU input

    tn = xn_b.shape[0]
    inner = heads * dim_head

    # Fused Q/V projection: one bf16 matmul, f32 accumulation on the MXU.
    # (Softmax scale is already folded into the Q columns in the wrapper.)
    qv = jnp.dot(xn_b, wqv_ref[...], preferred_element_type=jnp.float32)
    q3 = qv[:, :inner].reshape(tn, heads, dim_head)            # (TN, H, dh)
    v3 = qv[:, inner:].reshape(tn, heads, dim_head)
    q_ref[...] = jnp.transpose(q3, (1, 0, 2)).astype(q_ref.dtype)  # (H, TN, dh)
    v_ref[...] = jnp.transpose(v3, (1, 0, 2)).astype(v_ref.dtype)

    # K^T projection: W_k^T (inner, D) contracted against xn on the feature
    # dim yields (inner, TN) directly -> lane-dense K store and no QK^T
    # transpose inside the attention kernel.
    kt = lax.dot_general(wkt_ref[...], xn_b,
                         dimension_numbers=(((1,), (1,)), ((), ())),
                         preferred_element_type=jnp.float32)   # (inner, TN)
    k_ref[...] = kt.reshape(heads, dim_head, tn).astype(k_ref.dtype)


# --------------------------------------------------------------------------- #
# Kernel B: per-head attention + fused output projection
# --------------------------------------------------------------------------- #
def _attn_kernel(q_ref, k_ref, v_ref, wo_ref, bo_ref, o_ref, *,
                 heads, seq_len, padded_len):
    tq = q_ref.shape[1]
    d_out = o_ref.shape[-1]

    # Static mask for padded key columns (only built when padding exists).
    if seq_len < padded_len:
        col = lax.broadcasted_iota(jnp.int32, (1, padded_len), 1)
        key_bias = jnp.where(col < seq_len,
                             jnp.float32(0.0), jnp.float32(-1e30))
    else:
        key_bias = None

    def head_body(h, acc):
        qh = q_ref[h]                                          # (TQ, dh)  bf16
        kh = k_ref[h]                                          # (dh, Np)  bf16
        vh = v_ref[h]                                          # (Np, dh)  bf16

        # Scores: natural-orientation matmul (scale folded into W_q).
        # Only one (TQ, Np) f32 slab is live at a time.
        s = jnp.dot(qh, kh, preferred_element_type=jnp.float32)
        if key_bias is not None:
            s = s + key_bias

        m = jnp.max(s, axis=-1, keepdims=True)
        p = jnp.exp(s - m)
        l = jnp.sum(p, axis=-1, keepdims=True)

        # Unnormalized PV, then normalize the small (TQ, dh) context.
        ctx = jnp.dot(p.astype(jnp.bfloat16), vh,
                      preferred_element_type=jnp.float32)      # (TQ, dh) f32
        ctx = ctx * pl.reciprocal(l, approx=True)

        # Per-head slice of the output projection; accumulating over heads
        # replaces the merge-heads transpose + one big matmul.
        return acc + jnp.dot(ctx.astype(jnp.bfloat16), wo_ref[h],
                             preferred_element_type=jnp.float32)

    acc = lax.fori_loop(0, heads, head_body,
                        jnp.zeros((tq, d_out), jnp.float32), unroll=True)
    o_ref[...] = (acc + bo_ref[...]).astype(o_ref.dtype)       # lane-dense store


# --------------------------------------------------------------------------- #
# Wrapper
# --------------------------------------------------------------------------- #
def attention_forward(x, gamma, beta, w_qkv, w_out, b_out, *, heads, dim_head,
                      eps=1e-5):
    """x: (B, N, D).  Returns (B, N, D)."""
    B, N, D = x.shape
    inner = heads * dim_head
    scale = dim_head ** (-0.5)

    # Pad the sequence to a multiple of 128 so 128-token tiling always applies.
    n_pad = ((N + 127) // 128) * 128
    tn = tq = 128
    x_p = jnp.pad(x, ((0, 0), (0, n_pad - N), (0, 0))) if n_pad != N else x

    # Weight prep (XLA side): fold softmax scale into W_q, fuse Q/V weights,
    # pre-transpose W_k, reshape W_out per head, cast MXU weights to bf16.
    w_q = w_qkv[:, 0 * inner:1 * inner] * scale
    w_k = w_qkv[:, 1 * inner:2 * inner]
    w_v = w_qkv[:, 2 * inner:3 * inner]
    w_qv = jnp.concatenate([w_q, w_v], axis=1).astype(jnp.bfloat16)   # (D, 2I)
    w_kt = w_k.T.astype(jnp.bfloat16)                                  # (I, D)
    w_o = w_out.reshape(heads, dim_head, D).astype(jnp.bfloat16)       # (H,dh,D)
    gamma2 = gamma.reshape(1, D).astype(jnp.float32)
    beta2 = beta.reshape(1, D).astype(jnp.float32)
    bout2 = b_out.reshape(1, D).astype(jnp.float32)

    cparams = pltpu.CompilerParams(
        dimension_semantics=("parallel", "parallel"),
        vmem_limit_bytes=32 * 1024 * 1024)

    # ---- Kernel A: LN + QKV projection -------------------------------------
    qkv_kernel = functools.partial(_qkv_kernel, heads=heads,
                                   dim_head=dim_head, eps=eps)
    q_h, k_h, v_h = pl.pallas_call(
        qkv_kernel,
        out_shape=(
            jax.ShapeDtypeStruct((B, heads, n_pad, dim_head), jnp.bfloat16),
            jax.ShapeDtypeStruct((B, heads, dim_head, n_pad), jnp.bfloat16),
            jax.ShapeDtypeStruct((B, heads, n_pad, dim_head), jnp.bfloat16),
        ),
        grid_spec=pltpu.PrefetchScalarGridSpec(
            num_scalar_prefetch=0,
            grid=(B, n_pad // tn),
            in_specs=[
                pl.BlockSpec((None, tn, D), lambda b, n: (b, n, 0)),        # x
                pl.BlockSpec((1, D), lambda b, n: (0, 0)),                  # gamma
                pl.BlockSpec((1, D), lambda b, n: (0, 0)),                  # beta
                pl.BlockSpec((D, 2 * inner), lambda b, n: (0, 0)),          # W_qv
                pl.BlockSpec((inner, D), lambda b, n: (0, 0)),              # W_k^T
            ],
            out_specs=[
                pl.BlockSpec((None, heads, tn, dim_head),
                             lambda b, n: (b, 0, n, 0)),                    # q
                pl.BlockSpec((None, heads, dim_head, tn),
                             lambda b, n: (b, 0, 0, n)),                    # k^T
                pl.BlockSpec((None, heads, tn, dim_head),
                             lambda b, n: (b, 0, n, 0)),                    # v
            ],
        ),
        compiler_params=cparams,
    )(x_p, gamma2, beta2, w_qv, w_kt)

    # ---- Kernel B: per-head attention + output projection -------------------
    attn_kernel = functools.partial(_attn_kernel, heads=heads,
                                    seq_len=N, padded_len=n_pad)
    out = pl.pallas_call(
        attn_kernel,
        out_shape=jax.ShapeDtypeStruct((B, n_pad, D), x.dtype),
        grid_spec=pltpu.PrefetchScalarGridSpec(
            num_scalar_prefetch=0,
            grid=(B, n_pad // tq),
            in_specs=[
                pl.BlockSpec((None, heads, tq, dim_head),
                             lambda b, q: (b, 0, q, 0)),                    # q tile
                pl.BlockSpec((None, heads, dim_head, n_pad),
                             lambda b, q: (b, 0, 0, 0)),                    # k^T
                pl.BlockSpec((None, heads, n_pad, dim_head),
                             lambda b, q: (b, 0, 0, 0)),                    # v
                pl.BlockSpec((heads, dim_head, D),
                             lambda b, q: (0, 0, 0)),                       # W_out
                pl.BlockSpec((1, D), lambda b, q: (0, 0)),                  # b_out
            ],
            out_specs=pl.BlockSpec((None, tq, D), lambda b, q: (b, q, 0)),
        ),
        compiler_params=cparams,
    )(q_h, k_h, v_h, w_o, bout2)

    return out[:, :N, :] if n_pad != N else out


# --------------------------------------------------------------------------- #
# Pure-JAX reference mirroring the PyTorch module (f32 throughout)
# --------------------------------------------------------------------------- #
def reference_forward(x, gamma, beta, w_qkv, w_out, b_out, *, heads, dim_head,
                      eps=1e-5):
    B, N, D = x.shape
    inner = heads * dim_head
    scale = dim_head ** (-0.5)
    mean = jnp.mean(x, axis=-1, keepdims=True)
    var = jnp.mean((x - mean) ** 2, axis=-1, keepdims=True)
    xn = (x - mean) / jnp.sqrt(var + eps) * gamma + beta
    qkv = xn @ w_qkv                                        # (B, N, 3*inner)
    q, k, v = jnp.split(qkv, 3, axis=-1)

    def to_heads(t):
        return t.reshape(B, N, heads, dim_head).transpose(0, 2, 1, 3)

    q, k, v = map(to_heads, (q, k, v))                      # (B, H, N, dh)
    dots = jnp.einsum('bhid,bhjd->bhij', q, k) * scale
    attn = jax.nn.softmax(dots, axis=-1)
    out = jnp.einsum('bhij,bhjd->bhid', attn, v)
    out = out.transpose(0, 2, 1, 3).reshape(B, N, inner)
    return out @ w_out + b_out


if __name__ == "__main__":
    # Small, module-consistent shapes (N % 128 != 0 -> exercises pad + mask).
    B, N, D = 2, 8, 32
    HEADS, DIM_HEAD = 4, 16
    INNER = HEADS * DIM_HEAD

    key = jax.random.PRNGKey(0)
    kx, kqkv, kwo, kbo, kg, kb = jax.random.split(key, 6)

    x = jax.random.normal(kx, (B, N, D), dtype=jnp.float32)

    # Deterministic synthetic parameters (PyTorch-default-ish init):
    gamma = 1.0 + 0.1 * jax.random.normal(kg, (D,), jnp.float32)   # LN weight
    beta = 0.1 * jax.random.normal(kb, (D,), jnp.float32)          # LN bias
    w_qkv = jax.random.normal(kqkv, (D, 3 * INNER), jnp.float32) * (D ** -0.5)
    w_out = jax.random.normal(kwo, (INNER, D), jnp.float32) * (INNER ** -0.5)
    b_out = jax.random.normal(kbo, (D,), jnp.float32) * 0.01

    y = attention_forward(x, gamma, beta, w_qkv, w_out, b_out,
                          heads=HEADS, dim_head=DIM_HEAD)
    y = jax.block_until_ready(y)

    y_ref = reference_forward(x, gamma, beta, w_qkv, w_out, b_out,
                              heads=HEADS, dim_head=DIM_HEAD)
    assert y.shape == (B, N, D)
    # bf16 matmul inputs (f32 accumulation) + approx reciprocal => loosen
    # tolerance vs. the all-f32 reference.
    assert jnp.allclose(y, y_ref, atol=5e-2, rtol=5e-2), "mismatch vs reference"

    print("KERNEL_OK")
</pallas_src>

<mosaic_0001>
module attributes {stable_mosaic.version = 11 : i64} {
  func.func @_qkv_kernel(%arg0: i32, %arg1: i32, %arg2: memref<1x128x32xf32, #tpu.memory_space<vmem>>, %arg3: memref<1x32xf32, #tpu.memory_space<vmem>>, %arg4: memref<1x32xf32, #tpu.memory_space<vmem>>, %arg5: memref<32x128xbf16, #tpu.memory_space<vmem>>, %arg6: memref<64x32xbf16, #tpu.memory_space<vmem>>, %arg7: memref<1x4x128x16xbf16, #tpu.memory_space<vmem>>, %arg8: memref<1x4x16x128xbf16, #tpu.memory_space<vmem>>, %arg9: memref<1x4x128x16xbf16, #tpu.memory_space<vmem>>) attributes {dimension_semantics = [#tpu.dimension_semantics<parallel>, #tpu.dimension_semantics<parallel>], iteration_bounds = array<i64: 2, 1>, scalar_prefetch = 0 : i64, scratch_operands = 0 : i64, tpu.core_type = #tpu.core_type<tc>, window_params = [{transform_indices = @transform_0, window_bounds = array<i64: 1, 128, 32>}, {pipeline_mode = #tpu.pipeline_mode<synchronous>, transform_indices = @transform_1, window_bounds = array<i64: 1, 32>}, {pipeline_mode = #tpu.pipeline_mode<synchronous>, transform_indices = @transform_2, window_bounds = array<i64: 1, 32>}, {pipeline_mode = #tpu.pipeline_mode<synchronous>, transform_indices = @transform_3, window_bounds = array<i64: 32, 128>}, {pipeline_mode = #tpu.pipeline_mode<synchronous>, transform_indices = @transform_4, window_bounds = array<i64: 64, 32>}, {transform_indices = @transform_5, window_bounds = array<i64: 1, 4, 128, 16>}, {transform_indices = @transform_6, window_bounds = array<i64: 1, 4, 16, 128>}, {transform_indices = @transform_7, window_bounds = array<i64: 1, 4, 128, 16>}]} {
    %c0 = arith.constant 0 : index
    %c0_0 = arith.constant 0 : index
    %c0_1 = arith.constant 0 : index
    %0 = vector.load %arg2[%c0, %c0_0, %c0_1] : memref<1x128x32xf32, #tpu.memory_space<vmem>>, vector<1x128x32xf32>
    %1 = vector.shape_cast %0 : vector<1x128x32xf32> to vector<128x32xf32>
    %cst = arith.constant dense<0.000000e+00> : vector<128xf32>
    %2 = vector.multi_reduction <add>, %1, %cst [1] : vector<128x32xf32> to vector<128xf32>
    %3 = vector.shape_cast %2 : vector<128xf32> to vector<128x1xf32>
    %cst_2 = arith.constant 3.200000e+01 : f32
    %4 = vector.broadcast %cst_2 : f32 to vector<128x1xf32>
    %5 = arith.divf %3, %4 : vector<128x1xf32>
    %6 = vector.broadcast %5 : vector<128x1xf32> to vector<128x32xf32>
    %7 = arith.subf %1, %6 : vector<128x32xf32>
    %8 = arith.mulf %7, %7 : vector<128x32xf32>
    %cst_3 = arith.constant dense<0.000000e+00> : vector<128xf32>
    %9 = vector.multi_reduction <add>, %8, %cst_3 [1] : vector<128x32xf32> to vector<128xf32>
    %10 = vector.shape_cast %9 : vector<128xf32> to vector<128x1xf32>
    %cst_4 = arith.constant 3.200000e+01 : f32
    %11 = vector.broadcast %cst_4 : f32 to vector<128x1xf32>
    %12 = arith.divf %10, %11 : vector<128x1xf32>
    %13 = vector.broadcast %5 : vector<128x1xf32> to vector<128x32xf32>
    %14 = arith.subf %1, %13 : vector<128x32xf32>
    %cst_5 = arith.constant 9.99999974E-6 : f32
    %15 = vector.broadcast %cst_5 : f32 to vector<128x1xf32>
    %16 = arith.addf %12, %15 : vector<128x1xf32>
    %17 = math.rsqrt %16 : vector<128x1xf32>
    %18 = vector.broadcast %17 : vector<128x1xf32> to vector<128x32xf32>
    %19 = arith.mulf %14, %18 : vector<128x32xf32>
    %c0_6 = arith.constant 0 : index
    %c0_7 = arith.constant 0 : index
    %20 = vector.load %arg3[%c0_6, %c0_7] : memref<1x32xf32, #tpu.memory_space<vmem>>, vector<1x32xf32>
    %21 = vector.broadcast %20 : vector<1x32xf32> to vector<128x32xf32>
    %22 = arith.mulf %19, %21 : vector<128x32xf32>
    %c0_8 = arith.constant 0 : index
    %c0_9 = arith.constant 0 : index
    %23 = vector.load %arg4[%c0_8, %c0_9] : memref<1x32xf32, #tpu.memory_space<vmem>>, vector<1x32xf32>
    %24 = vector.broadcast %23 : vector<1x32xf32> to vector<128x32xf32>
    %25 = arith.addf %22, %24 : vector<128x32xf32>
    %26 = arith.truncf %25 : vector<128x32xf32> to vector<128x32xbf16>
    %c0_10 = arith.constant 0 : index
    %c0_11 = arith.constant 0 : index
    %27 = vector.load %arg5[%c0_10, %c0_11] : memref<32x128xbf16, #tpu.memory_space<vmem>>, vector<32x128xbf16>
    %cst_12 = arith.constant dense<0.000000e+00> : vector<128x128xf32>
    %28 = tpu.matmul %26, %27, %cst_12 {dimension_numbers = #tpu.dot_dimension_numbers<[1], [0], [0], [1], [0, 0, 1, 1], [], []>} : vector<128x32xbf16>, vector<32x128xbf16>, vector<128x128xf32> -> vector<128x128xf32>
    %29 = vector.extract_strided_slice %28 {offsets = [0, 0], sizes = [128, 64], strides = [1, 1]} : vector<128x128xf32> to vector<128x64xf32>
    %30 = vector.shape_cast %29 : vector<128x64xf32> to vector<128x4x16xf32>
    %31 = vector.extract_strided_slice %28 {offsets = [0, 64], sizes = [128, 64], strides = [1, 1]} : vector<128x128xf32> to vector<128x64xf32>
    %32 = vector.shape_cast %31 : vector<128x64xf32> to vector<128x4x16xf32>
    %33 = tpu.transpose %30, [1, 0, 2] : vector<128x4x16xf32> -> vector<4x128x16xf32>
    %34 = arith.truncf %33 : vector<4x128x16xf32> to vector<4x128x16xbf16>
    %c0_13 = arith.constant 0 : index
    %c0_14 = arith.constant 0 : index
    %c0_15 = arith.constant 0 : index
    %c0_16 = arith.constant 0 : index
    %35 = vector.load %arg7[%c0_13, %c0_14, %c0_15, %c0_16] : memref<1x4x128x16xbf16, #tpu.memory_space<vmem>>, vector<1x4x128x16xbf16>
    %36 = vector.shape_cast %35 : vector<1x4x128x16xbf16> to vector<4x128x16xbf16>
    %37 = vector.shape_cast %34 : vector<4x128x16xbf16> to vector<1x4x128x16xbf16>
    tpu.vector_store %arg7[%c0_13, %c0_14, %c0_15, %c0_16], %37 {strides = array<i32>} : memref<1x4x128x16xbf16, #tpu.memory_space<vmem>>, vector<1x4x128x16xbf16>,
    %38 = tpu.transpose %32, [1, 0, 2] : vector<128x4x16xf32> -> vector<4x128x16xf32>
    %39 = arith.truncf %38 : vector<4x128x16xf32> to vector<4x128x16xbf16>
    %c0_17 = arith.constant 0 : index
    %c0_18 = arith.constant 0 : index
    %c0_19 = arith.constant 0 : index
    %c0_20 = arith.constant 0 : index
    %40 = vector.load %arg9[%c0_17, %c0_18, %c0_19, %c0_20] : memref<1x4x128x16xbf16, #tpu.memory_space<vmem>>, vector<1x4x128x16xbf16>
    %41 = vector.shape_cast %40 : vector<1x4x128x16xbf16> to vector<4x128x16xbf16>
    %42 = vector.shape_cast %39 : vector<4x128x16xbf16> to vector<1x4x128x16xbf16>
    tpu.vector_store %arg9[%c0_17, %c0_18, %c0_19, %c0_20], %42 {strides = array<i32>} : memref<1x4x128x16xbf16, #tpu.memory_space<vmem>>, vector<1x4x128x16xbf16>,
    %c0_21 = arith.constant 0 : index
    %c0_22 = arith.constant 0 : index
    %43 = vector.load %arg6[%c0_21, %c0_22] : memref<64x32xbf16, #tpu.memory_space<vmem>>, vector<64x32xbf16>
    %cst_23 = arith.constant dense<0.000000e+00> : vector<64x128xf32>
    %44 = tpu.matmul %43, %26, %cst_23 {dimension_numbers = #tpu.dot_dimension_numbers<[1], [1], [0], [0], [0, 0, 1, 0], [], []>} : vector<64x32xbf16>, vector<128x32xbf16>, vector<64x128xf32> -> vector<64x128xf32>
    %45 = vector.shape_cast %44 : vector<64x128xf32> to vector<4x16x128xf32>
    %46 = arith.truncf %45 : vector<4x16x128xf32> to vector<4x16x128xbf16>
    %c0_24 = arith.constant 0 : index
    %c0_25 = arith.constant 0 : index
    %c0_26 = arith.constant 0 : index
    %c0_27 = arith.constant 0 : index
    %47 = vector.load %arg8[%c0_24, %c0_25, %c0_26, %c0_27] : memref<1x4x16x128xbf16, #tpu.memory_space<vmem>>, vector<1x4x16x128xbf16>
    %48 = vector.shape_cast %47 : vector<1x4x16x128xbf16> to vector<4x16x128xbf16>
    %49 = vector.shape_cast %46 : vector<4x16x128xbf16> to vector<1x4x16x128xbf16>
    tpu.vector_store %arg8[%c0_24, %c0_25, %c0_26, %c0_27], %49 {strides = array<i32>} : memref<1x4x16x128xbf16, #tpu.memory_space<vmem>>, vector<1x4x16x128xbf16>,
    return
  }
  func.func @transform_0(%arg0: i32, %arg1: i32) -> (i32, i32, i32) {
    %c0_i32 = arith.constant 0 : i32
    %c0_i32_0 = arith.constant 0 : i32
    return %arg0, %arg1, %c0_i32 : i32, i32, i32
  }
  func.func @transform_1(%arg0: i32, %arg1: i32) -> (i32, i32) {
    %c0_i32 = arith.constant 0 : i32
    %c0_i32_0 = arith.constant 0 : i32
    %c0_i32_1 = arith.constant 0 : i32
    return %c0_i32, %c0_i32_0 : i32, i32
  }
  func.func @transform_2(%arg0: i32, %arg1: i32) -> (i32, i32) {
    %c0_i32 = arith.constant 0 : i32
    %c0_i32_0 = arith.constant 0 : i32
    %c0_i32_1 = arith.constant 0 : i32
    return %c0_i32, %c0_i32_0 : i32, i32
  }
  func.func @transform_3(%arg0: i32, %arg1: i32) -> (i32, i32) {
    %c0_i32 = arith.constant 0 : i32
    %c0_i32_0 = arith.constant 0 : i32
    %c0_i32_1 = arith.constant 0 : i32
    return %c0_i32, %c0_i32_0 : i32, i32
  }
  func.func @transform_4(%arg0: i32, %arg1: i32) -> (i32, i32) {
    %c0_i32 = arith.constant 0 : i32
    %c0_i32_0 = arith.constant 0 : i32
    %c0_i32_1 = arith.constant 0 : i32
    return %c0_i32, %c0_i32_0 : i32, i32
  }
  func.func @transform_5(%arg0: i32, %arg1: i32) -> (i32, i32, i32, i32) {
    %c0_i32 = arith.constant 0 : i32
    %c0_i32_0 = arith.constant 0 : i32
    %c0_i32_1 = arith.constant 0 : i32
    return %arg0, %c0_i32, %arg1, %c0_i32_0 : i32, i32, i32, i32
  }
  func.func @transform_6(%arg0: i32, %arg1: i32) -> (i32, i32, i32, i32) {
    %c0_i32 = arith.constant 0 : i32
    %c0_i32_0 = arith.constant 0 : i32
    %c0_i32_1 = arith.constant 0 : i32
    return %arg0, %c0_i32, %c0_i32_0, %arg1 : i32, i32, i32, i32
  }
  func.func @transform_7(%arg0: i32, %arg1: i32) -> (i32, i32, i32, i32) {
    %c0_i32 = arith.constant 0 : i32
    %c0_i32_0 = arith.constant 0 : i32
    %c0_i32_1 = arith.constant 0 : i32
    return %arg0, %c0_i32, %arg1, %c0_i32_0 : i32, i32, i32, i32
  }
}

</mosaic_0001>

<bundles_post_ra>
// kernel: tpu_custom_call.1
= control target key start
LH: loop header
LB: loop body
LE: loop exit
PB: predicated region body
PF: predicated region fallthrough
CT: control target
= control target key end

     0   :  { %13 = vsyncpa [#allocation3], 0  ;;  %s8949_s0 = inlined_call_operand.vmem [shape: f32[2,128,32], index: 0, kind: input, shape index: {}]   ;;  %s8950_s1 = inlined_call_operand.vmem [shape: f32[1,32], index: 1, kind: input, shape index: {}]   ;;  %s8951_s2 = inlined_call_operand.vmem [shape: f32[1,32], index: 2, kind: input, shape index: {}]   ;;  %s8952_s3 = inlined_call_operand.vmem [shape: bf16[32,128], index: 3, kind: input, shape index: {}]   ;;  %s8953_s4 = inlined_call_operand.vmem [shape: bf16[64,32], index: 4, kind: input, shape index: {}]   ;;  %s8954_s5 = inlined_call_operand.vmem [shape: bf16[2,4,128,16], index: 5, kind: output, shape index: {0}]   ;;  %s8955_s6 = inlined_call_operand.hbm [shape: bf16[2,4,16,128], index: 6, kind: output, shape index: {1}]   ;;  %s8956_s7 = inlined_call_operand.vmem [shape: bf16[2,4,128,16], index: 7, kind: output, shape index: {2}]  }
   0x1   :  { %15 = vsyncpa [#allocation3 + $0x1], 0  ;;  %s7157_s24 = smov 0   ;;  %s7159_s25 = smov 0  }
   0x2   :  { %s7161_s26 = smov 0   ;;  %s7163_s27 = smov 0  }
   0x3   :  { %s7165_s28 = smov 0   ;;  %s7167_s29 = smov 0  }
   0x4 LB: > { %s6455_s30 = sadd.s32 4294967295, %s7107_s29   ;;  %s6456_s8 = sadd.s32 4294967294, %s7107_s29   ;;  %s7107_s29 = sphi %s7167_s29, %s21_s29   ;;  %s7103_s28 = sphi %s7165_s28, %s8963_s28   ;;  %s7099_s27 = sphi %s7163_s27, %s8962_s27   ;;  %s7095_s26 = sphi %s7161_s26, %s8961_s26   ;;  %s7091_s25 = sphi %s7159_s25, %s8960_s25   ;;  %s7087_s24 = sphi %s7157_s24, %s8959_s24  }
   0x5   : > { %s33_s9 = sadd.s32 1, %s7103_s28  ;;  %s182_s10 = sadd.s32 1, %s7095_s26 }
   0x6   : > { %p35_p0 = scmp.ge.s32.totalorder %s33_s9, 2  ;;  %p192_p1 = scmp.ne.s32.totalorder %s7095_s26, %s7091_s25 }
   0x7   : > { %p193_p2 = scmp.eq.s32.totalorder %s6455_s30, 1  ;;  %p198_p3 = scmp.ne.s32.totalorder %s7091_s25, %s7087_s24 }
   0x8   : > { %s8965_s9 = smov (%p35_p0, %s33_s9), 0  ;;  %p199_p5 = scmp.eq.s32.totalorder %s6456_s8, 1 }
   0x9   : > { %p7197_p4 = por %p193_p2, %p192_p1  ;;  %s177_s12 = ssub.s32 %s7103_s28, %s8965_s9 }
   0xa   : > { %p6459_p6 = scmp.ge.s32.totalorder %s7107_s29, 1  ;;  %p180_p7 = scmp.eq.s32.totalorder %s177_s12, 0 }
   0xb   : > { %p7204_p8 = por %p199_p5, %p198_p3  ;;  %p270_p9 = scmp.lt.s32.totalorder %s7107_s29, 3 }
   0xc   : > { %s7210_s14 = scalar_select %p180_p7, %s7095_s26, %s182_s10  }
   0xd   : > { %p271_p10 = pnand %p6459_p6, %p270_p9 }
   0xe   : > { %p325_p11 = scmp.lt.s32.totalorder (!%p271_p10), %s7099_s27, 1  ;;  %vm371_vm0 = vcmask (!%p271_p10), 261120   ;;  %s7110_s17 = smov (!%p271_p10), 112   ;;  %vm4644_vm1 = vcmask (!%p271_p10), 125952  }
   0xf   : > { %274 = sbr.rel (%p271_p10) target bundleno = 1043 (0x413), region = 40  ;;  %s7111_s18 = smov (!%p271_p10), 80  }
  0x10   : > { %s6831_s12 = sshll.u32 (!%p271_p10), %s7099_s27, 9  ;;  %s7115_s21 = smov (!%p271_p10), [#allocation2]  }
  0x11   : > { %s7033_s22 = sshll.u32 (!%p271_p10), %s7115_s21, 4  ;;  %s7034_s22 = int_to_ptr.vmem [resolvable:$false] %s7033_s22 }
  0x16   : > { %s7214_s15 = scalar_select %p325_p11, %s7099_s27, 1 }
  0x18   : > { %s6692_s16 = sshll.u32 %s7214_s15, 7 }
  0x19   : > { %s7220_s19 = scalar_lea.vmem %s8949_s0, %s6692_s16  ;;  %s7109_s16 = smov 96  }
  0x1a   : > { %v355_v0 = vld [vmem:[%s7220_s19] sm:$0xff]  ;;  %v357_v1 = vld [vmem:[%s7220_s19 + $0x10] sm:$0xff]  ;;  %v356_v2 = vld [vmem:[%s7220_s19 + $0x8] sm:$0xff] }
  0x1b   : > { %v372_v3 = vsel %vm371_vm0, %v355_v0, 0.0  ;;  %v378_v4 = vsel %vm371_vm0, %v357_v1, 0.0  ;;  %v358_v5 = vld [vmem:[%s7220_s19 + $0x18] sm:$0xff]  ;;  %v375_v6 = vsel %vm371_vm0, %v356_v2, 0.0  ;;  %v359_v8 = vld [vmem:[%s7220_s19 + $0x20] sm:$0xff]  ;;  %v360_v9 = vld [vmem:[%s7220_s19 + $0x28] sm:$0xff] }
  0x1c   : > { %373 = vadd.xlane.f32.xlu0 %v372_v3  ;;  %379 = vadd.xlane.f32.xlu1 %v378_v4  ;;  %v381_v7 = vsel %vm371_vm0, %v358_v5, 0.0  ;;  %v384_v10 = vsel %vm371_vm0, %v359_v8, 0.0  ;;  %v387_v11 = vsel %vm371_vm0, %v360_v9, 0.0  ;;  %v7235_v12 = vld [vmem:[%s7220_s19 + $0x30] sm:$0xff]  ;;  %v7238_v13 = vld [vmem:[%s7220_s19 + $0x38] sm:$0xff]  ;;  %v7245_v16 = vld [vmem:[%s7220_s19 + $0x40] sm:$0xff] }
  0x1d   : > { %v390_v14 = vsel %vm371_vm0, %v7235_v12, 0.0  ;;  %v393_v15 = vsel %vm371_vm0, %v7238_v13, 0.0  ;;  %v7248_v17 = vld [vmem:[%s7220_s19 + $0x48] sm:$0xff]  ;;  %v396_v18 = vsel %vm371_vm0, %v7245_v16, 0.0  ;;  %v7255_v20 = vld [vmem:[%s7220_s19 + $0x50] sm:$0xff]  ;;  %v7258_v21 = vld [vmem:[%s7220_s19 + $0x58] sm:$0xff] }
  0x1e   : > { %v399_v19 = vsel %vm371_vm0, %v7248_v17, 0.0  ;;  %v402_v22 = vsel %vm371_vm0, %v7255_v20, 0.0  ;;  %v405_v23 = vsel %vm371_vm0, %v7258_v21, 0.0  ;;  %v7265_v24 = vld [vmem:[%s7220_s19 + $0x60] sm:$0xff]  ;;  %v7268_v25 = vld [vmem:[%s7220_s19 + $0x68] sm:$0xff]  ;;  %v7275_v28 = vld [vmem:[%s7220_s19 + $0x70] sm:$0xff] }
  0x1f   : > { %v408_v26 = vsel %vm371_vm0, %v7265_v24, 0.0  ;;  %v411_v27 = vsel %vm371_vm0, %v7268_v25, 0.0  ;;  %v7278_v29 = vld [vmem:[%s7220_s19 + $0x78] sm:$0xff]  ;;  %v414_v30 = vsel %vm371_vm0, %v7275_v28, 0.0  ;;  %s7112_s19 = smov 64  }
  0x20   : > { %376 = vadd.xlane.f32.xlu0 %v375_v6  ;;  %382 = vadd.xlane.f32.xlu1 %v381_v7  ;;  %v417_v31 = vsel %vm371_vm0, %v7278_v29, 0.0 }
  0x24   : > { %385 = vadd.xlane.f32.xlu0 %v384_v10  ;;  %388 = vadd.xlane.f32.xlu1 %v387_v11 }
  0x28   : > { %391 = vadd.xlane.f32.xlu0 %v390_v14  ;;  %394 = vadd.xlane.f32.xlu1 %v393_v15 }
  0x2c   : > { %397 = vadd.xlane.f32.xlu0 %v396_v18  ;;  %400 = vadd.xlane.f32.xlu1 %v399_v19 }
  0x30   : > { %403 = vadd.xlane.f32.xlu0 %v402_v22  ;;  %406 = vadd.xlane.f32.xlu1 %v405_v23 }
  0x34   : > { %409 = vadd.xlane.f32.xlu0 %v408_v26  ;;  %412 = vadd.xlane.f32.xlu1 %v411_v27 }
  0x38   : > { %415 = vadd.xlane.f32.xlu0 %v414_v30  ;;  %418 = vadd.xlane.f32.xlu1 %v417_v31 }
  0xa9   : > { %v374_v32 = vpop.xlane.xlu0 %373  ;;  %v380_v33 = vpop.xlane.xlu1 %379 }
  0xaa   : > { %v421_v34 = vmul.f32 0.03125, %v374_v32  ;;  %v423_v35 = vmul.f32 0.03125, %v380_v33 }
  0xac   : > { %v7284_v36 = vsub.f32 %v355_v0, %v421_v34  ;;  %v7286_v37 = vsub.f32 %v357_v1, %v423_v35 }
  0xad   : > { %v377_v38 = vpop.xlane.xlu0 %376  ;;  %v383_v39 = vpop.xlane.xlu1 %382 }
  0xae   : > { %v422_v40 = vmul.f32 0.03125, %v377_v38  ;;  %v424_v41 = vmul.f32 0.03125, %v383_v39  ;;  %v453_v42 = vmul.f32 %v7284_v36, %v7284_v36  ;;  %v455_v43 = vmul.f32 %v7286_v37, %v7286_v37 }
  0xb0   : > { %v7292_v44 = vsub.f32 %v356_v2, %v422_v40  ;;  %v7294_v45 = vsub.f32 %v358_v5, %v424_v41  ;;  %v469_v46 = vsel %vm371_vm0, %v453_v42, 0.0  ;;  %v475_v49 = vsel %vm371_vm0, %v455_v43, 0.0 }
  0xb1   : > { %470 = vadd.xlane.f32.xlu0 %v469_v46  ;;  %v386_v47 = vpop.xlane.xlu0 %385  ;;  %v389_v48 = vpop.xlane.xlu1 %388 }
  0xb2   : > { %v425_v50 = vmul.f32 0.03125, %v386_v47  ;;  %v426_v51 = vmul.f32 0.03125, %v389_v48  ;;  %v454_v52 = vmul.f32 %v7292_v44, %v7292_v44  ;;  %v456_v53 = vmul.f32 %v7294_v45, %v7294_v45 }
  0xb4   : > { %v7302_v54 = vsub.f32 %v359_v8, %v425_v50  ;;  %v7304_v55 = vsub.f32 %v360_v9, %v426_v51  ;;  %v472_v56 = vsel %vm371_vm0, %v454_v52, 0.0  ;;  %v478_v59 = vsel %vm371_vm0, %v456_v53, 0.0  ;;  %v6992_v53 = vld [vmem:[%s8952_s3 + $0x8] sm:$0xff]  }
  0xb5   : > { %476 = vadd.xlane.f32.xlu0 %v475_v49  ;;  %473 = vadd.xlane.f32.xlu1 %v472_v56  ;;  %v392_v57 = vpop.xlane.xlu0 %391  ;;  %v395_v58 = vpop.xlane.xlu1 %394 }
  0xb6   : > { %v427_v60 = vmul.f32 0.03125, %v392_v57  ;;  %v428_v61 = vmul.f32 0.03125, %v395_v58  ;;  %v457_v62 = vmul.f32 %v7302_v54, %v7302_v54  ;;  %v458_v63 = vmul.f32 %v7304_v55, %v7304_v55 }
  0xb8   : > { %v7313_v0 = vsub.f32 %v7235_v12, %v427_v60  ;;  %v7316_v1 = vsub.f32 %v7238_v13, %v428_v61  ;;  %v481_v2 = vsel %vm371_vm0, %v457_v62, 0.0  ;;  %v484_v5 = vsel %vm371_vm0, %v458_v63, 0.0 }
  0xb9   : > { %479 = vadd.xlane.f32.xlu1 %v478_v59  ;;  %482 = vadd.xlane.f32.xlu0 %v481_v2  ;;  %v398_v3 = vpop.xlane.xlu0 %397  ;;  %v401_v4 = vpop.xlane.xlu1 %400 }
  0xba   : > { %v429_v6 = vmul.f32 0.03125, %v398_v3  ;;  %v430_v7 = vmul.f32 0.03125, %v401_v4  ;;  %v459_v8 = vmul.f32 %v7313_v0, %v7313_v0  ;;  %v460_v9 = vmul.f32 %v7316_v1, %v7316_v1 }
  0xbc   : > { %v7325_v10 = vsub.f32 %v7245_v16, %v429_v6  ;;  %v7328_v11 = vsub.f32 %v7248_v17, %v430_v7  ;;  %v487_v12 = vsel %vm371_vm0, %v459_v8, 0.0  ;;  %v490_v15 = vsel %vm371_vm0, %v460_v9, 0.0 }
  0xbd   : > { %485 = vadd.xlane.f32.xlu1 %v484_v5  ;;  %488 = vadd.xlane.f32.xlu0 %v487_v12  ;;  %v404_v13 = vpop.xlane.xlu0 %403  ;;  %v407_v14 = vpop.xlane.xlu1 %406 }
  0xbe   : > { %v431_v18 = vmul.f32 0.03125, %v404_v13  ;;  %v432_v19 = vmul.f32 0.03125, %v407_v14  ;;  %v461_v22 = vmul.f32 %v7325_v10, %v7325_v10  ;;  %v462_v16 = vmul.f32 %v7328_v11, %v7328_v11 }
  0xc0   : > { %v7337_v23 = vsub.f32 %v7255_v20, %v431_v18  ;;  %v7340_v17 = vsub.f32 %v7258_v21, %v432_v19  ;;  %v493_v26 = vsel %vm371_vm0, %v461_v22, 0.0  ;;  %v496_v31 = vsel %vm371_vm0, %v462_v16, 0.0 }
  0xc1   : > { %491 = vadd.xlane.f32.xlu1 %v490_v15  ;;  %494 = vadd.xlane.f32.xlu0 %v493_v26  ;;  %v410_v27 = vpop.xlane.xlu0 %409  ;;  %v413_v30 = vpop.xlane.xlu1 %412 }
  0xc2   : > { %v433_v32 = vmul.f32 0.03125, %v410_v27  ;;  %v434_v33 = vmul.f32 0.03125, %v413_v30  ;;  %v463_v34 = vmul.f32 %v7337_v23, %v7337_v23  ;;  %v464_v20 = vmul.f32 %v7340_v17, %v7340_v17 }
  0xc4   : > { %v7349_v35 = vsub.f32 %v7265_v24, %v433_v32  ;;  %v7352_v21 = vsub.f32 %v7268_v25, %v434_v33  ;;  %v499_v38 = vsel %vm371_vm0, %v463_v34, 0.0  ;;  %v502_v41 = vsel %vm371_vm0, %v464_v20, 0.0 }
  0xc5   : > { %497 = vadd.xlane.f32.xlu1 %v496_v31  ;;  %500 = vadd.xlane.f32.xlu0 %v499_v38  ;;  %v416_v39 = vpop.xlane.xlu0 %415  ;;  %v419_v40 = vpop.xlane.xlu1 %418  ;;  %v7384_v31 = vld [vmem:[%s8950_s1] ss:$0 sm:$0xff] }
  0xc6   : > { %v435_v42 = vmul.f32 0.03125, %v416_v39  ;;  %v436_v43 = vmul.f32 0.03125, %v419_v40  ;;  %v465_v46 = vmul.f32 %v7349_v35, %v7349_v35  ;;  %v466_v24 = vmul.f32 %v7352_v21, %v7352_v21 }
  0xc8   : > { %v7361_v47 = vsub.f32 %v7275_v28, %v435_v42  ;;  %v7364_v25 = vsub.f32 %v7278_v29, %v436_v43  ;;  %v505_v48 = vsel %vm371_vm0, %v465_v46, 0.0  ;;  %v508_v49 = vsel %vm371_vm0, %v466_v24, 0.0  ;;  %v6991_v29 = vld [vmem:[%s8952_s3] sm:$0xff]  }
  0xc9   : > { %503 = vadd.xlane.f32.xlu1 %v502_v41  ;;  %506 = vadd.xlane.f32.xlu0 %v505_v48  ;;  %v7391_v43 = vld [vmem:[%s8951_s2] ss:$0 sm:$0xff] }
  0xca   : > { %v467_v50 = vmul.f32 %v7361_v47, %v7361_v47  ;;  %v468_v51 = vmul.f32 %v7364_v25, %v7364_v25  ;;  %6877 = vmatprep.subr.bf16.mxu0 %v6991_v29 }
  0xcb   : > { %6878 = vmatpush3.bf16.msra.mxu0 %v6991_v29 }
  0xcc   : > { %v511_v52 = vsel %vm371_vm0, %v467_v50, 0.0  ;;  %v514_v28 = vsel %vm371_vm0, %v468_v51, 0.0  ;;  %6879 = vmatprep.subr.bf16.mxu0 %v6992_v53 }
  0xcd   : > { %509 = vadd.xlane.f32.xlu1 %v508_v49  ;;  %512 = vadd.xlane.f32.xlu0 %v511_v52 }
  0xcf   : > { %6880 = vmatpush3.bf16.msra.mxu0 %v6992_v53 }
  0xd1   : > { %515 = vadd.xlane.f32.xlu1 %v514_v28 }
 0x13e   : > { %v471_v56 = vpop.xlane.xlu0 %470 }
 0x13f   : > { %v517_v57 = vmul.f32 0.03125, %v471_v56 }
 0x141   : > { %v533_v58 = vadd.f32 1e-05, %v517_v57 }
 0x142   : > { %v474_v59 = vpop.xlane.xlu1 %473  ;;  %v477_v60 = vpop.xlane.xlu0 %476 }
 0x143   : > { %6997 = vrsqrt.f32 %v533_v58  ;;  %v518_v61 = vmul.f32 0.03125, %v474_v59  ;;  %v519_v62 = vmul.f32 0.03125, %v477_v60 }
 0x145   : > { %v534_v63 = vadd.f32 1e-05, %v518_v61  ;;  %v535_v2 = vadd.f32 1e-05, %v519_v62 }
 0x146   : > { %v480_v3 = vpop.xlane.xlu1 %479  ;;  %v483_v4 = vpop.xlane.xlu0 %482 }
 0x147   : > { %6999 = vrsqrt.f32 %v534_v63  ;;  %v520_v5 = vmul.f32 0.03125, %v480_v3  ;;  %v521_v6 = vmul.f32 0.03125, %v483_v4 }
 0x148   : > { %7001 = vrsqrt.f32 %v535_v2 }
 0x149   : > { %v536_v7 = vadd.f32 1e-05, %v520_v5  ;;  %v537_v8 = vadd.f32 1e-05, %v521_v6 }
 0x14a   : > { %v486_v9 = vpop.xlane.xlu1 %485  ;;  %v489_v12 = vpop.xlane.xlu0 %488 }
 0x14b   : > { %7003 = vrsqrt.f32 %v536_v7  ;;  %v522_v13 = vmul.f32 0.03125, %v486_v9  ;;  %v523_v14 = vmul.f32 0.03125, %v489_v12 }
 0x14c   : > { %7005 = vrsqrt.f32 %v537_v8 }
 0x14d   : > { %v6998_v15 = vpop.eup %6997  ;;  %v538_v18 = vadd.f32 1e-05, %v522_v13  ;;  %v539_v19 = vadd.f32 1e-05, %v523_v14 }
 0x14e   : > { %v492_v22 = vpop.xlane.xlu1 %491  ;;  %v495_v16 = vpop.xlane.xlu0 %494  ;;  %v565_v26 = vmul.f32 %v6998_v15, %v7284_v36 }
 0x14f   : > { %7007 = vrsqrt.f32 %v538_v18  ;;  %v524_v27 = vmul.f32 0.03125, %v492_v22  ;;  %v525_v30 = vmul.f32 0.03125, %v495_v16 }
 0x150   : > { %7009 = vrsqrt.f32 %v539_v19  ;;  %v588_v41 = vmul.f32 %v7384_v31, %v565_v26 }
 0x151   : > { %v7000_v32 = vpop.eup %6999  ;;  %v540_v33 = vadd.f32 1e-05, %v524_v27  ;;  %v541_v34 = vadd.f32 1e-05, %v525_v30 }
 0x152   : > { %v7002_v20 = vpop.eup %7001  ;;  %v498_v38 = vpop.xlane.xlu1 %497  ;;  %v566_v40 = vmul.f32 %v7000_v32, %v7292_v44  ;;  %v611_v29 = vadd.f32 %v7391_v43, %v588_v41 }
 0x153   : > { %v501_v39 = vpop.xlane.xlu0 %500  ;;  %7011 = vrsqrt.f32 %v540_v33  ;;  %v526_v36 = vmul.f32 0.03125, %v498_v38  ;;  %v567_v46 = vmul.f32 %v7002_v20, %v7286_v37 }
 0x154   : > { %v527_v42 = vmul.f32 0.03125, %v501_v39  ;;  %7013 = vrsqrt.f32 %v541_v34  ;;  %v589_v24 = vmul.f32 %v7384_v31, %v566_v40 }
 0x155   : > { %v7004_v48 = vpop.eup %7003  ;;  %v542_v49 = vadd.f32 1e-05, %v526_v36  ;;  %v590_v44 = vmul.f32 %v7384_v31, %v567_v46 }
 0x156   : > { %v543_v50 = vadd.f32 1e-05, %v527_v42  ;;  %v7006_v51 = vpop.eup %7005  ;;  %v504_v52 = vpop.xlane.xlu1 %503  ;;  %v612_v53 = vadd.f32 %v7391_v43, %v589_v24  ;;  %v568_v56 = vmul.f32 %v7004_v48, %v7294_v45 }
 0x157   : > { %v507_v28 = vpop.xlane.xlu0 %506  ;;  %7015 = vrsqrt.f32 %v542_v49  ;;  %v528_v57 = vmul.f32 0.03125, %v504_v52  ;;  %v569_v60 = vmul.f32 %v7006_v51, %v7302_v54  ;;  %v613_v2 = vadd.f32 %v7391_v43, %v590_v44 }
 0x158   : > { %v529_v37 = vmul.f32 0.03125, %v507_v28  ;;  %7017 = vrsqrt.f32 %v543_v50  ;;  %v627_v58 = vpack.c.bf16 %v612_v53, %v611_v29  ;;  %v591_v59 = vmul.f32 %v7384_v31, %v568_v56 }
 0x159   : > { %v7008_v61 = vpop.eup %7007  ;;  %v544_v62 = vadd.f32 1e-05, %v528_v57  ;;  %v592_v54 = vmul.f32 %v7384_v31, %v569_v60 }
 0x15a   : > { %v545_v63 = vadd.f32 1e-05, %v529_v37  ;;  %v7010_v3 = vpop.eup %7009  ;;  %v510_v4 = vpop.xlane.xlu1 %509  ;;  %6881 = vmatprep.mubr.msk.bf16.mxu0 %vm371_vm0, %v627_v58  ;;  %6921 = vmatprep.subr.msk.bf16.mxu1 %vm371_vm0, %v627_v58  ;;  %v652_v5 = vsel %vm371_vm0, %v627_v58, 0  ;;  %v614_v6 = vadd.f32 %v7391_v43, %v591_v59  ;;  %v570_v7 = vmul.f32 %v7008_v61, %v7304_v55 }
 0x15b   : > { %v513_v45 = vpop.xlane.xlu0 %512  ;;  %7019 = vrsqrt.f32 %v544_v62  ;;  %v530_v8 = vmul.f32 0.03125, %v510_v4  ;;  %6898 = vmatpush3.bf16.xpose.msra.mxu1 %v652_v5  ;;  %v571_v12 = vmul.f32 %v7010_v3, %v7313_v0  ;;  %v615_v22 = vadd.f32 %v7391_v43, %v592_v54 }
 0x15c   : > { %v531_v9 = vmul.f32 0.03125, %v513_v45  ;;  %7021 = vrsqrt.f32 %v545_v63  ;;  %v628_v13 = vpack.c.bf16 %v614_v6, %v613_v2  ;;  %v593_v14 = vmul.f32 %v7384_v31, %v570_v7 }
 0x15d   : > { %v7012_v15 = vpop.eup %7011  ;;  %v546_v18 = vadd.f32 1e-05, %v530_v8  ;;  %v594_v0 = vmul.f32 %v7384_v31, %v571_v12 }
 0x15e   : > { %v547_v19 = vadd.f32 1e-05, %v531_v9  ;;  %v7014_v16 = vpop.eup %7013  ;;  %v516_v26 = vpop.xlane.xlu1 %515  ;;  %6882 = vmatmul.mubr.msk.bf16.vlgmr.msra.gmra.mrb[0].mxu0 %vm371_vm0, %v628_v13  ;;  %6922 = vmatprep.subr.msk.bf16.mxu1 %vm371_vm0, %v628_v13  ;;  %v616_v55 = vadd.f32 %v7391_v43, %v593_v14  ;;  %v572_v27 = vmul.f32 %v7012_v15, %v7316_v1  ;;  %v655_v39 = vsel %vm371_vm0, %v628_v13, 0 }
 0x15f   : > { %7023 = vrsqrt.f32 %v546_v18  ;;  %v532_v30 = vmul.f32 0.03125, %v516_v26  ;;  %v573_v32 = vmul.f32 %v7014_v16, %v7325_v10  ;;  %v617_v41 = vadd.f32 %v7391_v43, %v594_v0 }
 0x160   : > { %7025 = vrsqrt.f32 %v547_v19  ;;  %v629_v33 = vpack.c.bf16 %v616_v55, %v615_v22  ;;  %v595_v34 = vmul.f32 %v7384_v31, %v572_v27 }
 0x161   : > { %v7016_v20 = vpop.eup %7015  ;;  %v548_v38 = vadd.f32 1e-05, %v532_v30  ;;  %v596_v42 = vmul.f32 %v7384_v31, %v573_v32  ;;  %v6993_v32 = vld [vmem:[%s8953_s4] sm:$0xff]  }
 0x162   : > { %v7018_v40 = vpop.eup %7017  ;;  %6885 = vmatprep.mubr.msk.bf16.mxu0 %vm371_vm0, %v629_v33  ;;  %v618_v1 = vadd.f32 %v7391_v43, %v595_v34  ;;  %v574_v36 = vmul.f32 %v7016_v20, %v7328_v11  ;;  %v658_v53 = vsel %vm371_vm0, %v629_v33, 0  ;;  %6913 = vmatprep.mubr.msk.bf16.mxu1 %vm371_vm0, %v6993_v32  ;;  %v6995_v34 = vld [vmem:[%s8953_s4 + $0x10] sm:$0xff]   ;;  %v6996_v20 = vld [vmem:[%s8953_s4 + $0x18] sm:$0xff]  }
 0x163   : > { %7027 = vrsqrt.f32 %v548_v38  ;;  %6900 = vmatpush3.bf16.xpose.msra.mxu1 %v655_v39  ;;  %v575_v10 = vmul.f32 %v7018_v40, %v7337_v23  ;;  %v619_v50 = vadd.f32 %v7391_v43, %v596_v42  ;;  %v7113_v38 = vmov 1983009808  }
 0x164   : > { %6923 = vmatprep.subr.msk.bf16.mxu1 %vm371_vm0, %v629_v33  ;;  %v630_v46 = vpack.c.bf16 %v618_v1, %v617_v41  ;;  %v597_v24 = vmul.f32 %v7384_v31, %v574_v36  ;;  %v6994_v33 = vld [vmem:[%s8953_s4 + $0x8] sm:$0xff]   ;;  %v935_v39 = vunpack.c.l.s4 %v7113_v38  ;;  %v937_v40 = vlaneseq }
 0x165   : > { %v7020_v48 = vpop.eup %7019  ;;  %v598_v51 = vmul.f32 %v7384_v31, %v575_v10  ;;  %v7114_v41 = vmov 1934713408  }
 0x166   : > { %v7022_v49 = vpop.eup %7021  ;;  %6886 = vmatmul.mubr.msk.bf16.gmra.mrb[4].mxu0 %vm371_vm0, %v630_v46  ;;  %v620_v44 = vadd.f32 %v7391_v43, %v597_v24  ;;  %v576_v11 = vmul.f32 %v7020_v48, %v7340_v17  ;;  %v967_v1 = vunpack.c.l.s4 %v7114_v41  ;;  %v936_v36 = vunpack.c.0.s8 %v935_v39 }
 0x167   : > { %v577_v52 = vmul.f32 %v7022_v49, %v7349_v35  ;;  %v621_v57 = vadd.f32 %v7391_v43, %v598_v51  ;;  %v938_v42 = vshrl.u32 %v937_v40, 7 }
 0x168   : > { %v631_v23 = vpack.c.bf16 %v620_v44, %v619_v50  ;;  %v599_v28 = vmul.f32 %v7384_v31, %v576_v11  ;;  %v968_v24 = vunpack.c.0.s8 %v967_v1 }
 0x169   : > { %v7024_v29 = vpop.eup %7023  ;;  %v600_v17 = vmul.f32 %v7384_v31, %v577_v52  ;;  %v7630_v48 = vsub.s32 %v936_v36, %v938_v42 }
 0x16a   : > { %v7026_v56 = vpop.eup %7025  ;;  %6889 = vmatprep.mubr.msk.bf16.mxu0 %vm371_vm0, %v631_v23  ;;  %v622_v37 = vadd.f32 %v7391_v43, %v599_v28  ;;  %v578_v58 = vmul.f32 %v7024_v29, %v7352_v21 }
 0x16b   : > { %6902 = vmatpush3.bf16.xpose.msra.mxu1 %v658_v53  ;;  %v579_v35 = vmul.f32 %v7026_v56, %v7361_v47  ;;  %v623_v62 = vadd.f32 %v7391_v43, %v600_v17  ;;  %v661_v47 = vsel %vm371_vm0, %v630_v46, 0 }
 0x16c   : > { %6924 = vmatprep.subr.msk.bf16.mxu1 %vm371_vm0, %v630_v46  ;;  %v632_v59 = vpack.c.bf16 %v622_v37, %v621_v57  ;;  %v601_v60 = vmul.f32 %v7384_v31, %v578_v58 }
 0x16d   : > { %v7028_v61 = vpop.eup %7027  ;;  %v602_v21 = vmul.f32 %v7384_v31, %v579_v35 }
 0x16e   : > { %6890 = vmatmul.mubr.msk.bf16.gmra.mrb[8].mxu0 %vm371_vm0, %v632_v59  ;;  %v624_v63 = vadd.f32 %v7391_v43, %v601_v60  ;;  %v580_v2 = vmul.f32 %v7028_v61, %v7364_v25  ;;  %v664_v25 = vsel %vm371_vm0, %v631_v23, 0 }
 0x16f   : > { %v625_v45 = vadd.f32 %v7391_v43, %v602_v21 }
 0x170   : > { %v633_v3 = vpack.c.bf16 %v624_v63, %v623_v62  ;;  %v603_v4 = vmul.f32 %v7384_v31, %v580_v2  ;;  %v667_v31 = vsel %vm371_vm0, %v632_v59, 0 }
 0x172   : > { %6893 = vmatprep.mubr.msk.bf16.mxu0 %vm371_vm0, %v633_v3  ;;  %v626_v5 = vadd.f32 %v7391_v43, %v603_v4  ;;  %v670_v7 = vsel %vm371_vm0, %v633_v3, 0 }
 0x173   : > { %6904 = vmatpush3.bf16.xpose.msra.mxu1 %v661_v47 }
 0x174   : > { %6925 = vmatprep.subr.msk.bf16.mxu1 %vm371_vm0, %v631_v23  ;;  %v634_v6 = vpack.c.bf16 %v626_v5, %v625_v45  ;;  %v7634_v23 = vsub.s32 %v968_v24, %v938_v42 }
 0x176   : > { %6894 = vmatmul.mubr.msk.bf16.gmra.mrb[12].mxu0 %vm371_vm0, %v634_v6  ;;  %v673_v43 = vsel %vm371_vm0, %v634_v6, 0 }
 0x17b   : > { %6906 = vmatpush3.bf16.xpose.msra.mxu1 %v664_v25 }
 0x17c   : > { %6926 = vmatprep.subr.msk.bf16.mxu1 %vm371_vm0, %v632_v59 }
 0x183   : > { %6908 = vmatpush3.bf16.xpose.msra.mxu1 %v667_v31 }
 0x184   : > { %6927 = vmatprep.subr.msk.bf16.mxu1 %vm371_vm0, %v633_v3 }
 0x18b   : > { %6910 = vmatpush3.bf16.xpose.msra.mxu1 %v670_v7 }
 0x18c   : > { %6928 = vmatprep.subr.msk.bf16.mxu1 %vm371_vm0, %v634_v6 }
 0x193   : > { %6912 = vmatpush3.bf16.xpose.msra.mxu1 %v673_v43 }
 0x19a   : > { %6914 = vmatmul.mubr.msk.bf16.vlgmr.msra.gmra.mrb[0].mxu1 %vm371_vm0, %v6994_v33 }
 0x19b   : > { %6917 = vmatprep.mubr.msk.bf16.mxu1 %vm371_vm0, %v6995_v34 }
 0x1a2   : > { %6918 = vmatmul.mubr.msk.bf16.gmra.mrb[4].mxu1 %vm371_vm0, %v6996_v20 }
 0x231   : > { %v7462_v54 = vpop.f32.mrb[0].mxu0 }
 0x232   : > { %840 = vrot.lane.b32.xlu0 %v7462_v54, %s7109_s16  ;;  %792 = vrot.lane.b32.xlu1 %v7462_v54, %s7110_s17  ;;  %v7468_v8 = vpop.f32.mrb[1].mxu0 }
 0x233   : > { %v7470_v9 = vpop.f32.mrb[2].mxu0 }
 0x234   : > { %v7472_v12 = vpop.f32.mrb[3].mxu0 }
 0x236   : > { %888 = vrot.lane.b32.xlu0 %v7462_v54, %s7111_s18  ;;  %794 = vrot.lane.b32.xlu1 %v7470_v9, %s7110_s17 }
 0x239   : > { %v7478_v13 = vpop.f32.mrb[4].mxu0 }
 0x23a   : > { %2024 = vrot.lane.b32.xlu0 %v7462_v54, %s7112_s19  ;;  %842 = vrot.lane.b32.xlu1 %v7470_v9, %s7109_s16  ;;  %v7484_v14 = vpop.f32.mrb[5].mxu0 }
 0x23b   : > { %v7486_v15 = vpop.f32.mrb[6].mxu0 }
 0x23c   : > { %v7488_v18 = vpop.f32.mrb[7].mxu0 }
 0x23e   : > { %788 = vrot.lane.b32.xlu0 %v7468_v8, %s7110_s17  ;;  %890 = vrot.lane.b32.xlu1 %v7470_v9, %s7111_s18 }
 0x241   : > { %v7494_v19 = vpop.f32.mrb[8].mxu0 }
 0x242   : > { %836 = vrot.lane.b32.xlu0 %v7468_v8, %s7109_s16  ;;  %2026 = vrot.lane.b32.xlu1 %v7470_v9, %s7112_s19  ;;  %v7500_v22 = vpop.f32.mrb[9].mxu0 }
 0x243   : > { %v7502_v16 = vpop.f32.mrb[10].mxu0 }
 0x244   : > { %v7504_v26 = vpop.f32.mrb[11].mxu0 }
 0x246   : > { %884 = vrot.lane.b32.xlu0 %v7468_v8, %s7111_s18  ;;  %790 = vrot.lane.b32.xlu1 %v7472_v12, %s7110_s17 }
 0x249   : > { %v7510_v55 = vpop.f32.mrb[12].mxu0 }
 0x24a   : > { %2020 = vrot.lane.b32.xlu0 %v7468_v8, %s7112_s19  ;;  %838 = vrot.lane.b32.xlu1 %v7472_v12, %s7109_s16  ;;  %v7516_v27 = vpop.f32.mrb[13].mxu0 }
 0x24b   : > { %v7518_v0 = vpop.f32.mrb[14].mxu0 }
 0x24c   : > { %v7520_v30 = vpop.f32.mrb[15].mxu0 }
 0x24e   : > { %886 = vrot.lane.b32.xlu1 %v7472_v12, %s7111_s18  ;;  %800 = vrot.lane.b32.xlu0 %v7478_v13, %s7110_s17 }
 0x252   : > { %2022 = vrot.lane.b32.xlu1 %v7472_v12, %s7112_s19  ;;  %848 = vrot.lane.b32.xlu0 %v7478_v13, %s7109_s16 }
 0x256   : > { %896 = vrot.lane.b32.xlu0 %v7478_v13, %s7111_s18  ;;  %802 = vrot.lane.b32.xlu1 %v7486_v15, %s7110_s17 }
 0x25a   : > { %2032 = vrot.lane.b32.xlu0 %v7478_v13, %s7112_s19  ;;  %850 = vrot.lane.b32.xlu1 %v7486_v15, %s7109_s16 }
 0x25e   : > { %796 = vrot.lane.b32.xlu0 %v7484_v14, %s7110_s17  ;;  %898 = vrot.lane.b32.xlu1 %v7486_v15, %s7111_s18 }
 0x262   : > { %844 = vrot.lane.b32.xlu0 %v7484_v14, %s7109_s16  ;;  %2034 = vrot.lane.b32.xlu1 %v7486_v15, %s7112_s19 }
 0x266   : > { %892 = vrot.lane.b32.xlu0 %v7484_v14, %s7111_s18  ;;  %798 = vrot.lane.b32.xlu1 %v7488_v18, %s7110_s17 }
 0x26a   : > { %2028 = vrot.lane.b32.xlu0 %v7484_v14, %s7112_s19  ;;  %846 = vrot.lane.b32.xlu1 %v7488_v18, %s7109_s16 }
 0x26e   : > { %894 = vrot.lane.b32.xlu1 %v7488_v18, %s7111_s18  ;;  %808 = vrot.lane.b32.xlu0 %v7494_v19, %s7110_s17 }
 0x272   : > { %2030 = vrot.lane.b32.xlu1 %v7488_v18, %s7112_s19  ;;  %856 = vrot.lane.b32.xlu0 %v7494_v19, %s7109_s16 }
 0x276   : > { %904 = vrot.lane.b32.xlu0 %v7494_v19, %s7111_s18  ;;  %810 = vrot.lane.b32.xlu1 %v7502_v16, %s7110_s17 }
 0x27a   : > { %2040 = vrot.lane.b32.xlu0 %v7494_v19, %s7112_s19  ;;  %858 = vrot.lane.b32.xlu1 %v7502_v16, %s7109_s16 }
 0x27e   : > { %804 = vrot.lane.b32.xlu0 %v7500_v22, %s7110_s17  ;;  %906 = vrot.lane.b32.xlu1 %v7502_v16, %s7111_s18 }
 0x282   : > { %852 = vrot.lane.b32.xlu0 %v7500_v22, %s7109_s16  ;;  %2042 = vrot.lane.b32.xlu1 %v7502_v16, %s7112_s19 }
 0x286   : > { %900 = vrot.lane.b32.xlu0 %v7500_v22, %s7111_s18  ;;  %806 = vrot.lane.b32.xlu1 %v7504_v26, %s7110_s17 }
 0x28a   : > { %2036 = vrot.lane.b32.xlu0 %v7500_v22, %s7112_s19  ;;  %854 = vrot.lane.b32.xlu1 %v7504_v26, %s7109_s16 }
 0x28e   : > { %902 = vrot.lane.b32.xlu1 %v7504_v26, %s7111_s18  ;;  %816 = vrot.lane.b32.xlu0 %v7510_v55, %s7110_s17 }
 0x292   : > { %2038 = vrot.lane.b32.xlu1 %v7504_v26, %s7112_s19  ;;  %864 = vrot.lane.b32.xlu0 %v7510_v55, %s7109_s16 }
 0x296   : > { %912 = vrot.lane.b32.xlu0 %v7510_v55, %s7111_s18  ;;  %818 = vrot.lane.b32.xlu1 %v7518_v0, %s7110_s17 }
 0x29a   : > { %2048 = vrot.lane.b32.xlu0 %v7510_v55, %s7112_s19  ;;  %866 = vrot.lane.b32.xlu1 %v7518_v0, %s7109_s16 }
 0x29e   : > { %812 = vrot.lane.b32.xlu0 %v7516_v27, %s7110_s17  ;;  %914 = vrot.lane.b32.xlu1 %v7518_v0, %s7111_s18 }
 0x2a2   : > { %860 = vrot.lane.b32.xlu0 %v7516_v27, %s7109_s16  ;;  %2050 = vrot.lane.b32.xlu1 %v7518_v0, %s7112_s19 }
 0x2a4   : > { %v793_v10 = vpop.permute.xlu1 %792  ;;  %v841_v46 = vpop.permute.xlu0 %840 }
 0x2a5   : > { %v1068_v49 = vcombine.low %v7462_v54, %v841_v46  ;;  %v1069_v50 = vcombine.high %v7462_v54, %v841_v46 }
 0x2a6   : > { %908 = vrot.lane.b32.xlu0 %v7516_v27, %s7111_s18  ;;  %814 = vrot.lane.b32.xlu1 %v7520_v30, %s7110_s17  ;;  %s8885_s17 = scalar_lea.hbm %s8955_s6, %s6831_s12 }
 0x2a7   : > { %v1076_v28 = vrot.slane %v1068_v49, %v7630_v48  ;;  %v1083_v29 = vrot.slane %v1069_v50, %v7630_v48 }
 0x2a8   : > { %v795_v44 = vpop.permute.xlu1 %794  ;;  %v889_v11 = vpop.permute.xlu0 %888 }
 0x2a9   : > { %v1084_v51 = vcombine.low %v793_v10, %v889_v11  ;;  %v1085_v52 = vcombine.high %v793_v10, %v889_v11 }
 0x2aa   : > { %2044 = vrot.lane.b32.xlu0 %v7516_v27, %s7112_s19  ;;  %862 = vrot.lane.b32.xlu1 %v7520_v30, %s7109_s16  ;;  %s6693_s16 = sshll.u32 %s7214_s15, 8  ;;  %s310_s15 = sand.u32 1, %s7091_s25  }
 0x2ab   : > { %v1092_v53 = vrot.slane %v1084_v51, %v7630_v48  ;;  %v1099_v56 = vrot.slane %v1085_v52, %v7630_v48  ;;  %s7696_s20 = scalar_lea.vmem %s8954_s5, %s6693_s16  ;;  %s8391_s23 = scalar_lea.vmem %s8956_s7, %s6693_s16 }
 0x2ac   : > { %v7644_v57 = vpop.permute.xlu1 %842  ;;  %v7646_v37 = vpop.permute.xlu0 %2024  ;;  %s6460_s30 = sshll.u32 %s310_s15, 5 }
 0x2ad   : > { %v1100_v58 = vcombine.low %v1076_v28, %v1092_v53  ;;  %v1101_v17 = vcombine.high %v1076_v28, %v1092_v53  ;;  %v1116_v35 = vcombine.low %v1083_v29, %v1099_v56  ;;  %v1117_v59 = vcombine.high %v1083_v29, %v1099_v56  ;;  %s8860_s8 = scalar_lea.vmem [#allocation2], %s6460_s30  ;;  %s7035_s30 = scalar_lea.vmem %s7034_s22, 1024 }
 0x2ae   : > { %2056 = vrot.lane.b32.xlu0 %v793_v10, %s7112_s19  ;;  %910 = vrot.lane.b32.xlu1 %v7520_v30, %s7111_s18  ;;  %v1136_v2 = vcombine.low %v7470_v9, %v7644_v57  ;;  %v1137_v21 = vcombine.high %v7470_v9, %v7644_v57  ;;  %s6299_s10 = sshll.u32 %s8860_s8, 4  ;;  %s8901_s18 = scalar_lea.sflag [#allocation3], %s310_s15  ;;  %s8864_s10 = int_to_ptr.vmem [resolvable:$true] %s6299_s10 }
 0x2af   : > { %v1108_v60 = vrot.slane %v1100_v58, %v7634_v23  ;;  %v1115_v61 = vrot.slane %v1101_v17, %v7634_v23  ;;  %v1124_v62 = vrot.slane %v1116_v35, %v7634_v23  ;;  %v1131_v63 = vrot.slane %v1117_v59, %v7634_v23  ;;  %p7036_p1 = scmp.lt.s32.totalorder %s8864_s10, %s7034_s22 }
 0x2b0   : > { %v7659_v3 = vpop.permute.xlu1 %890  ;;  %v7661_v4 = vpop.permute.xlu0 %788  ;;  %v1144_v32 = vrot.slane %v1136_v2, %v7630_v48  ;;  %v1151_v33 = vrot.slane %v1137_v21, %v7630_v48 }
 0x2b1   : > { %v3436_v47 = vcombine.low %v1108_v60, %v1115_v61  ;;  %v6483_v45 = vcombine.high %v1108_v60, %v1115_v61  ;;  %v3452_v5 = vcombine.low %v1124_v62, %v1131_v63  ;;  %v6484_v6 = vcombine.high %v1124_v62, %v1131_v63 }
 0x2b2   : > { %v1152_v25 = vcombine.low %v795_v44, %v7659_v3  ;;  %v1153_v31 = vcombine.high %v795_v44, %v7659_v3  ;;  %2046 = vrot.lane.b32.xlu1 %v7520_v30, %s7112_s19  ;;  %2088 = vrot.lane.b32.xlu0 %v841_v46, %s7112_s19 }
 0x2b3   : > { %v3443_v7 = vrot.slane %v3436_v47, %v7630_v48  ;;  %v3451_v43 = vrot.slane %v6483_v45, %v7630_v48  ;;  %v3459_v54 = vrot.slane %v3452_v5, %v7630_v48  ;;  %v3467_v9 = vrot.slane %v6484_v6, %v7630_v48 }
 0x2b4   : > { %v1160_v34 = vrot.slane %v1152_v25, %v7630_v48  ;;  %v1167_v20 = vrot.slane %v1153_v31, %v7630_v48  ;;  %v7676_v38 = vpop.permute.xlu1 %2026  ;;  %v837_v39 = vpop.permute.xlu0 %836 }
 0x2b5   : > { %v3468_v40 = vcombine.low %v3443_v7, %v3451_v43  ;;  %v3469_v41 = vcombine.high %v3443_v7, %v3451_v43  ;;  %v3484_v1 = vcombine.low %v3459_v54, %v3467_v9  ;;  %v3485_v36 = vcombine.high %v3459_v54, %v3467_v9 }
 0x2b6   : > { %v1168_v42 = vcombine.low %v1144_v32, %v1160_v34  ;;  %v1169_v10 = vcombine.high %v1144_v32, %v1160_v34  ;;  %v1184_v46 = vcombine.low %v1151_v33, %v1167_v20  ;;  %v1185_v24 = vcombine.high %v1151_v33, %v1167_v20  ;;  %2058 = vrot.lane.b32.xlu1 %v795_v44, %s7112_s19 }
 0x2b7   : > { %v3476_v49 = vrot.slane %v3468_v40, %v7634_v23  ;;  %v3483_v50 = vrot.slane %v3469_v41, %v7634_v23  ;;  %v3492_v51 = vrot.slane %v3484_v1, %v7634_v23  ;;  %v3499_v52 = vrot.slane %v3485_v36, %v7634_v23  ;;  %2120 = vrot.lane.b32.xlu0 %v889_v11, %s7112_s19 }
 0x2b8   : > { %v1176_v28 = vrot.slane %v1168_v42, %v7634_v23  ;;  %v1183_v29 = vrot.slane %v1169_v10, %v7634_v23  ;;  %v1192_v53 = vrot.slane %v1184_v46, %v7634_v23  ;;  %v1199_v44 = vrot.slane %v1185_v24, %v7634_v23  ;;  %v7689_v56 = vpop.permute.xlu1 %790  ;;  %v885_v58 = vpop.permute.xlu0 %884 }
 0x2b9   : > { %v3500_v17 = vcombine.low %v3476_v49, %v3492_v51  ;;  %v3501_v35 = vcombine.high %v3476_v49, %v3492_v51  ;;  %v3502_v59 = vcombine.low %v3483_v50, %v3499_v52  ;;  %v3503_v60 = vcombine.high %v3483_v50, %v3499_v52 }
 0x2ba   : > { %v3504_v11 = vcombine.low %v1176_v28, %v1183_v29  ;;  %v6485_v61 = vcombine.high %v1176_v28, %v1183_v29  ;;  %v3520_v62 = vcombine.low %v1192_v53, %v1199_v44  ;;  %v6486_v63 = vcombine.high %v1192_v53, %v1199_v44  ;;  %2090 = vrot.lane.b32.xlu1 %v7644_v57, %s7112_s19 }
 0x2bb   : > { %v6697_v2 = vpack.c.bf16 %v3500_v17, %v3500_v17  ;;  %v6713_v21 = vpack.c.bf16 %v3501_v35, %v3501_v35  ;;  %v6729_v47 = vpack.c.bf16 %v3502_v59, %v3502_v59  ;;  %v6745_v45 = vpack.c.bf16 %v3503_v60, %v3503_v60  ;;  %2052 = vrot.lane.b32.xlu0 %v7661_v4, %s7112_s19 }
 0x2bc   : > { %v3511_v5 = vrot.slane %v3504_v11, %v7630_v48  ;;  %v3519_v6 = vrot.slane %v6485_v61, %v7630_v48  ;;  %v3527_v25 = vrot.slane %v3520_v62, %v7630_v48  ;;  %v3535_v31 = vrot.slane %v6486_v63, %v7630_v48  ;;  %v7706_v7 = vpop.permute.xlu1 %838  ;;  %v7708_v43 = vpop.permute.xlu0 %2020 }
 0x2bd   : > { %4647 = vst.msk [vmem:[%s7696_s20 + $0x8] sm:$0xf] %vm4644_vm1, %v6697_v2  ;;  %4663 = vst.msk [vmem:[%s7696_s20 + $0x48] sm:$0xf] %vm4644_vm1, %v6713_v21  ;;  %v932_v57 = vcombine.low %v7468_v8, %v837_v39  ;;  %v933_v54 = vcombine.high %v7468_v8, %v837_v39  ;;  %v948_v9 = vcombine.low %v7661_v4, %v885_v58 }
 0x2be   : > { %4679 = vst.msk [vmem:[%s7696_s20 + $0x88] sm:$0xf] %vm4644_vm1, %v6729_v47  ;;  %4695 = vst.msk [vmem:[%s7696_s20 + $0xc8] sm:$0xf] %vm4644_vm1, %v6745_v45  ;;  %v949_v32 = vcombine.high %v7661_v4, %v885_v58  ;;  %v3536_v33 = vcombine.low %v3511_v5, %v3519_v6  ;;  %v3537_v34 = vcombine.high %v3511_v5, %v3519_v6  ;;  %2122 = vrot.lane.b32.xlu1 %v7659_v3, %s7112_s19 }
 0x2bf   : > { %v3552_v20 = vcombine.low %v3527_v25, %v3535_v31  ;;  %v3553_v40 = vcombine.high %v3527_v25, %v3535_v31  ;;  %v940_v41 = vrot.slane %v932_v57, %v7630_v48  ;;  %v947_v1 = vrot.slane %v933_v54, %v7630_v48  ;;  %2084 = vrot.lane.b32.xlu0 %v837_v39, %s7112_s19 }
 0x2c0   : > { %v956_v36 = vrot.slane %v948_v9, %v7630_v48  ;;  %v963_v42 = vrot.slane %v949_v32, %v7630_v48  ;;  %v3544_v8 = vrot.slane %v3536_v33, %v7634_v23  ;;  %v3551_v4 = vrot.slane %v3537_v34, %v7634_v23  ;;  %v887_v24 = vpop.permute.xlu1 %886  ;;  %v7733_v3 = vpop.permute.xlu0 %800 }
 0x2c1   : > { %v3560_v10 = vrot.slane %v3552_v20, %v7634_v23  ;;  %v3567_v46 = vrot.slane %v3553_v40, %v7634_v23  ;;  %v1001_v6 = vcombine.high %v7472_v12, %v7706_v7  ;;  %v1016_v25 = vcombine.low %v7689_v56, %v887_v24 }
 0x2c2   : > { %v964_v49 = vcombine.low %v940_v41, %v956_v36  ;;  %v965_v50 = vcombine.high %v940_v41, %v956_v36  ;;  %v980_v51 = vcombine.low %v947_v1, %v963_v42  ;;  %v981_v52 = vcombine.high %v947_v1, %v963_v42  ;;  %2054 = vrot.lane.b32.xlu1 %v7689_v56, %s7112_s19 }
 0x2c3   : > { %v3568_v28 = vcombine.low %v3544_v8, %v3560_v10  ;;  %v3569_v29 = vcombine.high %v3544_v8, %v3560_v10  ;;  %v3570_v53 = vcombine.low %v3551_v4, %v3567_v46  ;;  %v3571_v44 = vcombine.high %v3551_v4, %v3567_v46  ;;  %2116 = vrot.lane.b32.xlu0 %v885_v58, %s7112_s19 }
 0x2c4   : > { %v972_v39 = vrot.slane %v964_v49, %v7634_v23  ;;  %v979_v17 = vrot.slane %v965_v50, %v7634_v23  ;;  %v988_v35 = vrot.slane %v980_v51, %v7634_v23  ;;  %v995_v59 = vrot.slane %v981_v52, %v7634_v23  ;;  %v7742_v63 = vpop.permute.xlu1 %2022  ;;  %v7744_v2 = vpop.permute.xlu0 %848 }
 0x2c5   : > { %v6698_v60 = vpack.c.bf16 %v3568_v28, %v3568_v28  ;;  %v6714_v11 = vpack.c.bf16 %v3569_v29, %v3569_v29  ;;  %v6730_v61 = vpack.c.bf16 %v3570_v53, %v3570_v53  ;;  %v6746_v62 = vpack.c.bf16 %v3571_v44, %v3571_v44 }
 0x2c6   : > { %v3300_v21 = vcombine.low %v972_v39, %v979_v17  ;;  %v6479_v47 = vcombine.high %v972_v39, %v979_v17  ;;  %v3316_v45 = vcombine.low %v988_v35, %v995_v59  ;;  %v6480_v5 = vcombine.high %v988_v35, %v995_v59  ;;  %2086 = vrot.lane.b32.xlu1 %v7706_v7, %s7112_s19 }
 0x2c7   : > { %4648 = vst.msk [vmem:[%s7696_s20 + $0xc] sm:$0xf] %vm4644_vm1, %v6698_v60  ;;  %4664 = vst.msk [vmem:[%s7696_s20 + $0x4c] sm:$0xf] %vm4644_vm1, %v6714_v11  ;;  %v1000_v58 = vcombine.low %v7472_v12, %v7706_v7  ;;  %v1017_v31 = vcombine.high %v7689_v56, %v887_v24  ;;  %2064 = vrot.lane.b32.xlu0 %v7733_v3, %s7112_s19  ;;  %v1015_v33 = vrot.slane %v1001_v6, %v7630_v48 }
 0x2c8   : > { %4680 = vst.msk [vmem:[%s7696_s20 + $0x8c] sm:$0xf] %vm4644_vm1, %v6730_v61  ;;  %4696 = vst.msk [vmem:[%s7696_s20 + $0xcc] sm:$0xf] %vm4644_vm1, %v6746_v62  ;;  %v3307_v57 = vrot.slane %v3300_v21, %v7630_v48  ;;  %v3315_v54 = vrot.slane %v6479_v47, %v7630_v48  ;;  %v3323_v9 = vrot.slane %v3316_v45, %v7630_v48  ;;  %v7772_v7 = vpop.permute.xlu1 %802  ;;  %v897_v20 = vpop.permute.xlu0 %896 }
 0x2c9   : > { %v3331_v32 = vrot.slane %v6480_v5, %v7630_v48  ;;  %v1008_v12 = vrot.slane %v1000_v58, %v7630_v48  ;;  %v1024_v56 = vrot.slane %v1016_v25, %v7630_v48  ;;  %v1031_v34 = vrot.slane %v1017_v31, %v7630_v48 }
 0x2ca   : > { %v3332_v40 = vcombine.low %v3307_v57, %v3315_v54  ;;  %v3333_v41 = vcombine.high %v3307_v57, %v3315_v54  ;;  %2118 = vrot.lane.b32.xlu1 %v887_v24, %s7112_s19 }
 0x2cb   : > { %v3348_v1 = vcombine.low %v3323_v9, %v3331_v32  ;;  %v3349_v36 = vcombine.high %v3323_v9, %v3331_v32  ;;  %v1032_v42 = vcombine.low %v1008_v12, %v1024_v56  ;;  %v1033_v8 = vcombine.high %v1008_v12, %v1024_v56  ;;  %2096 = vrot.lane.b32.xlu0 %v7744_v2, %s7112_s19 }
 0x2cc   : > { %v1048_v4 = vcombine.low %v1015_v33, %v1031_v34  ;;  %v1049_v10 = vcombine.high %v1015_v33, %v1031_v34  ;;  %v3340_v46 = vrot.slane %v3332_v40, %v7634_v23  ;;  %v3347_v49 = vrot.slane %v3333_v41, %v7634_v23  ;;  %v7785_v24 = vpop.permute.xlu1 %850  ;;  %v7787_v44 = vpop.permute.xlu0 %2032 }
 0x2cd   : > { %v3356_v50 = vrot.slane %v3348_v1, %v7634_v23  ;;  %v3363_v51 = vrot.slane %v3349_v36, %v7634_v23  ;;  %v1040_v52 = vrot.slane %v1032_v42, %v7634_v23  ;;  %v1047_v28 = vrot.slane %v1033_v8, %v7634_v23 }
 0x2ce   : > { %v1056_v29 = vrot.slane %v1048_v4, %v7634_v23  ;;  %v1063_v53 = vrot.slane %v1049_v10, %v7634_v23  ;;  %2066 = vrot.lane.b32.xlu1 %v7772_v7, %s7112_s19  ;;  %v1340_v9 = vcombine.low %v7478_v13, %v7744_v2  ;;  %v1341_v32 = vcombine.high %v7478_v13, %v7744_v2 }
 0x2cf   : > { %v3364_v39 = vcombine.low %v3340_v46, %v3356_v50  ;;  %v3365_v17 = vcombine.high %v3340_v46, %v3356_v50  ;;  %v3366_v35 = vcombine.low %v3347_v49, %v3363_v51  ;;  %v3367_v59 = vcombine.high %v3347_v49, %v3363_v51  ;;  %2128 = vrot.lane.b32.xlu0 %v897_v20, %s7112_s19 }
 0x2d0   : > { %v3368_v60 = vcombine.low %v1040_v52, %v1047_v28  ;;  %v6481_v11 = vcombine.high %v1040_v52, %v1047_v28  ;;  %v3384_v61 = vcombine.low %v1056_v29, %v1063_v53  ;;  %v6482_v62 = vcombine.high %v1056_v29, %v1063_v53  ;;  %v7796_v57 = vpop.permute.xlu1 %898  ;;  %v7798_v54 = vpop.permute.xlu0 %796 }
 0x2d1   : > { %v6695_v21 = vpack.c.bf16 %v3364_v39, %v3364_v39  ;;  %v6711_v47 = vpack.c.bf16 %v3365_v17, %v3365_v17  ;;  %v6727_v45 = vpack.c.bf16 %v3366_v35, %v3366_v35  ;;  %v6743_v5 = vpack.c.bf16 %v3367_v59, %v3367_v59 }
 0x2d2   : > { %v3375_v58 = vrot.slane %v3368_v60, %v7630_v48  ;;  %v3383_v6 = vrot.slane %v6481_v11, %v7630_v48  ;;  %v3391_v25 = vrot.slane %v3384_v61, %v7630_v48  ;;  %v3399_v31 = vrot.slane %v6482_v62, %v7630_v48  ;;  %2098 = vrot.lane.b32.xlu1 %v7785_v24, %s7112_s19 }
 0x2d3   : > { %4645 = vst.msk [vmem:[%s7696_s20] sm:$0xf] %vm4644_vm1, %v6695_v21  ;;  %4661 = vst.msk [vmem:[%s7696_s20 + $0x40] sm:$0xf] %vm4644_vm1, %v6711_v47  ;;  %v1356_v12 = vcombine.low %v7733_v3, %v897_v20  ;;  %v1357_v33 = vcombine.high %v7733_v3, %v897_v20  ;;  %v1348_v1 = vrot.slane %v1340_v9, %v7630_v48  ;;  %2060 = vrot.lane.b32.xlu0 %v7798_v54, %s7112_s19 }
 0x2d4   : > { %4677 = vst.msk [vmem:[%s7696_s20 + $0x80] sm:$0xf] %vm4644_vm1, %v6727_v45  ;;  %4693 = vst.msk [vmem:[%s7696_s20 + $0xc0] sm:$0xf] %vm4644_vm1, %v6743_v5  ;;  %v3400_v56 = vcombine.low %v3375_v58, %v3383_v6  ;;  %v3401_v34 = vcombine.high %v3375_v58, %v3383_v6  ;;  %v3416_v40 = vcombine.low %v3391_v25, %v3399_v31  ;;  %v7826_v4 = vpop.permute.xlu1 %2034  ;;  %v7828_v10 = vpop.permute.xlu0 %844 }
 0x2d5   : > { %v3417_v41 = vcombine.high %v3391_v25, %v3399_v31  ;;  %v1355_v36 = vrot.slane %v1341_v32, %v7630_v48  ;;  %v1364_v42 = vrot.slane %v1356_v12, %v7630_v48  ;;  %v1371_v8 = vrot.slane %v1357_v33, %v7630_v48 }
 0x2d6   : > { %v3408_v13 = vrot.slane %v3400_v56, %v7634_v23  ;;  %v3415_v3 = vrot.slane %v3401_v34, %v7634_v23  ;;  %v3424_v2 = vrot.slane %v3416_v40, %v7634_v23  ;;  %2130 = vrot.lane.b32.xlu1 %v7796_v57, %s7112_s19  ;;  %v1408_v25 = vcombine.low %v7486_v15, %v7785_v24 }
 0x2d7   : > { %v3431_v20 = vrot.slane %v3417_v41, %v7634_v23  ;;  %v1372_v46 = vcombine.low %v1348_v1, %v1364_v42  ;;  %v1373_v49 = vcombine.high %v1348_v1, %v1364_v42  ;;  %v1388_v50 = vcombine.low %v1355_v36, %v1371_v8  ;;  %2092 = vrot.lane.b32.xlu0 %v7828_v10, %s7112_s19 }
 0x2d8   : > { %v1389_v51 = vcombine.high %v1355_v36, %v1371_v8  ;;  %v3432_v52 = vcombine.low %v3408_v13, %v3424_v2  ;;  %v3433_v28 = vcombine.high %v3408_v13, %v3424_v2  ;;  %v7838_v21 = vpop.permute.xlu1 %798  ;;  %v7840_v47 = vpop.permute.xlu0 %892  ;;  %v1409_v31 = vcombine.high %v7486_v15, %v7785_v24 }
 0x2d9   : > { %v3434_v29 = vcombine.low %v3415_v3, %v3431_v20  ;;  %v3435_v53 = vcombine.high %v3415_v3, %v3431_v20  ;;  %v1380_v39 = vrot.slane %v1372_v46, %v7634_v23  ;;  %v1387_v17 = vrot.slane %v1373_v49, %v7634_v23 }
 0x2da   : > { %v1396_v35 = vrot.slane %v1388_v50, %v7634_v23  ;;  %v1403_v59 = vrot.slane %v1389_v51, %v7634_v23  ;;  %v6696_v60 = vpack.c.bf16 %v3432_v52, %v3432_v52  ;;  %v6712_v11 = vpack.c.bf16 %v3433_v28, %v3433_v28  ;;  %2062 = vrot.lane.b32.xlu1 %v7838_v21, %s7112_s19 }
 0x2db   : > { %v6728_v61 = vpack.c.bf16 %v3434_v29, %v3434_v29  ;;  %v6744_v62 = vpack.c.bf16 %v3435_v53, %v3435_v53  ;;  %v3708_v45 = vcombine.low %v1380_v39, %v1387_v17  ;;  %v6491_v5 = vcombine.high %v1380_v39, %v1387_v17  ;;  %2124 = vrot.lane.b32.xlu0 %v7840_v47, %s7112_s19 }
 0x2dc   : > { %v3724_v58 = vcombine.low %v1396_v35, %v1403_v59  ;;  %v6492_v6 = vcombine.high %v1396_v35, %v1403_v59  ;;  %4646 = vst.msk [vmem:[%s7696_s20 + $0x4] sm:$0xf] %vm4644_vm1, %v6696_v60  ;;  %4662 = vst.msk [vmem:[%s7696_s20 + $0x44] sm:$0xf] %vm4644_vm1, %v6712_v11  ;;  %v1424_v9 = vcombine.low %v7772_v7, %v7796_v57  ;;  %v7870_v40 = vpop.permute.xlu1 %846  ;;  %v7872_v41 = vpop.permute.xlu0 %2028 }
 0x2dd   : > { %4678 = vst.msk [vmem:[%s7696_s20 + $0x84] sm:$0xf] %vm4644_vm1, %v6728_v61  ;;  %4694 = vst.msk [vmem:[%s7696_s20 + $0xc4] sm:$0xf] %vm4644_vm1, %v6744_v62  ;;  %v1425_v32 = vcombine.high %v7772_v7, %v7796_v57  ;;  %v3715_v12 = vrot.slane %v3708_v45, %v7630_v48  ;;  %v3723_v33 = vrot.slane %v6491_v5, %v7630_v48 }
 0x2de   : > { %v3731_v56 = vrot.slane %v3724_v58, %v7630_v48  ;;  %v3739_v34 = vrot.slane %v6492_v6, %v7630_v48  ;;  %v1416_v15 = vrot.slane %v1408_v25, %v7630_v48  ;;  %v1423_v24 = vrot.slane %v1409_v31, %v7630_v48  ;;  %2094 = vrot.lane.b32.xlu1 %v7870_v40, %s7112_s19 }
 0x2df   : > { %v1432_v7 = vrot.slane %v1424_v9, %v7630_v48  ;;  %v1439_v57 = vrot.slane %v1425_v32, %v7630_v48  ;;  %v3740_v1 = vcombine.low %v3715_v12, %v3723_v33  ;;  %v3741_v36 = vcombine.high %v3715_v12, %v3723_v33 }
 0x2e0   : > { %v3756_v42 = vcombine.low %v3731_v56, %v3739_v34  ;;  %v3757_v8 = vcombine.high %v3731_v56, %v3739_v34  ;;  %v7884_v39 = vpop.permute.xlu1 %894  ;;  %v7886_v17 = vpop.permute.xlu0 %808 }
 0x2e1   : > { %v1440_v13 = vcombine.low %v1416_v15, %v1432_v7  ;;  %v1441_v3 = vcombine.high %v1416_v15, %v1432_v7  ;;  %v1456_v2 = vcombine.low %v1423_v24, %v1439_v57  ;;  %v1457_v20 = vcombine.high %v1423_v24, %v1439_v57  ;;  %2072 = vrot.lane.b32.xlu0 %v7886_v17, %s7112_s19 }
 0x2e2   : > { %v3748_v46 = vrot.slane %v3740_v1, %v7634_v23  ;;  %v3755_v49 = vrot.slane %v3741_v36, %v7634_v23  ;;  %v3764_v50 = vrot.slane %v3756_v42, %v7634_v23  ;;  %v3771_v51 = vrot.slane %v3757_v8, %v7634_v23  ;;  %2126 = vrot.lane.b32.xlu1 %v7884_v39, %s7112_s19 }
 0x2e3   : > { %v1448_v52 = vrot.slane %v1440_v13, %v7634_v23  ;;  %v1455_v28 = vrot.slane %v1441_v3, %v7634_v23  ;;  %v1464_v29 = vrot.slane %v1456_v2, %v7634_v23  ;;  %v1471_v53 = vrot.slane %v1457_v20, %v7634_v23 }
 0x2e4   : > { %v3772_v35 = vcombine.low %v3748_v46, %v3764_v50  ;;  %v3773_v59 = vcombine.high %v3748_v46, %v3764_v50  ;;  %v3774_v60 = vcombine.low %v3755_v49, %v3771_v51  ;;  %v3775_v11 = vcombine.high %v3755_v49, %v3771_v51  ;;  %v7896_v56 = vpop.permute.xlu1 %2030  ;;  %v7898_v34 = vpop.permute.xlu0 %856 }
 0x2e5   : > { %v3776_v61 = vcombine.low %v1448_v52, %v1455_v28  ;;  %v6493_v62 = vcombine.high %v1448_v52, %v1455_v28  ;;  %v3792_v45 = vcombine.low %v1464_v29, %v1471_v53  ;;  %v6494_v5 = vcombine.high %v1464_v29, %v1471_v53  ;;  %2104 = vrot.lane.b32.xlu0 %v7898_v34, %s7112_s19 }
 0x2e6   : > { %v6701_v58 = vpack.c.bf16 %v3772_v35, %v3772_v35  ;;  %v6717_v6 = vpack.c.bf16 %v3773_v59, %v3773_v59  ;;  %v6733_v25 = vpack.c.bf16 %v3774_v60, %v3774_v60  ;;  %v6749_v31 = vpack.c.bf16 %v3775_v11, %v3775_v11 }
 0x2e7   : > { %v3783_v9 = vrot.slane %v3776_v61, %v7630_v48  ;;  %v3791_v32 = vrot.slane %v6493_v62, %v7630_v48  ;;  %v3799_v12 = vrot.slane %v3792_v45, %v7630_v48  ;;  %v3807_v33 = vrot.slane %v6494_v5, %v7630_v48 }
 0x2e8   : > { %4651 = vst.msk [vmem:[%s7696_s20 + $0x18] sm:$0xf] %vm4644_vm1, %v6701_v58  ;;  %4667 = vst.msk [vmem:[%s7696_s20 + $0x58] sm:$0xf] %vm4644_vm1, %v6717_v6  ;;  %v1204_v15 = vcombine.low %v7484_v14, %v7828_v10  ;;  %v1205_v24 = vcombine.high %v7484_v14, %v7828_v10  ;;  %v1220_v7 = vcombine.low %v7798_v54, %v7840_v47  ;;  %v7926_v46 = vpop.permute.xlu1 %810  ;;  %v7928_v49 = vpop.permute.xlu0 %904 }
 0x2e9   : > { %4683 = vst.msk [vmem:[%s7696_s20 + $0x98] sm:$0xf] %vm4644_vm1, %v6733_v25  ;;  %4699 = vst.msk [vmem:[%s7696_s20 + $0xd8] sm:$0xf] %vm4644_vm1, %v6749_v31  ;;  %v1221_v57 = vcombine.high %v7798_v54, %v7840_v47  ;;  %v3808_v1 = vcombine.low %v3783_v9, %v3791_v32  ;;  %v3809_v36 = vcombine.high %v3783_v9, %v3791_v32  ;;  %2074 = vrot.lane.b32.xlu1 %v7926_v46, %s7112_s19 }
 0x2ea   : > { %v3824_v42 = vcombine.low %v3799_v12, %v3807_v33  ;;  %v3825_v8 = vcombine.high %v3799_v12, %v3807_v33  ;;  %v1212_v13 = vrot.slane %v1204_v15, %v7630_v48  ;;  %v1219_v3 = vrot.slane %v1205_v24, %v7630_v48  ;;  %2136 = vrot.lane.b32.xlu0 %v7928_v49, %s7112_s19 }
 0x2eb   : > { %v1228_v2 = vrot.slane %v1220_v7, %v7630_v48  ;;  %v1235_v14 = vrot.slane %v1221_v57, %v7630_v48  ;;  %v3816_v10 = vrot.slane %v3808_v1, %v7634_v23  ;;  %v3823_v20 = vrot.slane %v3809_v36, %v7634_v23 }
 0x2ec   : > { %v3832_v54 = vrot.slane %v3824_v42, %v7634_v23  ;;  %v3839_v47 = vrot.slane %v3825_v8, %v7634_v23  ;;  %v7938_v25 = vpop.permute.xlu1 %858  ;;  %v7940_v31 = vpop.permute.xlu0 %2040  ;;  %v1272_v15 = vcombine.low %v7488_v18, %v7870_v40  ;;  %v1273_v24 = vcombine.high %v7488_v18, %v7870_v40 }
 0x2ed   : > { %v1236_v50 = vcombine.low %v1212_v13, %v1228_v2  ;;  %v1237_v51 = vcombine.high %v1212_v13, %v1228_v2  ;;  %v1252_v52 = vcombine.low %v1219_v3, %v1235_v14  ;;  %v1253_v28 = vcombine.high %v1219_v3, %v1235_v14  ;;  %2106 = vrot.lane.b32.xlu1 %v7938_v25, %s7112_s19 }
 0x2ee   : > { %v3840_v29 = vcombine.low %v3816_v10, %v3832_v54  ;;  %v3841_v53 = vcombine.high %v3816_v10, %v3832_v54  ;;  %v3842_v35 = vcombine.low %v3823_v20, %v3839_v47  ;;  %v3843_v59 = vcombine.high %v3823_v20, %v3839_v47 }
 0x2ef   : > { %v1244_v60 = vrot.slane %v1236_v50, %v7634_v23  ;;  %v1251_v11 = vrot.slane %v1237_v51, %v7634_v23  ;;  %v1260_v61 = vrot.slane %v1252_v52, %v7634_v23  ;;  %v1267_v62 = vrot.slane %v1253_v28, %v7634_v23 }
 0x2f0   : > { %v6702_v45 = vpack.c.bf16 %v3840_v29, %v3840_v29  ;;  %v6718_v5 = vpack.c.bf16 %v3841_v53, %v3841_v53  ;;  %v6734_v58 = vpack.c.bf16 %v3842_v35, %v3842_v35  ;;  %v6750_v6 = vpack.c.bf16 %v3843_v59, %v3843_v59  ;;  %v7968_v2 = vpop.permute.xlu1 %906  ;;  %v7970_v14 = vpop.permute.xlu0 %804 }
 0x2f1   : > { %v3572_v9 = vcombine.low %v1244_v60, %v1251_v11  ;;  %v6487_v32 = vcombine.high %v1244_v60, %v1251_v11  ;;  %v3588_v12 = vcombine.low %v1260_v61, %v1267_v62  ;;  %v6488_v33 = vcombine.high %v1260_v61, %v1267_v62  ;;  %2138 = vrot.lane.b32.xlu1 %v7968_v2, %s7112_s19 }
 0x2f2   : > { %4652 = vst.msk [vmem:[%s7696_s20 + $0x1c] sm:$0xf] %vm4644_vm1, %v6702_v45  ;;  %4668 = vst.msk [vmem:[%s7696_s20 + $0x5c] sm:$0xf] %vm4644_vm1, %v6718_v5  ;;  %v1288_v7 = vcombine.low %v7838_v21, %v7884_v39  ;;  %v1289_v57 = vcombine.high %v7838_v21, %v7884_v39  ;;  %v1280_v13 = vrot.slane %v1272_v15, %v7630_v48  ;;  %2068 = vrot.lane.b32.xlu0 %v7970_v14, %s7112_s19 }
 0x2f3   : > { %4684 = vst.msk [vmem:[%s7696_s20 + $0x9c] sm:$0xf] %vm4644_vm1, %v6734_v58  ;;  %4700 = vst.msk [vmem:[%s7696_s20 + $0xdc] sm:$0xf] %vm4644_vm1, %v6750_v6  ;;  %v3579_v1 = vrot.slane %v3572_v9, %v7630_v48  ;;  %v3587_v36 = vrot.slane %v6487_v32, %v7630_v48  ;;  %v3595_v42 = vrot.slane %v3588_v12, %v7630_v48 }
 0x2f4   : > { %v3603_v8 = vrot.slane %v6488_v33, %v7630_v48  ;;  %v1287_v3 = vrot.slane %v1273_v24, %v7630_v48  ;;  %v1296_v18 = vrot.slane %v1288_v7, %v7630_v48  ;;  %v1303_v40 = vrot.slane %v1289_v57, %v7630_v48  ;;  %v7984_v61 = vpop.permute.xlu1 %2042  ;;  %v7986_v62 = vpop.permute.xlu0 %852 }
 0x2f5   : > { %v3604_v21 = vcombine.low %v3579_v1, %v3587_v36  ;;  %v3605_v39 = vcombine.high %v3579_v1, %v3587_v36 }
 0x2f6   : > { %v3620_v10 = vcombine.low %v3595_v42, %v3603_v8  ;;  %v3621_v20 = vcombine.high %v3595_v42, %v3603_v8  ;;  %v1304_v54 = vcombine.low %v1280_v13, %v1296_v18  ;;  %v1305_v47 = vcombine.high %v1280_v13, %v1296_v18  ;;  %2100 = vrot.lane.b32.xlu0 %v7986_v62, %s7112_s19 }
 0x2f7   : > { %v1320_v50 = vcombine.low %v1287_v3, %v1303_v40  ;;  %v1321_v51 = vcombine.high %v1287_v3, %v1303_v40  ;;  %v3612_v52 = vrot.slane %v3604_v21, %v7634_v23  ;;  %v3619_v28 = vrot.slane %v3605_v39, %v7634_v23 }
 0x2f8   : > { %v3628_v29 = vrot.slane %v3620_v10, %v7634_v23  ;;  %v3635_v53 = vrot.slane %v3621_v20, %v7634_v23  ;;  %v1312_v35 = vrot.slane %v1304_v54, %v7634_v23  ;;  %v1319_v59 = vrot.slane %v1305_v47, %v7634_v23  ;;  %v7994_v13 = vpop.permute.xlu1 %806  ;;  %v7996_v3 = vpop.permute.xlu0 %900 }
 0x2f9   : > { %v1328_v60 = vrot.slane %v1320_v50, %v7634_v23  ;;  %v1335_v11 = vrot.slane %v1321_v51, %v7634_v23  ;;  %v1612_v18 = vcombine.low %v7494_v19, %v7898_v34  ;;  %v1613_v40 = vcombine.high %v7494_v19, %v7898_v34  ;;  %2070 = vrot.lane.b32.xlu1 %v7994_v13, %s7112_s19 }
 0x2fa   : > { %v3636_v45 = vcombine.low %v3612_v52, %v3628_v29  ;;  %v3637_v5 = vcombine.high %v3612_v52, %v3628_v29  ;;  %v3638_v58 = vcombine.low %v3619_v28, %v3635_v53  ;;  %v3639_v6 = vcombine.high %v3619_v28, %v3635_v53  ;;  %2132 = vrot.lane.b32.xlu0 %v7996_v3, %s7112_s19 }
 0x2fb   : > { %v3640_v9 = vcombine.low %v1312_v35, %v1319_v59  ;;  %v6489_v32 = vcombine.high %v1312_v35, %v1319_v59  ;;  %v3656_v12 = vcombine.low %v1328_v60, %v1335_v11  ;;  %v6490_v33 = vcombine.high %v1328_v60, %v1335_v11 }
 0x2fc   : > { %v6699_v15 = vpack.c.bf16 %v3636_v45, %v3636_v45  ;;  %v6715_v24 = vpack.c.bf16 %v3637_v5, %v3637_v5  ;;  %v6731_v7 = vpack.c.bf16 %v3638_v58, %v3638_v58  ;;  %v6747_v57 = vpack.c.bf16 %v3639_v6, %v3639_v6  ;;  %v8026_v29 = vpop.permute.xlu1 %854  ;;  %v8028_v53 = vpop.permute.xlu0 %2036 }
 0x2fd   : > { %v3647_v1 = vrot.slane %v3640_v9, %v7630_v48  ;;  %v3655_v36 = vrot.slane %v6489_v32, %v7630_v48  ;;  %v3663_v42 = vrot.slane %v3656_v12, %v7630_v48  ;;  %v3671_v8 = vrot.slane %v6490_v33, %v7630_v48  ;;  %2102 = vrot.lane.b32.xlu1 %v8026_v29, %s7112_s19 }
 0x2fe   : > { %4649 = vst.msk [vmem:[%s7696_s20 + $0x10] sm:$0xf] %vm4644_vm1, %v6699_v15  ;;  %4665 = vst.msk [vmem:[%s7696_s20 + $0x50] sm:$0xf] %vm4644_vm1, %v6715_v24  ;;  %v1628_v21 = vcombine.low %v7886_v17, %v7928_v49  ;;  %v1629_v39 = vcombine.high %v7886_v17, %v7928_v49  ;;  %v1620_v50 = vrot.slane %v1612_v18, %v7630_v48 }
 0x2ff   : > { %4681 = vst.msk [vmem:[%s7696_s20 + $0x90] sm:$0xf] %vm4644_vm1, %v6731_v7  ;;  %4697 = vst.msk [vmem:[%s7696_s20 + $0xd0] sm:$0xf] %vm4644_vm1, %v6747_v57  ;;  %v3672_v10 = vcombine.low %v3647_v1, %v3655_v36  ;;  %v3673_v20 = vcombine.high %v3647_v1, %v3655_v36  ;;  %v3688_v54 = vcombine.low %v3663_v42, %v3671_v8 }
 0x300   : > { %v3689_v47 = vcombine.high %v3663_v42, %v3671_v8  ;;  %v1627_v19 = vrot.slane %v1613_v40, %v7630_v48  ;;  %v1636_v34 = vrot.slane %v1628_v21, %v7630_v48  ;;  %v1643_v51 = vrot.slane %v1629_v39, %v7630_v48  ;;  %v8036_v1 = vpop.permute.xlu1 %902  ;;  %v8038_v36 = vpop.permute.xlu0 %816 }
 0x301   : > { %v3680_v17 = vrot.slane %v3672_v10, %v7634_v23  ;;  %v3687_v49 = vrot.slane %v3673_v20, %v7634_v23  ;;  %v3696_v52 = vrot.slane %v3688_v54, %v7634_v23  ;;  %2134 = vrot.lane.b32.xlu1 %v8036_v1, %s7112_s19  ;;  %v1680_v21 = vcombine.low %v7502_v16, %v7938_v25 }
 0x302   : > { %v3703_v28 = vrot.slane %v3689_v47, %v7634_v23  ;;  %v1644_v35 = vcombine.low %v1620_v50, %v1636_v34  ;;  %v1645_v59 = vcombine.high %v1620_v50, %v1636_v34  ;;  %v1660_v60 = vcombine.low %v1627_v19, %v1643_v51  ;;  %2080 = vrot.lane.b32.xlu0 %v8038_v36, %s7112_s19 }
 0x303   : > { %v1661_v11 = vcombine.high %v1627_v19, %v1643_v51  ;;  %v3704_v45 = vcombine.low %v3680_v17, %v3696_v52  ;;  %v3705_v5 = vcombine.high %v3680_v17, %v3696_v52  ;;  %v1681_v39 = vcombine.high %v7502_v16, %v7938_v25 }
 0x304   : > { %v3706_v58 = vcombine.low %v3687_v49, %v3703_v28  ;;  %v3707_v6 = vcombine.high %v3687_v49, %v3703_v28  ;;  %v1652_v9 = vrot.slane %v1644_v35, %v7634_v23  ;;  %v1659_v32 = vrot.slane %v1645_v59, %v7634_v23 }
 0x305   : > { %v1668_v12 = vrot.slane %v1660_v60, %v7634_v23  ;;  %v1675_v33 = vrot.slane %v1661_v11, %v7634_v23  ;;  %v6700_v15 = vpack.c.bf16 %v3704_v45, %v3704_v45  ;;  %v6716_v24 = vpack.c.bf16 %v3705_v5, %v3705_v5 }
 0x306   : > { %v6732_v7 = vpack.c.bf16 %v3706_v58, %v3706_v58  ;;  %v6748_v57 = vpack.c.bf16 %v3707_v6, %v3707_v6  ;;  %v3980_v42 = vcombine.low %v1652_v9, %v1659_v32  ;;  %v6499_v8 = vcombine.high %v1652_v9, %v1659_v32 }
 0x307   : > { %v3996_v18 = vcombine.low %v1668_v12, %v1675_v33  ;;  %v6500_v40 = vcombine.high %v1668_v12, %v1675_v33  ;;  %4650 = vst.msk [vmem:[%s7696_s20 + $0x14] sm:$0xf] %vm4644_vm1, %v6700_v15  ;;  %4666 = vst.msk [vmem:[%s7696_s20 + $0x54] sm:$0xf] %vm4644_vm1, %v6716_v24  ;;  %v1696_v10 = vcombine.low %v7926_v46, %v7968_v2 }
 0x308   : > { %4682 = vst.msk [vmem:[%s7696_s20 + $0x94] sm:$0xf] %vm4644_vm1, %v6732_v7  ;;  %4698 = vst.msk [vmem:[%s7696_s20 + $0xd4] sm:$0xf] %vm4644_vm1, %v6748_v57  ;;  %v1697_v20 = vcombine.high %v7926_v46, %v7968_v2  ;;  %v3987_v54 = vrot.slane %v3980_v42, %v7630_v48  ;;  %v3995_v47 = vrot.slane %v6499_v8, %v7630_v48  ;;  %v8068_v46 = vpop.permute.xlu1 %2038  ;;  %v8070_v2 = vpop.permute.xlu0 %864 }
 0x309   : > { %v4003_v50 = vrot.slane %v3996_v18, %v7630_v48  ;;  %v4011_v19 = vrot.slane %v6500_v40, %v7630_v48  ;;  %v1688_v34 = vrot.slane %v1680_v21, %v7630_v48  ;;  %v1695_v16 = vrot.slane %v1681_v39, %v7630_v48  ;;  %2112 = vrot.lane.b32.xlu0 %v8070_v2, %s7112_s19 }
 0x30a   : > { %v1704_v25 = vrot.slane %v1696_v10, %v7630_v48  ;;  %v1711_v51 = vrot.slane %v1697_v20, %v7630_v48  ;;  %v4012_v17 = vcombine.low %v3987_v54, %v3995_v47  ;;  %v4013_v49 = vcombine.high %v3987_v54, %v3995_v47 }
 0x30b   : > { %v4028_v52 = vcombine.low %v4003_v50, %v4011_v19  ;;  %v4029_v28 = vcombine.high %v4003_v50, %v4011_v19 }
 0x30c   : > { %v1712_v35 = vcombine.low %v1688_v34, %v1704_v25  ;;  %v1713_v59 = vcombine.high %v1688_v34, %v1704_v25  ;;  %v1728_v60 = vcombine.low %v1695_v16, %v1711_v51  ;;  %v1729_v11 = vcombine.high %v1695_v16, %v1711_v51  ;;  %v8082_v15 = vpop.permute.xlu1 %818  ;;  %v8084_v24 = vpop.permute.xlu0 %912 }
 0x30d   : > { %v4020_v45 = vrot.slane %v4012_v17, %v7634_v23  ;;  %v4027_v5 = vrot.slane %v4013_v49, %v7634_v23  ;;  %v4036_v58 = vrot.slane %v4028_v52, %v7634_v23  ;;  %v4043_v6 = vrot.slane %v4029_v28, %v7634_v23  ;;  %2082 = vrot.lane.b32.xlu1 %v8082_v15, %s7112_s19 }
 0x30e   : > { %v1720_v9 = vrot.slane %v1712_v35, %v7634_v23  ;;  %v1727_v32 = vrot.slane %v1713_v59, %v7634_v23  ;;  %v1736_v12 = vrot.slane %v1728_v60, %v7634_v23  ;;  %v1743_v33 = vrot.slane %v1729_v11, %v7634_v23 }
 0x30f   : > { %v4044_v7 = vcombine.low %v4020_v45, %v4036_v58  ;;  %v4045_v57 = vcombine.high %v4020_v45, %v4036_v58  ;;  %v4046_v42 = vcombine.low %v4027_v5, %v4043_v6  ;;  %v4047_v8 = vcombine.high %v4027_v5, %v4043_v6 }
 0x310   : > { %v4048_v18 = vcombine.low %v1720_v9, %v1727_v32  ;;  %v6501_v40 = vcombine.high %v1720_v9, %v1727_v32  ;;  %v4064_v21 = vcombine.low %v1736_v12, %v1743_v33  ;;  %v6502_v39 = vcombine.high %v1736_v12, %v1743_v33  ;;  %v8092_v25 = vpop.permute.xlu1 %866  ;;  %v8094_v51 = vpop.permute.xlu0 %2048 }
 0x311   : > { %v6705_v10 = vpack.c.bf16 %v4044_v7, %v4044_v7  ;;  %v6721_v20 = vpack.c.bf16 %v4045_v57, %v4045_v57  ;;  %v6737_v54 = vpack.c.bf16 %v4046_v42, %v4046_v42  ;;  %v6753_v47 = vpack.c.bf16 %v4047_v8, %v4047_v8  ;;  %2114 = vrot.lane.b32.xlu1 %v8092_v25, %s7112_s19 }
 0x312   : > { %v4055_v50 = vrot.slane %v4048_v18, %v7630_v48  ;;  %v4063_v19 = vrot.slane %v6501_v40, %v7630_v48  ;;  %v4071_v34 = vrot.slane %v4064_v21, %v7630_v48  ;;  %v4079_v16 = vrot.slane %v6502_v39, %v7630_v48 }
 0x313   : > { %4655 = vst.msk [vmem:[%s7696_s20 + $0x28] sm:$0xf] %vm4644_vm1, %v6705_v10  ;;  %4671 = vst.msk [vmem:[%s7696_s20 + $0x68] sm:$0xf] %vm4644_vm1, %v6721_v20  ;;  %v1476_v17 = vcombine.low %v7500_v22, %v7986_v62  ;;  %v1477_v49 = vcombine.high %v7500_v22, %v7986_v62  ;;  %v1492_v52 = vcombine.low %v7970_v14, %v7996_v3 }
 0x314   : > { %4687 = vst.msk [vmem:[%s7696_s20 + $0xa8] sm:$0xf] %vm4644_vm1, %v6737_v54  ;;  %4703 = vst.msk [vmem:[%s7696_s20 + $0xe8] sm:$0xf] %vm4644_vm1, %v6753_v47  ;;  %v1493_v28 = vcombine.high %v7970_v14, %v7996_v3  ;;  %v4080_v35 = vcombine.low %v4055_v50, %v4063_v19  ;;  %v4081_v59 = vcombine.high %v4055_v50, %v4063_v19  ;;  %v8122_v9 = vpop.permute.xlu1 %914  ;;  %v8124_v32 = vpop.permute.xlu0 %812 }
 0x315   : > { %v4096_v60 = vcombine.low %v4071_v34, %v4079_v16  ;;  %v4097_v11 = vcombine.high %v4071_v34, %v4079_v16  ;;  %v1484_v45 = vrot.slane %v1476_v17, %v7630_v48  ;;  %v1491_v5 = vrot.slane %v1477_v49, %v7630_v48  ;;  %2076 = vrot.lane.b32.xlu0 %v8124_v32, %s7112_s19 }
 0x316   : > { %v1500_v58 = vrot.slane %v1492_v52, %v7630_v48  ;;  %v1507_v22 = vrot.slane %v1493_v28, %v7630_v48  ;;  %v4088_v62 = vrot.slane %v4080_v35, %v7634_v23  ;;  %v4095_v6 = vrot.slane %v4081_v59, %v7634_v23 }
 0x317   : > { %v4104_v14 = vrot.slane %v4096_v60, %v7634_v23  ;;  %v4111_v3 = vrot.slane %v4097_v11, %v7634_v23  ;;  %v1544_v35 = vcombine.low %v7504_v26, %v8026_v29  ;;  %v1545_v59 = vcombine.high %v7504_v26, %v8026_v29 }
 0x318   : > { %v1508_v12 = vcombine.low %v1484_v45, %v1500_v58  ;;  %v1509_v33 = vcombine.high %v1484_v45, %v1500_v58  ;;  %v1524_v7 = vcombine.low %v1491_v5, %v1507_v22  ;;  %v1525_v57 = vcombine.high %v1491_v5, %v1507_v22  ;;  %v8132_v34 = vpop.permute.xlu1 %2050  ;;  %v8134_v16 = vpop.permute.xlu0 %860 }
 0x319   : > { %v4112_v42 = vcombine.low %v4088_v62, %v4104_v14  ;;  %v4113_v8 = vcombine.high %v4088_v62, %v4104_v14  ;;  %v4114_v18 = vcombine.low %v4095_v6, %v4111_v3  ;;  %v4115_v40 = vcombine.high %v4095_v6, %v4111_v3  ;;  %2108 = vrot.lane.b32.xlu0 %v8134_v16, %s7112_s19 }
 0x31a   : > { %v1516_v21 = vrot.slane %v1508_v12, %v7634_v23  ;;  %v1523_v39 = vrot.slane %v1509_v33, %v7634_v23  ;;  %v1532_v10 = vrot.slane %v1524_v7, %v7634_v23  ;;  %v1539_v20 = vrot.slane %v1525_v57, %v7634_v23 }
 0x31b   : > { %v6706_v54 = vpack.c.bf16 %v4112_v42, %v4112_v42  ;;  %v6722_v47 = vpack.c.bf16 %v4113_v8, %v4113_v8  ;;  %v6738_v50 = vpack.c.bf16 %v4114_v18, %v4114_v18  ;;  %v6754_v19 = vpack.c.bf16 %v4115_v40, %v4115_v40 }
 0x31c   : > { %v3844_v17 = vcombine.low %v1516_v21, %v1523_v39  ;;  %v6495_v49 = vcombine.high %v1516_v21, %v1523_v39  ;;  %v3860_v52 = vcombine.low %v1532_v10, %v1539_v20  ;;  %v6496_v28 = vcombine.high %v1532_v10, %v1539_v20  ;;  %v8162_v14 = vpop.permute.xlu1 %814  ;;  %v8164_v3 = vpop.permute.xlu0 %908 }
 0x31d   : > { %4656 = vst.msk [vmem:[%s7696_s20 + $0x2c] sm:$0xf] %vm4644_vm1, %v6706_v54  ;;  %4672 = vst.msk [vmem:[%s7696_s20 + $0x6c] sm:$0xf] %vm4644_vm1, %v6722_v47  ;;  %v1560_v60 = vcombine.low %v7994_v13, %v8036_v1  ;;  %v1561_v11 = vcombine.high %v7994_v13, %v8036_v1  ;;  %v1552_v62 = vrot.slane %v1544_v35, %v7630_v48  ;;  %2078 = vrot.lane.b32.xlu1 %v8162_v14, %s7112_s19 }
 0x31e   : > { %4688 = vst.msk [vmem:[%s7696_s20 + $0xac] sm:$0xf] %vm4644_vm1, %v6738_v50  ;;  %4704 = vst.msk [vmem:[%s7696_s20 + $0xec] sm:$0xf] %vm4644_vm1, %v6754_v19  ;;  %v3851_v45 = vrot.slane %v3844_v17, %v7630_v48  ;;  %v3859_v5 = vrot.slane %v6495_v49, %v7630_v48  ;;  %v3867_v58 = vrot.slane %v3860_v52, %v7630_v48  ;;  %2140 = vrot.lane.b32.xlu0 %v8164_v3, %s7112_s19 }
 0x31f   : > { %v3875_v22 = vrot.slane %v6496_v28, %v7630_v48  ;;  %v1559_v6 = vrot.slane %v1545_v59, %v7630_v48  ;;  %v1568_v26 = vrot.slane %v1560_v60, %v7630_v48  ;;  %v1575_v29 = vrot.slane %v1561_v11, %v7630_v48 }
 0x320   : > { %v3876_v13 = vcombine.low %v3851_v45, %v3859_v5  ;;  %v3877_v1 = vcombine.high %v3851_v45, %v3859_v5  ;;  %v8178_v50 = vpop.permute.xlu1 %862 }
 0x321   : > { %v3892_v12 = vcombine.low %v3867_v58, %v3875_v22  ;;  %v3893_v33 = vcombine.high %v3867_v58, %v3875_v22  ;;  %v1576_v7 = vcombine.low %v1552_v62, %v1568_v26  ;;  %v1577_v57 = vcombine.high %v1552_v62, %v1568_v26  ;;  %2110 = vrot.lane.b32.xlu1 %v8178_v50, %s7112_s19 }
 0x322   : > { %v1592_v42 = vcombine.low %v1559_v6, %v1575_v29  ;;  %v1593_v8 = vcombine.high %v1559_v6, %v1575_v29  ;;  %v3884_v18 = vrot.slane %v3876_v13, %v7634_v23  ;;  %v3891_v40 = vrot.slane %v3877_v1, %v7634_v23  ;;  %2144 = vrot.lane.b32.xlu0 %v8084_v24, %s7112_s19 }
 0x323   : > { %v3900_v21 = vrot.slane %v3892_v12, %v7634_v23  ;;  %v3907_v39 = vrot.slane %v3893_v33, %v7634_v23  ;;  %v1584_v10 = vrot.slane %v1576_v7, %v7634_v23  ;;  %v1591_v20 = vrot.slane %v1577_v57, %v7634_v23 }
 0x324   : > { %v1600_v54 = vrot.slane %v1592_v42, %v7634_v23  ;;  %v1607_v47 = vrot.slane %v1593_v8, %v7634_v23  ;;  %v8188_v29 = vpop.permute.xlu1 %910  ;;  %v1884_v13 = vcombine.low %v7510_v55, %v8070_v2  ;;  %v1885_v1 = vcombine.high %v7510_v55, %v8070_v2 }
 0x325   : > { %v3908_v19 = vcombine.low %v3884_v18, %v3900_v21  ;;  %v3909_v17 = vcombine.high %v3884_v18, %v3900_v21  ;;  %v3910_v49 = vcombine.low %v3891_v40, %v3907_v39  ;;  %v3911_v52 = vcombine.high %v3891_v40, %v3907_v39  ;;  %2142 = vrot.lane.b32.xlu1 %v8188_v29, %s7112_s19 }
 0x326   : > { %v3912_v28 = vcombine.low %v1584_v10, %v1591_v20  ;;  %v6497_v35 = vcombine.high %v1584_v10, %v1591_v20  ;;  %v3928_v59 = vcombine.low %v1600_v54, %v1607_v47  ;;  %v6498_v60 = vcombine.high %v1600_v54, %v1607_v47 }
 0x327   : > { %v6703_v11 = vpack.c.bf16 %v3908_v19, %v3908_v19  ;;  %v6719_v45 = vpack.c.bf16 %v3909_v17, %v3909_v17  ;;  %v6735_v5 = vpack.c.bf16 %v3910_v49, %v3910_v49  ;;  %v6751_v58 = vpack.c.bf16 %v3911_v52, %v3911_v52 }
 0x328   : > { %v3919_v22 = vrot.slane %v3912_v28, %v7630_v48  ;;  %v3927_v62 = vrot.slane %v6497_v35, %v7630_v48  ;;  %v3935_v6 = vrot.slane %v3928_v59, %v7630_v48  ;;  %v3943_v26 = vrot.slane %v6498_v60, %v7630_v48 }
 0x329   : > { %4653 = vst.msk [vmem:[%s7696_s20 + $0x20] sm:$0xf] %vm4644_vm1, %v6703_v11  ;;  %4669 = vst.msk [vmem:[%s7696_s20 + $0x60] sm:$0xf] %vm4644_vm1, %v6719_v45  ;;  %v1900_v12 = vcombine.low %v8038_v36, %v8084_v24  ;;  %v1901_v33 = vcombine.high %v8038_v36, %v8084_v24  ;;  %v1892_v18 = vrot.slane %v1884_v13, %v7630_v48  ;;  %2146 = vrot.lane.b32.xlu1 %v8122_v9, %s7112_s19 }
 0x32a   : > { %4685 = vst.msk [vmem:[%s7696_s20 + $0xa0] sm:$0xf] %vm4644_vm1, %v6735_v5  ;;  %4701 = vst.msk [vmem:[%s7696_s20 + $0xe0] sm:$0xf] %vm4644_vm1, %v6751_v58  ;;  %v3944_v7 = vcombine.low %v3919_v22, %v3927_v62  ;;  %v3945_v57 = vcombine.high %v3919_v22, %v3927_v62  ;;  %v3960_v42 = vcombine.low %v3935_v6, %v3943_v26 }
 0x32b   : > { %v3961_v8 = vcombine.high %v3935_v6, %v3943_v26  ;;  %v1899_v40 = vrot.slane %v1885_v1, %v7630_v48  ;;  %v1908_v21 = vrot.slane %v1900_v12, %v7630_v48  ;;  %v1915_v55 = vrot.slane %v1901_v33, %v7630_v48 }
 0x32c   : > { %v3952_v2 = vrot.slane %v3944_v7, %v7634_v23  ;;  %v3959_v39 = vrot.slane %v3945_v57, %v7634_v23  ;;  %v3968_v36 = vrot.slane %v3960_v42, %v7634_v23  ;;  %v1952_v13 = vcombine.low %v7518_v0, %v8092_v25 }
 0x32d   : > { %v3975_v24 = vrot.slane %v3961_v8, %v7634_v23  ;;  %v1916_v10 = vcombine.low %v1892_v18, %v1908_v21  ;;  %v1917_v20 = vcombine.high %v1892_v18, %v1908_v21  ;;  %v1932_v54 = vcombine.low %v1899_v40, %v1915_v55 }
 0x32e   : > { %v1933_v47 = vcombine.high %v1899_v40, %v1915_v55  ;;  %v3976_v19 = vcombine.low %v3952_v2, %v3968_v36  ;;  %v3977_v17 = vcombine.high %v3952_v2, %v3968_v36  ;;  %v1953_v1 = vcombine.high %v7518_v0, %v8092_v25 }
 0x32f   : > { %v3978_v49 = vcombine.low %v3959_v39, %v3975_v24  ;;  %v3979_v52 = vcombine.high %v3959_v39, %v3975_v24  ;;  %v1924_v28 = vrot.slane %v1916_v10, %v7634_v23  ;;  %v1931_v35 = vrot.slane %v1917_v20, %v7634_v23 }
 0x330   : > { %v1940_v59 = vrot.slane %v1932_v54, %v7634_v23  ;;  %v1947_v60 = vrot.slane %v1933_v47, %v7634_v23  ;;  %v6704_v11 = vpack.c.bf16 %v3976_v19, %v3976_v19  ;;  %v6720_v45 = vpack.c.bf16 %v3977_v17, %v3977_v17 }
 0x331   : > { %v6736_v5 = vpack.c.bf16 %v3978_v49, %v3978_v49  ;;  %v6752_v58 = vpack.c.bf16 %v3979_v52, %v3979_v52  ;;  %v4252_v22 = vcombine.low %v1924_v28, %v1931_v35  ;;  %v6507_v62 = vcombine.high %v1924_v28, %v1931_v35 }
 0x332   : > { %v4268_v6 = vcombine.low %v1940_v59, %v1947_v60  ;;  %v6508_v26 = vcombine.high %v1940_v59, %v1947_v60  ;;  %4654 = vst.msk [vmem:[%s7696_s20 + $0x24] sm:$0xf] %vm4644_vm1, %v6704_v11  ;;  %4670 = vst.msk [vmem:[%s7696_s20 + $0x64] sm:$0xf] %vm4644_vm1, %v6720_v45  ;;  %v1968_v12 = vcombine.low %v8082_v15, %v8122_v9 }
 0x333   : > { %4686 = vst.msk [vmem:[%s7696_s20 + $0xa4] sm:$0xf] %vm4644_vm1, %v6736_v5  ;;  %4702 = vst.msk [vmem:[%s7696_s20 + $0xe4] sm:$0xf] %vm4644_vm1, %v6752_v58  ;;  %v1969_v33 = vcombine.high %v8082_v15, %v8122_v9  ;;  %v4259_v7 = vrot.slane %v4252_v22, %v7630_v48  ;;  %v4267_v57 = vrot.slane %v6507_v62, %v7630_v48 }
 0x334   : > { %v4275_v42 = vrot.slane %v4268_v6, %v7630_v48  ;;  %v4283_v8 = vrot.slane %v6508_v26, %v7630_v48  ;;  %v1960_v18 = vrot.slane %v1952_v13, %v7630_v48  ;;  %v1967_v40 = vrot.slane %v1953_v1, %v7630_v48 }
 0x335   : > { %v1976_v0 = vrot.slane %v1968_v12, %v7630_v48  ;;  %v1983_v25 = vrot.slane %v1969_v33, %v7630_v48  ;;  %v4284_v21 = vcombine.low %v4259_v7, %v4267_v57  ;;  %v4285_v55 = vcombine.high %v4259_v7, %v4267_v57  ;;  %v8258_v7 = vpop.permute.xlu0 %2044 }
 0x336   : > { %v4300_v2 = vcombine.low %v4275_v42, %v4283_v8  ;;  %v4301_v15 = vcombine.high %v4275_v42, %v4283_v8  ;;  %v1748_v57 = vcombine.low %v7516_v27, %v8134_v16  ;;  %v1749_v42 = vcombine.high %v7516_v27, %v8134_v16 }
 0x337   : > { %v1984_v9 = vcombine.low %v1960_v18, %v1976_v0  ;;  %v1985_v39 = vcombine.high %v1960_v18, %v1976_v0  ;;  %v2000_v36 = vcombine.low %v1967_v40, %v1983_v25  ;;  %v2001_v24 = vcombine.high %v1967_v40, %v1983_v25 }
 0x338   : > { %v4292_v10 = vrot.slane %v4284_v21, %v7634_v23  ;;  %v4299_v20 = vrot.slane %v4285_v55, %v7634_v23  ;;  %v4308_v54 = vrot.slane %v4300_v2, %v7634_v23  ;;  %v4315_v47 = vrot.slane %v4301_v15, %v7634_v23 }
 0x339   : > { %v1992_v19 = vrot.slane %v1984_v9, %v7634_v23  ;;  %v1999_v17 = vrot.slane %v1985_v39, %v7634_v23  ;;  %v2008_v49 = vrot.slane %v2000_v36, %v7634_v23  ;;  %v2015_v52 = vrot.slane %v2001_v24, %v7634_v23 }
 0x33a   : > { %v4316_v28 = vcombine.low %v4292_v10, %v4308_v54  ;;  %v4317_v35 = vcombine.high %v4292_v10, %v4308_v54  ;;  %v4318_v59 = vcombine.low %v4299_v20, %v4315_v47  ;;  %v4319_v60 = vcombine.high %v4299_v20, %v4315_v47 }
 0x33b   : > { %v4320_v11 = vcombine.low %v1992_v19, %v1999_v17  ;;  %v6509_v45 = vcombine.high %v1992_v19, %v1999_v17  ;;  %v4336_v5 = vcombine.low %v2008_v49, %v2015_v52  ;;  %v6510_v58 = vcombine.high %v2008_v49, %v2015_v52  ;;  %v8284_v17 = vpop.permute.xlu0 %2056 }
 0x33c   : > { %v6709_v22 = vpack.c.bf16 %v4316_v28, %v4316_v28  ;;  %v6725_v62 = vpack.c.bf16 %v4317_v35, %v4317_v35  ;;  %v6741_v6 = vpack.c.bf16 %v4318_v59, %v4318_v59  ;;  %v6757_v26 = vpack.c.bf16 %v4319_v60, %v4319_v60 }
 0x33d   : > { %v4327_v13 = vrot.slane %v4320_v11, %v7630_v48  ;;  %v4335_v1 = vrot.slane %v6509_v45, %v7630_v48  ;;  %v4343_v12 = vrot.slane %v4336_v5, %v7630_v48  ;;  %v4351_v33 = vrot.slane %v6510_v58, %v7630_v48 }
 0x33e   : > { %4659 = vst.msk [vmem:[%s7696_s20 + $0x38] sm:$0xf] %vm4644_vm1, %v6709_v22  ;;  %4675 = vst.msk [vmem:[%s7696_s20 + $0x78] sm:$0xf] %vm4644_vm1, %v6725_v62  ;;  %v1764_v8 = vcombine.low %v8124_v32, %v8164_v3  ;;  %v1765_v18 = vcombine.high %v8124_v32, %v8164_v3  ;;  %v1756_v55 = vrot.slane %v1748_v57, %v7630_v48 }
 0x33f   : > { %4691 = vst.msk [vmem:[%s7696_s20 + $0xb8] sm:$0xf] %vm4644_vm1, %v6741_v6  ;;  %4707 = vst.msk [vmem:[%s7696_s20 + $0xf8] sm:$0xf] %vm4644_vm1, %v6757_v26  ;;  %v4352_v40 = vcombine.low %v4327_v13, %v4335_v1  ;;  %v4353_v0 = vcombine.high %v4327_v13, %v4335_v1  ;;  %v4368_v25 = vcombine.low %v4343_v12, %v4351_v33  ;;  %v8290_v6 = vpop.permute.xlu1 %2046 }
 0x340   : > { %v4369_v21 = vcombine.high %v4343_v12, %v4351_v33  ;;  %v1763_v2 = vrot.slane %v1749_v42, %v7630_v48  ;;  %v1772_v15 = vrot.slane %v1764_v8, %v7630_v48  ;;  %v1779_v9 = vrot.slane %v1765_v18, %v7630_v48 }
 0x341   : > { %v4360_v27 = vrot.slane %v4352_v40, %v7634_v23  ;;  %v4367_v16 = vrot.slane %v4353_v0, %v7634_v23  ;;  %v4376_v39 = vrot.slane %v4368_v25, %v7634_v23  ;;  %v1816_v26 = vcombine.low %v7520_v30, %v8178_v50  ;;  %v2089_v0 = vpop.permute.xlu0 %2088 }
 0x342   : > { %v4383_v32 = vrot.slane %v4369_v21, %v7634_v23  ;;  %v1780_v3 = vcombine.low %v1756_v55, %v1772_v15  ;;  %v1781_v36 = vcombine.high %v1756_v55, %v1772_v15  ;;  %v1796_v24 = vcombine.low %v1763_v2, %v1779_v9 }
 0x343   : > { %v1797_v10 = vcombine.high %v1763_v2, %v1779_v9  ;;  %v4384_v20 = vcombine.low %v4360_v27, %v4376_v39  ;;  %v4385_v54 = vcombine.high %v4360_v27, %v4376_v39  ;;  %v1817_v13 = vcombine.high %v7520_v30, %v8178_v50 }
 0x344   : > { %v4386_v47 = vcombine.low %v4367_v16, %v4383_v32  ;;  %v4387_v19 = vcombine.high %v4367_v16, %v4383_v32  ;;  %v1788_v49 = vrot.slane %v1780_v3, %v7634_v23  ;;  %v1795_v52 = vrot.slane %v1781_v36, %v7634_v23  ;;  %v8320_v3 = vpop.permute.xlu1 %2058 }
 0x345   : > { %v1804_v28 = vrot.slane %v1796_v24, %v7634_v23  ;;  %v1811_v35 = vrot.slane %v1797_v10, %v7634_v23  ;;  %v6710_v59 = vpack.c.bf16 %v4384_v20, %v4384_v20  ;;  %v6726_v60 = vpack.c.bf16 %v4385_v54, %v4385_v54 }
 0x346   : > { %v6742_v11 = vpack.c.bf16 %v4386_v47, %v4386_v47  ;;  %v6758_v45 = vpack.c.bf16 %v4387_v19, %v4387_v19  ;;  %v4116_v5 = vcombine.low %v1788_v49, %v1795_v52  ;;  %v6503_v58 = vcombine.high %v1788_v49, %v1795_v52 }
 0x347   : > { %v4132_v22 = vcombine.low %v1804_v28, %v1811_v35  ;;  %v6504_v62 = vcombine.high %v1804_v28, %v1811_v35  ;;  %4660 = vst.msk [vmem:[%s7696_s20 + $0x3c] sm:$0xf] %vm4644_vm1, %v6710_v59  ;;  %4676 = vst.msk [vmem:[%s7696_s20 + $0x7c] sm:$0xf] %vm4644_vm1, %v6726_v60  ;;  %v1832_v1 = vcombine.low %v8162_v14, %v8188_v29  ;;  %v2121_v60 = vpop.permute.xlu0 %2120 }
 0x348   : > { %4692 = vst.msk [vmem:[%s7696_s20 + $0xbc] sm:$0xf] %vm4644_vm1, %v6742_v11  ;;  %4708 = vst.msk [vmem:[%s7696_s20 + $0xfc] sm:$0xf] %vm4644_vm1, %v6758_v45  ;;  %v1833_v12 = vcombine.high %v8162_v14, %v8188_v29  ;;  %v4123_v33 = vrot.slane %v4116_v5, %v7630_v48  ;;  %v4131_v57 = vrot.slane %v6503_v58, %v7630_v48 }
 0x349   : > { %v4139_v42 = vrot.slane %v4132_v22, %v7630_v48  ;;  %v4147_v8 = vrot.slane %v6504_v62, %v7630_v48  ;;  %v1824_v18 = vrot.slane %v1816_v26, %v7630_v48  ;;  %v1831_v40 = vrot.slane %v1817_v13, %v7630_v48 }
 0x34a   : > { %v1840_v30 = vrot.slane %v1832_v1, %v7630_v48  ;;  %v1847_v50 = vrot.slane %v1833_v12, %v7630_v48  ;;  %v4148_v25 = vcombine.low %v4123_v33, %v4131_v57  ;;  %v4149_v21 = vcombine.high %v4123_v33, %v4131_v57 }
 0x34b   : > { %v4164_v14 = vcombine.low %v4139_v42, %v4147_v8  ;;  %v4165_v29 = vcombine.high %v4139_v42, %v4147_v8  ;;  %v2348_v1 = vcombine.low %v7646_v37, %v2089_v0  ;;  %v2349_v12 = vcombine.high %v7646_v37, %v2089_v0  ;;  %v2091_v42 = vpop.permute.xlu1 %2090 }
 0x34c   : > { %v1848_v55 = vcombine.low %v1824_v18, %v1840_v30  ;;  %v1849_v2 = vcombine.high %v1824_v18, %v1840_v30  ;;  %v1864_v15 = vcombine.low %v1831_v40, %v1847_v50  ;;  %v1865_v9 = vcombine.high %v1831_v40, %v1847_v50 }
 0x34d   : > { %v4156_v27 = vrot.slane %v4148_v25, %v7634_v23  ;;  %v4163_v16 = vrot.slane %v4149_v21, %v7634_v23  ;;  %v4172_v39 = vrot.slane %v4164_v14, %v7634_v23  ;;  %v4179_v32 = vrot.slane %v4165_v29, %v7634_v23 }
 0x34e   : > { %v1856_v36 = vrot.slane %v1848_v55, %v7634_v23  ;;  %v1863_v24 = vrot.slane %v1849_v2, %v7634_v23  ;;  %v1872_v10 = vrot.slane %v1864_v15, %v7634_v23  ;;  %v1879_v20 = vrot.slane %v1865_v9, %v7634_v23 }
 0x34f   : > { %v4180_v54 = vcombine.low %v4156_v27, %v4172_v39  ;;  %v4181_v47 = vcombine.high %v4156_v27, %v4172_v39  ;;  %v4182_v19 = vcombine.low %v4163_v16, %v4179_v32  ;;  %v4183_v49 = vcombine.high %v4163_v16, %v4179_v32 }
 0x350   : > { %v4184_v52 = vcombine.low %v1856_v36, %v1863_v24  ;;  %v6505_v28 = vcombine.high %v1856_v36, %v1863_v24  ;;  %v4200_v35 = vcombine.low %v1872_v10, %v1879_v20  ;;  %v6506_v59 = vcombine.high %v1872_v10, %v1879_v20  ;;  %v8350_v36 = vpop.permute.xlu0 %2052 }
 0x351   : > { %v6707_v11 = vpack.c.bf16 %v4180_v54, %v4180_v54  ;;  %v6723_v45 = vpack.c.bf16 %v4181_v47, %v4181_v47  ;;  %v6739_v5 = vpack.c.bf16 %v4182_v19, %v4182_v19  ;;  %v6755_v58 = vpack.c.bf16 %v4183_v49, %v4183_v49  ;;  %v2123_v47 = vpop.permute.xlu1 %2122 }
 0x352   : > { %v4191_v22 = vrot.slane %v4184_v52, %v7630_v48  ;;  %v4199_v62 = vrot.slane %v6505_v28, %v7630_v48  ;;  %v4207_v26 = vrot.slane %v4200_v35, %v7630_v48  ;;  %v4215_v13 = vrot.slane %v6506_v59, %v7630_v48 }
 0x353   : > { %4657 = vst.msk [vmem:[%s7696_s20 + $0x30] sm:$0xf] %vm4644_vm1, %v6707_v11  ;;  %4673 = vst.msk [vmem:[%s7696_s20 + $0x70] sm:$0xf] %vm4644_vm1, %v6723_v45  ;;  %v2364_v33 = vcombine.low %v8284_v17, %v2121_v60  ;;  %v2365_v57 = vcombine.high %v8284_v17, %v2121_v60  ;;  %v2356_v50 = vrot.slane %v2348_v1, %v7630_v48 }
 0x354   : > { %4689 = vst.msk [vmem:[%s7696_s20 + $0xb0] sm:$0xf] %vm4644_vm1, %v6739_v5  ;;  %4705 = vst.msk [vmem:[%s7696_s20 + $0xf0] sm:$0xf] %vm4644_vm1, %v6755_v58  ;;  %v4216_v8 = vcombine.low %v4191_v22, %v4199_v62  ;;  %v4217_v18 = vcombine.high %v4191_v22, %v4199_v62  ;;  %v4232_v40 = vcombine.low %v4207_v26, %v4215_v13 }
 0x355   : > { %v4233_v30 = vcombine.high %v4207_v26, %v4215_v13  ;;  %v2363_v25 = vrot.slane %v2349_v12, %v7630_v48  ;;  %v2372_v21 = vrot.slane %v2364_v33, %v7630_v48  ;;  %v2379_v14 = vrot.slane %v2365_v57, %v7630_v48 }
 0x356   : > { %v4224_v29 = vrot.slane %v4216_v8, %v7634_v23  ;;  %v4231_v37 = vrot.slane %v4217_v18, %v7634_v23  ;;  %v4240_v0 = vrot.slane %v4232_v40, %v7634_v23  ;;  %v2416_v45 = vcombine.low %v7676_v38, %v2091_v42 }
 0x357   : > { %v4247_v17 = vrot.slane %v4233_v30, %v7634_v23  ;;  %v2380_v55 = vcombine.low %v2356_v50, %v2372_v21  ;;  %v2381_v2 = vcombine.high %v2356_v50, %v2372_v21  ;;  %v2396_v15 = vcombine.low %v2363_v25, %v2379_v14 }
 0x358   : > { %v2397_v9 = vcombine.high %v2363_v25, %v2379_v14  ;;  %v4248_v27 = vcombine.low %v4224_v29, %v4240_v0  ;;  %v4249_v16 = vcombine.high %v4224_v29, %v4240_v0  ;;  %v2417_v5 = vcombine.high %v7676_v38, %v2091_v42  ;;  %v2085_v42 = vpop.permute.xlu0 %2084 }
 0x359   : > { %v4250_v39 = vcombine.low %v4231_v37, %v4247_v17  ;;  %v4251_v32 = vcombine.high %v4231_v37, %v4247_v17  ;;  %v2388_v24 = vrot.slane %v2380_v55, %v7634_v23  ;;  %v2395_v10 = vrot.slane %v2381_v2, %v7634_v23  ;;  %v8380_v17 = vpop.permute.xlu1 %2054 }
 0x35a   : > { %v2404_v20 = vrot.slane %v2396_v15, %v7634_v23  ;;  %v2411_v54 = vrot.slane %v2397_v9, %v7634_v23  ;;  %v6708_v19 = vpack.c.bf16 %v4248_v27, %v4248_v27  ;;  %v6724_v49 = vpack.c.bf16 %v4249_v16, %v4249_v16 }
 0x35b   : > { %v6740_v52 = vpack.c.bf16 %v4250_v39, %v4250_v39  ;;  %v6756_v28 = vpack.c.bf16 %v4251_v32, %v4251_v32  ;;  %v4845_v35 = vcombine.low %v2388_v24, %v2395_v10  ;;  %v6579_v59 = vcombine.high %v2388_v24, %v2395_v10 }
 0x35c   : > { %v4861_v60 = vcombine.low %v2404_v20, %v2411_v54  ;;  %v6580_v11 = vcombine.high %v2404_v20, %v2411_v54  ;;  %4658 = vst.msk [vmem:[%s7696_s20 + $0x34] sm:$0xf] %vm4644_vm1, %v6708_v19  ;;  %4674 = vst.msk [vmem:[%s7696_s20 + $0x74] sm:$0xf] %vm4644_vm1, %v6724_v49  ;;  %v2432_v58 = vcombine.low %v8320_v3, %v2123_v47 }
 0x35d   : > { %4690 = vst.msk [vmem:[%s7696_s20 + $0xb4] sm:$0xf] %vm4644_vm1, %v6740_v52  ;;  %4706 = vst.msk [vmem:[%s7696_s20 + $0xf4] sm:$0xf] %vm4644_vm1, %v6756_v28  ;;  %v2433_v22 = vcombine.high %v8320_v3, %v2123_v47  ;;  %v4852_v62 = vrot.slane %v4845_v35, %v7630_v48  ;;  %v4860_v26 = vrot.slane %v6579_v59, %v7630_v48  ;;  %v2117_v47 = vpop.permute.xlu0 %2116  ;;  %s7029_s20 = scalar_lea.vmem %s8864_s10, 512 }
 0x35e   : > { %v4868_v13 = vrot.slane %v4861_v60, %v7630_v48  ;;  %v4876_v1 = vrot.slane %v6580_v11, %v7630_v48  ;;  %v2424_v12 = vrot.slane %v2416_v45, %v7630_v48  ;;  %v2431_v33 = vrot.slane %v2417_v5, %v7630_v48  ;;  %p7030_p12 = scmp.ne.s32.totalorder %s8864_s10, %s7029_s20  ;;  %p7037_p2 = scmp.lt.s32.totalorder %s7035_s30, %s7029_s20 }
 0x35f   : > { %v2440_v57 = vrot.slane %v2432_v58, %v7630_v48  ;;  %v2447_v38 = vrot.slane %v2433_v22, %v7630_v48  ;;  %v4877_v8 = vcombine.low %v4852_v62, %v4860_v26  ;;  %v4878_v18 = vcombine.high %v4852_v62, %v4860_v26  ;;  %v2087_v62 = vpop.permute.xlu1 %2086 }
 0x360   : > { %v4893_v3 = vcombine.low %v4868_v13, %v4876_v1  ;;  %v4894_v40 = vcombine.high %v4868_v13, %v4876_v1  ;;  %v2212_v45 = vcombine.low %v7708_v43, %v2085_v42  ;;  %v2213_v5 = vcombine.high %v7708_v43, %v2085_v42  ;;  %p7031_p13 = pnand %p7030_p12, %p7197_p4  ;;  %p7038_p3 = por %p7037_p2, %p7036_p1 }
 0x361   : > { %v2448_v30 = vcombine.low %v2424_v12, %v2440_v57  ;;  %v2449_v50 = vcombine.high %v2424_v12, %v2440_v57  ;;  %v2464_v25 = vcombine.low %v2431_v33, %v2447_v38  ;;  %v2465_v21 = vcombine.high %v2431_v33, %v2447_v38 }
 0x362   : > { %v4885_v14 = vrot.slane %v4877_v8, %v7634_v23  ;;  %v4892_v29 = vrot.slane %v4878_v18, %v7634_v23  ;;  %v4901_v37 = vrot.slane %v4893_v3, %v7634_v23  ;;  %v4908_v0 = vrot.slane %v4894_v40, %v7634_v23  ;;  %p7032_p0 = pneg %p7031_p13 }
 0x363   : > { %v2456_v55 = vrot.slane %v2448_v30, %v7634_v23  ;;  %v2463_v2 = vrot.slane %v2449_v50, %v7634_v23  ;;  %v2472_v15 = vrot.slane %v2464_v25, %v7634_v23  ;;  %v2479_v9 = vrot.slane %v2465_v21, %v7634_v23 }
 0x364   : > { %v4909_v27 = vcombine.low %v4885_v14, %v4901_v37  ;;  %v4910_v16 = vcombine.high %v4885_v14, %v4901_v37  ;;  %v4911_v39 = vcombine.low %v4892_v29, %v4908_v0  ;;  %v4912_v32 = vcombine.high %v4892_v29, %v4908_v0  ;;  %v8417_v37 = vpop.permute.xlu0 %2064  ;;  %p7039_p5 = pnand %p7038_p3, %p7032_p0 }
 0x365   : > { %v4913_v24 = vcombine.low %v2456_v55, %v2463_v2  ;;  %v6581_v10 = vcombine.high %v2456_v55, %v2463_v2  ;;  %v4929_v20 = vcombine.low %v2472_v15, %v2479_v9  ;;  %v6582_v54 = vcombine.high %v2472_v15, %v2479_v9  ;;  %v2119_v9 = vpop.permute.xlu1 %2118 }
 0x366   : > { %v6761_v19 = vpack.c.bf16 %v4909_v27, %v4909_v27  ;;  %v6777_v49 = vpack.c.bf16 %v4910_v16, %v4910_v16  ;;  %v6793_v52 = vpack.c.bf16 %v4911_v39, %v4911_v39  ;;  %v6809_v28 = vpack.c.bf16 %v4912_v32, %v4912_v32  ;;  %v8423_v27 = vpop.f32.mrb[0].mxu1 }
 0x367   : > { %v4920_v35 = vrot.slane %v4913_v24, %v7630_v48  ;;  %v4928_v59 = vrot.slane %v6581_v10, %v7630_v48  ;;  %v4936_v60 = vrot.slane %v4929_v20, %v7630_v48  ;;  %v4944_v11 = vrot.slane %v6582_v54, %v7630_v48  ;;  %v8425_v10 = vpop.f32.mrb[1].mxu1 }
 0x368   : > { %6055 = vst.msk [vmem:[%s8391_s23 + $0x8] sm:$0xf] %vm4644_vm1, %v6761_v19  ;;  %6071 = vst.msk [vmem:[%s8391_s23 + $0x48] sm:$0xf] %vm4644_vm1, %v6777_v49  ;;  %v2228_v58 = vcombine.low %v8350_v36, %v2117_v47  ;;  %v2229_v22 = vcombine.high %v8350_v36, %v2117_v47  ;;  %v2220_v33 = vrot.slane %v2212_v45, %v7630_v48  ;;  %v8427_v49 = vpop.f32.mrb[2].mxu1 }
 0x369   : > { %6087 = vst.msk [vmem:[%s8391_s23 + $0x88] sm:$0xf] %vm4644_vm1, %v6793_v52  ;;  %6103 = vst.msk [vmem:[%s8391_s23 + $0xc8] sm:$0xf] %vm4644_vm1, %v6809_v28  ;;  %v4945_v26 = vcombine.low %v4920_v35, %v4928_v59  ;;  %v4946_v13 = vcombine.high %v4920_v35, %v4928_v59  ;;  %v4961_v1 = vcombine.low %v4936_v60, %v4944_v11 }
 0x36a   : > { %v4962_v12 = vcombine.high %v4936_v60, %v4944_v11  ;;  %v2227_v57 = vrot.slane %v2213_v5, %v7630_v48  ;;  %v2236_v38 = vrot.slane %v2228_v58, %v7630_v48  ;;  %v2243_v8 = vrot.slane %v2229_v22, %v7630_v48 }
 0x36b   : > { %v4953_v18 = vrot.slane %v4945_v26, %v7634_v23  ;;  %v4960_v43 = vrot.slane %v4946_v13, %v7634_v23  ;;  %v4969_v42 = vrot.slane %v4961_v1, %v7634_v23  ;;  %v2280_v52 = vcombine.low %v7742_v63, %v2087_v62 }
 0x36c   : > { %v4976_v36 = vrot.slane %v4962_v12, %v7634_v23  ;;  %v2244_v3 = vcombine.low %v2220_v33, %v2236_v38  ;;  %v2245_v40 = vcombine.high %v2220_v33, %v2236_v38  ;;  %v2260_v30 = vcombine.low %v2227_v57, %v2243_v8 }
 0x36d   : > { %v2261_v50 = vcombine.high %v2227_v57, %v2243_v8  ;;  %v4977_v25 = vcombine.low %v4953_v18, %v4969_v42  ;;  %v4978_v21 = vcombine.high %v4953_v18, %v4969_v42  ;;  %v2281_v28 = vcombine.high %v7742_v63, %v2087_v62  ;;  %v2097_v62 = vpop.permute.xlu0 %2096 }
 0x36e   : > { %v4979_v14 = vcombine.low %v4960_v43, %v4976_v36  ;;  %v4980_v29 = vcombine.high %v4960_v43, %v4976_v36  ;;  %v2252_v0 = vrot.slane %v2244_v3, %v7634_v23  ;;  %v2259_v55 = vrot.slane %v2245_v40, %v7634_v23  ;;  %v8453_v3 = vpop.permute.xlu1 %2066 }
 0x36f   : > { %v2268_v2 = vrot.slane %v2260_v30, %v7634_v23  ;;  %v2275_v15 = vrot.slane %v2261_v50, %v7634_v23  ;;  %v6762_v16 = vpack.c.bf16 %v4977_v25, %v4977_v25  ;;  %v6778_v39 = vpack.c.bf16 %v4978_v21, %v4978_v21  ;;  %v8459_v21 = vpop.f32.mrb[3].mxu1 }
 0x370   : > { %v6794_v32 = vpack.c.bf16 %v4979_v14, %v4979_v14  ;;  %v6810_v24 = vpack.c.bf16 %v4980_v29, %v4980_v29  ;;  %v4709_v20 = vcombine.low %v2252_v0, %v2259_v55  ;;  %v6575_v54 = vcombine.high %v2252_v0, %v2259_v55 }
 0x371   : > { %v4725_v47 = vcombine.low %v2268_v2, %v2275_v15  ;;  %v6576_v19 = vcombine.high %v2268_v2, %v2275_v15  ;;  %6056 = vst.msk [vmem:[%s8391_s23 + $0xc] sm:$0xf] %vm4644_vm1, %v6762_v16  ;;  %6072 = vst.msk [vmem:[%s8391_s23 + $0x4c] sm:$0xf] %vm4644_vm1, %v6778_v39  ;;  %v2296_v35 = vcombine.low %v8380_v17, %v2119_v9  ;;  %v2129_v39 = vpop.permute.xlu0 %2128 }
 0x372   : > { %6088 = vst.msk [vmem:[%s8391_s23 + $0x8c] sm:$0xf] %vm4644_vm1, %v6794_v32  ;;  %6104 = vst.msk [vmem:[%s8391_s23 + $0xcc] sm:$0xf] %vm4644_vm1, %v6810_v24  ;;  %v2297_v59 = vcombine.high %v8380_v17, %v2119_v9  ;;  %v4716_v60 = vrot.slane %v4709_v20, %v7630_v48  ;;  %v4724_v11 = vrot.slane %v6575_v54, %v7630_v48 }
 0x373   : > { %v4732_v45 = vrot.slane %v4725_v47, %v7630_v48  ;;  %v4740_v5 = vrot.slane %v6576_v19, %v7630_v48  ;;  %v2288_v58 = vrot.slane %v2280_v52, %v7630_v48  ;;  %v2295_v22 = vrot.slane %v2281_v28, %v7630_v48  ;;  %v8461_v47 = vpop.f32.mrb[4].mxu1 }
 0x374   : > { %v2304_v26 = vrot.slane %v2296_v35, %v7630_v48  ;;  %v2311_v63 = vrot.slane %v2297_v59, %v7630_v48  ;;  %v4741_v13 = vcombine.low %v4716_v60, %v4724_v11  ;;  %v4742_v1 = vcombine.high %v4716_v60, %v4724_v11  ;;  %v8467_v59 = vpop.f32.mrb[5].mxu1 }
 0x375   : > { %v4757_v17 = vcombine.low %v4732_v45, %v4740_v5  ;;  %v4758_v12 = vcombine.high %v4732_v45, %v4740_v5  ;;  %v2620_v60 = vcombine.low %v7787_v44, %v2097_v62  ;;  %v2621_v11 = vcombine.high %v7787_v44, %v2097_v62 }
 0x376   : > { %v2312_v33 = vcombine.low %v2288_v58, %v2304_v26  ;;  %v2313_v57 = vcombine.high %v2288_v58, %v2304_v26  ;;  %v2328_v38 = vcombine.low %v2295_v22, %v2311_v63  ;;  %v2329_v8 = vcombine.high %v2295_v22, %v2311_v63  ;;  %v2099_v58 = vpop.permute.xlu1 %2098  ;;  %v8481_v22 = vpop.f32.mrb[6].mxu1 }
 0x377   : > { %v4749_v18 = vrot.slane %v4741_v13, %v7634_v23  ;;  %v4756_v43 = vrot.slane %v4742_v1, %v7634_v23  ;;  %v4765_v42 = vrot.slane %v4757_v17, %v7634_v23  ;;  %v4772_v36 = vrot.slane %v4758_v12, %v7634_v23  ;;  %v8483_v17 = vpop.f32.mrb[7].mxu1 }
 0x378   : > { %v2320_v40 = vrot.slane %v2312_v33, %v7634_v23  ;;  %v2327_v30 = vrot.slane %v2313_v57, %v7634_v23  ;;  %v2336_v50 = vrot.slane %v2328_v38, %v7634_v23  ;;  %v2343_v25 = vrot.slane %v2329_v8, %v7634_v23 }
 0x379   : > { %v4773_v14 = vcombine.low %v4749_v18, %v4765_v42  ;;  %v4774_v29 = vcombine.high %v4749_v18, %v4765_v42  ;;  %v4775_v0 = vcombine.low %v4756_v43, %v4772_v36  ;;  %v4776_v55 = vcombine.high %v4756_v43, %v4772_v36 }
 0x37a   : > { %v4777_v2 = vcombine.low %v2320_v40, %v2327_v30  ;;  %v6577_v15 = vcombine.high %v2320_v40, %v2327_v30  ;;  %v4793_v9 = vcombine.low %v2336_v50, %v2343_v25  ;;  %v6578_v16 = vcombine.high %v2336_v50, %v2343_v25 }
 0x37b   : > { %v6759_v32 = vpack.c.bf16 %v4773_v14, %v4773_v14  ;;  %v6775_v24 = vpack.c.bf16 %v4774_v29, %v4774_v29  ;;  %v6791_v20 = vpack.c.bf16 %v4775_v0, %v4775_v0  ;;  %v6807_v54 = vpack.c.bf16 %v4776_v55, %v4776_v55  ;;  %v8493_v14 = vpop.permute.xlu0 %2060 }
 0x37c   : > { %v4784_v19 = vrot.slane %v4777_v2, %v7630_v48  ;;  %v4792_v52 = vrot.slane %v6577_v15, %v7630_v48  ;;  %v4800_v28 = vrot.slane %v4793_v9, %v7630_v48  ;;  %v4808_v35 = vrot.slane %v6578_v16, %v7630_v48  ;;  %v2131_v15 = vpop.permute.xlu1 %2130 }
 0x37d   : > { %6053 = vst.msk [vmem:[%s8391_s23] sm:$0xf] %vm4644_vm1, %v6759_v32  ;;  %6069 = vst.msk [vmem:[%s8391_s23 + $0x40] sm:$0xf] %vm4644_vm1, %v6775_v24  ;;  %v2636_v45 = vcombine.low %v8417_v37, %v2129_v39  ;;  %v2637_v5 = vcombine.high %v8417_v37, %v2129_v39  ;;  %v2628_v12 = vrot.slane %v2620_v60, %v7630_v48 }
 0x37e   : > { %6085 = vst.msk [vmem:[%s8391_s23 + $0x80] sm:$0xf] %vm4644_vm1, %v6791_v20  ;;  %6101 = vst.msk [vmem:[%s8391_s23 + $0xc0] sm:$0xf] %vm4644_vm1, %v6807_v54  ;;  %v4809_v26 = vcombine.low %v4784_v19, %v4792_v52  ;;  %v4810_v63 = vcombine.high %v4784_v19, %v4792_v52  ;;  %v4825_v13 = vcombine.low %v4800_v28, %v4808_v35 }
 0x37f   : > { %v4826_v1 = vcombine.high %v4800_v28, %v4808_v35  ;;  %v2635_v33 = vrot.slane %v2621_v11, %v7630_v48  ;;  %v2644_v57 = vrot.slane %v2636_v45, %v7630_v48  ;;  %v2651_v44 = vrot.slane %v2637_v5, %v7630_v48 }
 0x380   : > { %v4817_v62 = vrot.slane %v4809_v26, %v7634_v23  ;;  %v4824_v37 = vrot.slane %v4810_v63, %v7634_v23  ;;  %v4833_v38 = vrot.slane %v4825_v13, %v7634_v23  ;;  %v2688_v52 = vcombine.low %v7826_v4, %v2099_v58 }
 0x381   : > { %v4840_v8 = vrot.slane %v4826_v1, %v7634_v23  ;;  %v2652_v18 = vcombine.low %v2628_v12, %v2644_v57  ;;  %v2653_v43 = vcombine.high %v2628_v12, %v2644_v57  ;;  %v2668_v42 = vcombine.low %v2635_v33, %v2651_v44 }
 0x382   : > { %v2669_v36 = vcombine.high %v2635_v33, %v2651_v44  ;;  %v4841_v40 = vcombine.low %v4817_v62, %v4833_v38  ;;  %v4842_v30 = vcombine.high %v4817_v62, %v4833_v38  ;;  %v2689_v28 = vcombine.high %v7826_v4, %v2099_v58  ;;  %v2093_v58 = vpop.permute.xlu0 %2092 }
 0x383   : > { %v4843_v50 = vcombine.low %v4824_v37, %v4840_v8  ;;  %v4844_v25 = vcombine.high %v4824_v37, %v4840_v8  ;;  %v2660_v29 = vrot.slane %v2652_v18, %v7634_v23  ;;  %v2667_v0 = vrot.slane %v2653_v43, %v7634_v23 }
 0x384   : > { %v2676_v55 = vrot.slane %v2668_v42, %v7634_v23  ;;  %v2683_v2 = vrot.slane %v2669_v36, %v7634_v23  ;;  %v6760_v9 = vpack.c.bf16 %v4841_v40, %v4841_v40  ;;  %v6776_v16 = vpack.c.bf16 %v4842_v30, %v4842_v30  ;;  %v8523_v36 = vpop.permute.xlu1 %2062 }
 0x385   : > { %v6792_v39 = vpack.c.bf16 %v4843_v50, %v4843_v50  ;;  %v6808_v32 = vpack.c.bf16 %v4844_v25, %v4844_v25  ;;  %v5117_v24 = vcombine.low %v2660_v29, %v2667_v0  ;;  %v6587_v20 = vcombine.high %v2660_v29, %v2667_v0 }
 0x386   : > { %v5133_v54 = vcombine.low %v2676_v55, %v2683_v2  ;;  %v6588_v19 = vcombine.high %v2676_v55, %v2683_v2  ;;  %6054 = vst.msk [vmem:[%s8391_s23 + $0x4] sm:$0xf] %vm4644_vm1, %v6760_v9  ;;  %6070 = vst.msk [vmem:[%s8391_s23 + $0x44] sm:$0xf] %vm4644_vm1, %v6776_v16  ;;  %v2704_v35 = vcombine.low %v8453_v3, %v2131_v15 }
 0x387   : > { %6086 = vst.msk [vmem:[%s8391_s23 + $0x84] sm:$0xf] %vm4644_vm1, %v6792_v39  ;;  %6102 = vst.msk [vmem:[%s8391_s23 + $0xc4] sm:$0xf] %vm4644_vm1, %v6808_v32  ;;  %v2705_v60 = vcombine.high %v8453_v3, %v2131_v15  ;;  %v5124_v11 = vrot.slane %v5117_v24, %v7630_v48  ;;  %v5132_v45 = vrot.slane %v6587_v20, %v7630_v48  ;;  %v2125_v32 = vpop.permute.xlu0 %2124 }
 0x388   : > { %v5140_v5 = vrot.slane %v5133_v54, %v7630_v48  ;;  %v5148_v26 = vrot.slane %v6588_v19, %v7630_v48  ;;  %v2696_v63 = vrot.slane %v2688_v52, %v7630_v48  ;;  %v2703_v13 = vrot.slane %v2689_v28, %v7630_v48 }
 0x389   : > { %v2712_v1 = vrot.slane %v2704_v35, %v7630_v48  ;;  %v2719_v4 = vrot.slane %v2705_v60, %v7630_v48  ;;  %v5149_v12 = vcombine.low %v5124_v11, %v5132_v45  ;;  %v5150_v33 = vcombine.high %v5124_v11, %v5132_v45 }
 0x38a   : > { %v5165_v3 = vcombine.low %v5140_v5, %v5148_v26  ;;  %v5166_v57 = vcombine.high %v5140_v5, %v5148_v26  ;;  %v2484_v11 = vcombine.low %v7872_v41, %v2093_v58  ;;  %v2485_v45 = vcombine.high %v7872_v41, %v2093_v58 }
 0x38b   : > { %v2720_v44 = vcombine.low %v2696_v63, %v2712_v1  ;;  %v2721_v62 = vcombine.high %v2696_v63, %v2712_v1  ;;  %v2736_v37 = vcombine.low %v2703_v13, %v2719_v4  ;;  %v2737_v38 = vcombine.high %v2703_v13, %v2719_v4  ;;  %v2095_v63 = vpop.permute.xlu1 %2094 }
 0x38c   : > { %v5157_v8 = vrot.slane %v5149_v12, %v7634_v23  ;;  %v5164_v18 = vrot.slane %v5150_v33, %v7634_v23  ;;  %v5173_v43 = vrot.slane %v5165_v3, %v7634_v23  ;;  %v5180_v42 = vrot.slane %v5166_v57, %v7634_v23 }
 0x38d   : > { %v2728_v40 = vrot.slane %v2720_v44, %v7634_v23  ;;  %v2735_v30 = vrot.slane %v2721_v62, %v7634_v23  ;;  %v2744_v50 = vrot.slane %v2736_v37, %v7634_v23  ;;  %v2751_v25 = vrot.slane %v2737_v38, %v7634_v23 }
 0x38e   : > { %v5181_v29 = vcombine.low %v5157_v8, %v5173_v43  ;;  %v5182_v0 = vcombine.high %v5157_v8, %v5173_v43  ;;  %v5183_v55 = vcombine.low %v5164_v18, %v5180_v42  ;;  %v5184_v2 = vcombine.high %v5164_v18, %v5180_v42 }
 0x38f   : > { %v5185_v15 = vcombine.low %v2728_v40, %v2735_v30  ;;  %v6589_v9 = vcombine.high %v2728_v40, %v2735_v30  ;;  %v5201_v16 = vcombine.low %v2744_v50, %v2751_v25  ;;  %v6590_v39 = vcombine.high %v2744_v50, %v2751_v25  ;;  %v8553_v50 = vpop.permute.xlu0 %2072 }
 0x390   : > { %v6765_v24 = vpack.c.bf16 %v5181_v29, %v5181_v29  ;;  %v6781_v20 = vpack.c.bf16 %v5182_v0, %v5182_v0  ;;  %v6797_v54 = vpack.c.bf16 %v5183_v55, %v5183_v55  ;;  %v6813_v19 = vpack.c.bf16 %v5184_v2, %v5184_v2  ;;  %v2127_v2 = vpop.permute.xlu1 %2126 }
 0x391   : > { %v5192_v52 = vrot.slane %v5185_v15, %v7630_v48  ;;  %v5200_v28 = vrot.slane %v6589_v9, %v7630_v48  ;;  %v5208_v35 = vrot.slane %v5201_v16, %v7630_v48  ;;  %v5216_v60 = vrot.slane %v6590_v39, %v7630_v48 }
 0x392   : > { %6059 = vst.msk [vmem:[%s8391_s23 + $0x18] sm:$0xf] %vm4644_vm1, %v6765_v24  ;;  %6075 = vst.msk [vmem:[%s8391_s23 + $0x58] sm:$0xf] %vm4644_vm1, %v6781_v20  ;;  %v2500_v5 = vcombine.low %v8493_v14, %v2125_v32  ;;  %v2501_v26 = vcombine.high %v8493_v14, %v2125_v32  ;;  %v2492_v33 = vrot.slane %v2484_v11, %v7630_v48 }
 0x393   : > { %6091 = vst.msk [vmem:[%s8391_s23 + $0x98] sm:$0xf] %vm4644_vm1, %v6797_v54  ;;  %6107 = vst.msk [vmem:[%s8391_s23 + $0xd8] sm:$0xf] %vm4644_vm1, %v6813_v19  ;;  %v5217_v13 = vcombine.low %v5192_v52, %v5200_v28  ;;  %v5218_v1 = vcombine.high %v5192_v52, %v5200_v28  ;;  %v5233_v4 = vcombine.low %v5208_v35, %v5216_v60 }
 0x394   : > { %v5234_v12 = vcombine.high %v5208_v35, %v5216_v60  ;;  %v2499_v3 = vrot.slane %v2485_v45, %v7630_v48  ;;  %v2508_v57 = vrot.slane %v2500_v5, %v7630_v48  ;;  %v2515_v44 = vrot.slane %v2501_v26, %v7630_v48 }
 0x395   : > { %v5225_v62 = vrot.slane %v5217_v13, %v7634_v23  ;;  %v5232_v41 = vrot.slane %v5218_v1, %v7634_v23  ;;  %v5241_v58 = vrot.slane %v5233_v4, %v7634_v23  ;;  %v2552_v19 = vcombine.low %v7896_v56, %v2095_v63 }
 0x396   : > { %v5248_v14 = vrot.slane %v5234_v12, %v7634_v23  ;;  %v2516_v37 = vcombine.low %v2492_v33, %v2508_v57  ;;  %v2517_v38 = vcombine.high %v2492_v33, %v2508_v57  ;;  %v2532_v8 = vcombine.low %v2499_v3, %v2515_v44 }
 0x397   : > { %v2533_v18 = vcombine.high %v2499_v3, %v2515_v44  ;;  %v5249_v43 = vcombine.low %v5225_v62, %v5241_v58  ;;  %v5250_v42 = vcombine.high %v5225_v62, %v5241_v58  ;;  %v2553_v52 = vcombine.high %v7896_v56, %v2095_v63  ;;  %v2105_v63 = vpop.permute.xlu0 %2104 }
 0x398   : > { %v5251_v40 = vcombine.low %v5232_v41, %v5248_v14  ;;  %v5252_v30 = vcombine.high %v5232_v41, %v5248_v14  ;;  %v2524_v25 = vrot.slane %v2516_v37, %v7634_v23  ;;  %v2531_v29 = vrot.slane %v2517_v38, %v7634_v23  ;;  %v8583_v38 = vpop.permute.xlu1 %2074 }
 0x399   : > { %v2540_v0 = vrot.slane %v2532_v8, %v7634_v23  ;;  %v2547_v55 = vrot.slane %v2533_v18, %v7634_v23  ;;  %v6766_v15 = vpack.c.bf16 %v5249_v43, %v5249_v43  ;;  %v6782_v9 = vpack.c.bf16 %v5250_v42, %v5250_v42 }
 0x39a   : > { %v6798_v16 = vpack.c.bf16 %v5251_v40, %v5251_v40  ;;  %v6814_v39 = vpack.c.bf16 %v5252_v30, %v5252_v30  ;;  %v4981_v32 = vcombine.low %v2524_v25, %v2531_v29  ;;  %v6583_v24 = vcombine.high %v2524_v25, %v2531_v29 }
 0x39b   : > { %v4997_v20 = vcombine.low %v2540_v0, %v2547_v55  ;;  %v6584_v54 = vcombine.high %v2540_v0, %v2547_v55  ;;  %6060 = vst.msk [vmem:[%s8391_s23 + $0x1c] sm:$0xf] %vm4644_vm1, %v6766_v15  ;;  %6076 = vst.msk [vmem:[%s8391_s23 + $0x5c] sm:$0xf] %vm4644_vm1, %v6782_v9  ;;  %v2568_v28 = vcombine.low %v8523_v36, %v2127_v2  ;;  %v2137_v9 = vpop.permute.xlu0 %2136 }
 0x39c   : > { %6092 = vst.msk [vmem:[%s8391_s23 + $0x9c] sm:$0xf] %vm4644_vm1, %v6798_v16  ;;  %6108 = vst.msk [vmem:[%s8391_s23 + $0xdc] sm:$0xf] %vm4644_vm1, %v6814_v39  ;;  %v2569_v35 = vcombine.high %v8523_v36, %v2127_v2  ;;  %v4988_v60 = vrot.slane %v4981_v32, %v7630_v48  ;;  %v4996_v11 = vrot.slane %v6583_v24, %v7630_v48 }
 0x39d   : > { %v5004_v45 = vrot.slane %v4997_v20, %v7630_v48  ;;  %v5012_v5 = vrot.slane %v6584_v54, %v7630_v48  ;;  %v2560_v26 = vrot.slane %v2552_v19, %v7630_v48  ;;  %v2567_v13 = vrot.slane %v2553_v52, %v7630_v48 }
 0x39e   : > { %v2576_v1 = vrot.slane %v2568_v28, %v7630_v48  ;;  %v2583_v56 = vrot.slane %v2569_v35, %v7630_v48  ;;  %v5013_v4 = vcombine.low %v4988_v60, %v4996_v11  ;;  %v5014_v12 = vcombine.high %v4988_v60, %v4996_v11 }
 0x39f   : > { %v5029_v36 = vcombine.low %v5004_v45, %v5012_v5  ;;  %v5030_v33 = vcombine.high %v5004_v45, %v5012_v5  ;;  %v2892_v28 = vcombine.low %v7940_v31, %v2105_v63  ;;  %v2893_v35 = vcombine.high %v7940_v31, %v2105_v63  ;;  %v2107_v45 = vpop.permute.xlu1 %2106 }
 0x3a0   : > { %v2584_v3 = vcombine.low %v2560_v26, %v2576_v1  ;;  %v2585_v57 = vcombine.high %v2560_v26, %v2576_v1  ;;  %v2600_v44 = vcombine.low %v2567_v13, %v2583_v56  ;;  %v2601_v62 = vcombine.high %v2567_v13, %v2583_v56 }
 0x3a1   : > { %v5021_v41 = vrot.slane %v5013_v4, %v7634_v23  ;;  %v5028_v58 = vrot.slane %v5014_v12, %v7634_v23  ;;  %v5037_v14 = vrot.slane %v5029_v36, %v7634_v23  ;;  %v5044_v37 = vrot.slane %v5030_v33, %v7634_v23  ;;  %v8609_v33 = vpop.permute.xlu0 %2068 }
 0x3a2   : > { %v2592_v8 = vrot.slane %v2584_v3, %v7634_v23  ;;  %v2599_v18 = vrot.slane %v2585_v57, %v7634_v23  ;;  %v2608_v43 = vrot.slane %v2600_v44, %v7634_v23  ;;  %v2615_v42 = vrot.slane %v2601_v62, %v7634_v23 }
 0x3a3   : > { %v5045_v40 = vcombine.low %v5021_v41, %v5037_v14  ;;  %v5046_v30 = vcombine.high %v5021_v41, %v5037_v14  ;;  %v5047_v25 = vcombine.low %v5028_v58, %v5044_v37  ;;  %v5048_v29 = vcombine.high %v5028_v58, %v5044_v37 }
 0x3a4   : > { %v5049_v0 = vcombine.low %v2592_v8, %v2599_v18  ;;  %v6585_v55 = vcombine.high %v2592_v8, %v2599_v18  ;;  %v5065_v2 = vcombine.low %v2608_v43, %v2615_v42  ;;  %v6586_v15 = vcombine.high %v2608_v43, %v2615_v42 }
 0x3a5   : > { %v6763_v16 = vpack.c.bf16 %v5045_v40, %v5045_v40  ;;  %v6779_v39 = vpack.c.bf16 %v5046_v30, %v5046_v30  ;;  %v6795_v32 = vpack.c.bf16 %v5047_v25, %v5047_v25  ;;  %v6811_v24 = vpack.c.bf16 %v5048_v29, %v5048_v29  ;;  %v2139_v30 = vpop.permute.xlu1 %2138 }
 0x3a6   : > { %v5056_v20 = vrot.slane %v5049_v0, %v7630_v48  ;;  %v5064_v54 = vrot.slane %v6585_v55, %v7630_v48  ;;  %v5072_v19 = vrot.slane %v5065_v2, %v7630_v48  ;;  %v5080_v52 = vrot.slane %v6586_v15, %v7630_v48 }
 0x3a7   : > { %6057 = vst.msk [vmem:[%s8391_s23 + $0x10] sm:$0xf] %vm4644_vm1, %v6763_v16  ;;  %6073 = vst.msk [vmem:[%s8391_s23 + $0x50] sm:$0xf] %vm4644_vm1, %v6779_v39  ;;  %v2908_v60 = vcombine.low %v8553_v50, %v2137_v9  ;;  %v2909_v11 = vcombine.high %v8553_v50, %v2137_v9  ;;  %v2900_v56 = vrot.slane %v2892_v28, %v7630_v48  ;;  %v8619_v39 = vpop.permute.xlu0 %2100 }
 0x3a8   : > { %6089 = vst.msk [vmem:[%s8391_s23 + $0x90] sm:$0xf] %vm4644_vm1, %v6795_v32  ;;  %6105 = vst.msk [vmem:[%s8391_s23 + $0xd0] sm:$0xf] %vm4644_vm1, %v6811_v24  ;;  %v5081_v5 = vcombine.low %v5056_v20, %v5064_v54  ;;  %v5082_v26 = vcombine.high %v5056_v20, %v5064_v54  ;;  %v5097_v13 = vcombine.low %v5072_v19, %v5080_v52 }
 0x3a9   : > { %v5098_v1 = vcombine.high %v5072_v19, %v5080_v52  ;;  %v2907_v4 = vrot.slane %v2893_v35, %v7630_v48  ;;  %v2916_v12 = vrot.slane %v2908_v60, %v7630_v48  ;;  %v2923_v36 = vrot.slane %v2909_v11, %v7630_v48 }
 0x3aa   : > { %v5089_v31 = vrot.slane %v5081_v5, %v7634_v23  ;;  %v5096_v63 = vrot.slane %v5082_v26, %v7634_v23  ;;  %v5105_v50 = vrot.slane %v5097_v13, %v7634_v23  ;;  %v2960_v32 = vcombine.low %v7984_v61, %v2107_v45 }
 0x3ab   : > { %v5112_v3 = vrot.slane %v5098_v1, %v7634_v23  ;;  %v2924_v57 = vcombine.low %v2900_v56, %v2916_v12  ;;  %v2925_v44 = vcombine.high %v2900_v56, %v2916_v12  ;;  %v2940_v62 = vcombine.low %v2907_v4, %v2923_v36 }
 0x3ac   : > { %v2941_v41 = vcombine.high %v2907_v4, %v2923_v36  ;;  %v5113_v58 = vcombine.low %v5089_v31, %v5105_v50  ;;  %v5114_v14 = vcombine.high %v5089_v31, %v5105_v50  ;;  %v2961_v24 = vcombine.high %v7984_v61, %v2107_v45 }
 0x3ad   : > { %v5115_v37 = vcombine.low %v5096_v63, %v5112_v3  ;;  %v5116_v8 = vcombine.high %v5096_v63, %v5112_v3  ;;  %v2932_v18 = vrot.slane %v2924_v57, %v7634_v23  ;;  %v2939_v43 = vrot.slane %v2925_v44, %v7634_v23  ;;  %v8645_v3 = vpop.permute.xlu1 %2070  ;;  %v2133_v57 = vpop.permute.xlu0 %2132 }
 0x3ae   : > { %v2948_v42 = vrot.slane %v2940_v62, %v7634_v23  ;;  %v2955_v40 = vrot.slane %v2941_v41, %v7634_v23  ;;  %v6764_v25 = vpack.c.bf16 %v5113_v58, %v5113_v58  ;;  %v6780_v29 = vpack.c.bf16 %v5114_v14, %v5114_v14 }
 0x3af   : > { %v6796_v0 = vpack.c.bf16 %v5115_v37, %v5115_v37  ;;  %v6812_v55 = vpack.c.bf16 %v5116_v8, %v5116_v8  ;;  %v5389_v2 = vcombine.low %v2932_v18, %v2939_v43  ;;  %v6595_v15 = vcombine.high %v2932_v18, %v2939_v43 }
 0x3b0   : > { %v5405_v9 = vcombine.low %v2948_v42, %v2955_v40  ;;  %v6596_v16 = vcombine.high %v2948_v42, %v2955_v40  ;;  %6058 = vst.msk [vmem:[%s8391_s23 + $0x14] sm:$0xf] %vm4644_vm1, %v6764_v25  ;;  %6074 = vst.msk [vmem:[%s8391_s23 + $0x54] sm:$0xf] %vm4644_vm1, %v6780_v29  ;;  %v2976_v20 = vcombine.low %v8583_v38, %v2139_v30 }
 0x3b1   : > { %6090 = vst.msk [vmem:[%s8391_s23 + $0x94] sm:$0xf] %vm4644_vm1, %v6796_v0  ;;  %6106 = vst.msk [vmem:[%s8391_s23 + $0xd4] sm:$0xf] %vm4644_vm1, %v6812_v55  ;;  %v2977_v54 = vcombine.high %v8583_v38, %v2139_v30  ;;  %v5396_v19 = vrot.slane %v5389_v2, %v7630_v48  ;;  %v5404_v52 = vrot.slane %v6595_v15, %v7630_v48  ;;  %v8651_v2 = vpop.permute.xlu0 %2080 }
 0x3b2   : > { %v5412_v28 = vrot.slane %v5405_v9, %v7630_v48  ;;  %v5420_v35 = vrot.slane %v6596_v16, %v7630_v48  ;;  %v2968_v60 = vrot.slane %v2960_v32, %v7630_v48  ;;  %v2975_v11 = vrot.slane %v2961_v24, %v7630_v48 }
 0x3b3   : > { %v2984_v5 = vrot.slane %v2976_v20, %v7630_v48  ;;  %v2991_v61 = vrot.slane %v2977_v54, %v7630_v48  ;;  %v5421_v45 = vcombine.low %v5396_v19, %v5404_v52  ;;  %v5422_v26 = vcombine.high %v5396_v19, %v5404_v52  ;;  %v2103_v52 = vpop.permute.xlu1 %2102 }
 0x3b4   : > { %v5437_v13 = vcombine.low %v5412_v28, %v5420_v35  ;;  %v5438_v38 = vcombine.high %v5412_v28, %v5420_v35  ;;  %v2756_v24 = vcombine.low %v8028_v53, %v8619_v39  ;;  %v2757_v20 = vcombine.high %v8028_v53, %v8619_v39 }
 0x3b5   : > { %v2992_v1 = vcombine.low %v2968_v60, %v2984_v5  ;;  %v2993_v56 = vcombine.high %v2968_v60, %v2984_v5  ;;  %v3008_v4 = vcombine.low %v2975_v11, %v2991_v61  ;;  %v3009_v12 = vcombine.high %v2975_v11, %v2991_v61 }
 0x3b6   : > { %v5429_v36 = vrot.slane %v5421_v45, %v7634_v23  ;;  %v5436_v31 = vrot.slane %v5422_v26, %v7634_v23  ;;  %v5445_v63 = vrot.slane %v5437_v13, %v7634_v23  ;;  %v5452_v50 = vrot.slane %v5438_v38, %v7634_v23 }
 0x3b7   : > { %v3000_v44 = vrot.slane %v2992_v1, %v7634_v23  ;;  %v3007_v62 = vrot.slane %v2993_v56, %v7634_v23  ;;  %v3016_v41 = vrot.slane %v3008_v4, %v7634_v23  ;;  %v3023_v58 = vrot.slane %v3009_v12, %v7634_v23  ;;  %v8679_v12 = vpop.permute.xlu0 %2112 }
 0x3b8   : > { %v5453_v14 = vcombine.low %v5429_v36, %v5445_v63  ;;  %v5454_v37 = vcombine.high %v5429_v36, %v5445_v63  ;;  %v5455_v8 = vcombine.low %v5436_v31, %v5452_v50  ;;  %v5456_v18 = vcombine.high %v5436_v31, %v5452_v50 }
 0x3b9   : > { %v5457_v43 = vcombine.low %v3000_v44, %v3007_v62  ;;  %v6597_v42 = vcombine.high %v3000_v44, %v3007_v62  ;;  %v5473_v40 = vcombine.low %v3016_v41, %v3023_v58  ;;  %v6598_v30 = vcombine.high %v3016_v41, %v3023_v58  ;;  %v2135_v58 = vpop.permute.xlu1 %2134 }
 0x3ba   : > { %v6769_v25 = vpack.c.bf16 %v5453_v14, %v5453_v14  ;;  %v6785_v29 = vpack.c.bf16 %v5454_v37, %v5454_v37  ;;  %v6801_v0 = vpack.c.bf16 %v5455_v8, %v5455_v8  ;;  %v6817_v55 = vpack.c.bf16 %v5456_v18, %v5456_v18 }
 0x3bb   : > { %v5464_v15 = vrot.slane %v5457_v43, %v7630_v48  ;;  %v5472_v9 = vrot.slane %v6597_v42, %v7630_v48  ;;  %v5480_v16 = vrot.slane %v5473_v40, %v7630_v48  ;;  %v5488_v32 = vrot.slane %v6598_v30, %v7630_v48 }
 0x3bc   : > { %6063 = vst.msk [vmem:[%s8391_s23 + $0x28] sm:$0xf] %vm4644_vm1, %v6769_v25  ;;  %6079 = vst.msk [vmem:[%s8391_s23 + $0x68] sm:$0xf] %vm4644_vm1, %v6785_v29  ;;  %v2772_v54 = vcombine.low %v8609_v33, %v2133_v57  ;;  %v2773_v19 = vcombine.high %v8609_v33, %v2133_v57  ;;  %v2764_v5 = vrot.slane %v2756_v24, %v7630_v48  ;;  %v8685_v25 = vpop.permute.xlu0 %2076 }
 0x3bd   : > { %6095 = vst.msk [vmem:[%s8391_s23 + $0xa8] sm:$0xf] %vm4644_vm1, %v6801_v0  ;;  %6111 = vst.msk [vmem:[%s8391_s23 + $0xe8] sm:$0xf] %vm4644_vm1, %v6817_v55  ;;  %v5489_v28 = vcombine.low %v5464_v15, %v5472_v9  ;;  %v5490_v35 = vcombine.high %v5464_v15, %v5472_v9  ;;  %v5505_v60 = vcombine.low %v5480_v16, %v5488_v32 }
 0x3be   : > { %v5506_v11 = vcombine.high %v5480_v16, %v5488_v32  ;;  %v2771_v61 = vrot.slane %v2757_v20, %v7630_v48  ;;  %v2780_v45 = vrot.slane %v2772_v54, %v7630_v48  ;;  %v2787_v26 = vrot.slane %v2773_v19, %v7630_v48  ;;  %v8703_v20 = vpop.permute.xlu1 %2082 }
 0x3bf   : > { %v5497_v13 = vrot.slane %v5489_v28, %v7634_v23  ;;  %v5504_v53 = vrot.slane %v5490_v35, %v7634_v23  ;;  %v5513_v39 = vrot.slane %v5505_v60, %v7634_v23  ;;  %v2824_v29 = vcombine.low %v8068_v46, %v2103_v52 }
 0x3c0   : > { %v5520_v33 = vrot.slane %v5506_v11, %v7634_v23  ;;  %v2788_v38 = vcombine.low %v2764_v5, %v2780_v45  ;;  %v2789_v1 = vcombine.high %v2764_v5, %v2780_v45  ;;  %v2804_v56 = vcombine.low %v2771_v61, %v2787_v26 }
 0x3c1   : > { %v2805_v4 = vcombine.high %v2771_v61, %v2787_v26  ;;  %v5521_v36 = vcombine.low %v5497_v13, %v5513_v39  ;;  %v5522_v31 = vcombine.high %v5497_v13, %v5513_v39  ;;  %v2825_v0 = vcombine.high %v8068_v46, %v2103_v52 }
 0x3c2   : > { %v5523_v63 = vcombine.low %v5504_v53, %v5520_v33  ;;  %v5524_v50 = vcombine.high %v5504_v53, %v5520_v33  ;;  %v2796_v57 = vrot.slane %v2788_v38, %v7634_v23  ;;  %v2803_v44 = vrot.slane %v2789_v1, %v7634_v23  ;;  %v2109_v33 = vpop.permute.xlu0 %2108 }
 0x3c3   : > { %v2812_v62 = vrot.slane %v2804_v56, %v7634_v23  ;;  %v2819_v41 = vrot.slane %v2805_v4, %v7634_v23  ;;  %v6770_v14 = vpack.c.bf16 %v5521_v36, %v5521_v36  ;;  %v6786_v37 = vpack.c.bf16 %v5522_v31, %v5522_v31 }
 0x3c4   : > { %v6802_v8 = vpack.c.bf16 %v5523_v63, %v5523_v63  ;;  %v6818_v18 = vpack.c.bf16 %v5524_v50, %v5524_v50  ;;  %v5253_v43 = vcombine.low %v2796_v57, %v2803_v44  ;;  %v6591_v42 = vcombine.high %v2796_v57, %v2803_v44  ;;  %v2115_v57 = vpop.permute.xlu1 %2114 }
 0x3c5   : > { %v5269_v40 = vcombine.low %v2812_v62, %v2819_v41  ;;  %v6592_v30 = vcombine.high %v2812_v62, %v2819_v41  ;;  %6064 = vst.msk [vmem:[%s8391_s23 + $0x2c] sm:$0xf] %vm4644_vm1, %v6770_v14  ;;  %6080 = vst.msk [vmem:[%s8391_s23 + $0x6c] sm:$0xf] %vm4644_vm1, %v6786_v37  ;;  %v2840_v55 = vcombine.low %v8645_v3, %v2135_v58 }
 0x3c6   : > { %6096 = vst.msk [vmem:[%s8391_s23 + $0xac] sm:$0xf] %vm4644_vm1, %v6802_v8  ;;  %6112 = vst.msk [vmem:[%s8391_s23 + $0xec] sm:$0xf] %vm4644_vm1, %v6818_v18  ;;  %v2841_v15 = vcombine.high %v8645_v3, %v2135_v58  ;;  %v5260_v9 = vrot.slane %v5253_v43, %v7630_v48  ;;  %v5268_v16 = vrot.slane %v6591_v42, %v7630_v48 }
 0x3c7   : > { %v5276_v32 = vrot.slane %v5269_v40, %v7630_v48  ;;  %v5284_v24 = vrot.slane %v6592_v30, %v7630_v48  ;;  %v2832_v54 = vrot.slane %v2824_v29, %v7630_v48  ;;  %v2839_v19 = vrot.slane %v2825_v0, %v7630_v48 }
 0x3c8   : > { %v2848_v46 = vrot.slane %v2840_v55, %v7630_v48  ;;  %v2855_v52 = vrot.slane %v2841_v15, %v7630_v48  ;;  %v5285_v28 = vcombine.low %v5260_v9, %v5268_v16  ;;  %v5286_v3 = vcombine.high %v5260_v9, %v5268_v16  ;;  %v8735_v9 = vpop.permute.xlu1 %2078  ;;  %v2141_v16 = vpop.permute.xlu0 %2140 }
 0x3c9   : > { %v5301_v35 = vcombine.low %v5276_v32, %v5284_v24  ;;  %v5302_v60 = vcombine.high %v5276_v32, %v5284_v24  ;;  %v3164_v29 = vcombine.low %v8094_v51, %v8679_v12  ;;  %v3165_v0 = vcombine.high %v8094_v51, %v8679_v12 }
 0x3ca   : > { %v2856_v11 = vcombine.low %v2832_v54, %v2848_v46  ;;  %v2857_v5 = vcombine.high %v2832_v54, %v2848_v46  ;;  %v2872_v61 = vcombine.low %v2839_v19, %v2855_v52  ;;  %v2873_v45 = vcombine.high %v2839_v19, %v2855_v52 }
 0x3cb   : > { %v5293_v26 = vrot.slane %v5285_v28, %v7634_v23  ;;  %v5300_v13 = vrot.slane %v5286_v3, %v7634_v23  ;;  %v5309_v53 = vrot.slane %v5301_v35, %v7634_v23  ;;  %v5316_v39 = vrot.slane %v5302_v60, %v7634_v23 }
 0x3cc   : > { %v2864_v38 = vrot.slane %v2856_v11, %v7634_v23  ;;  %v2871_v1 = vrot.slane %v2857_v5, %v7634_v23  ;;  %v2880_v56 = vrot.slane %v2872_v61, %v7634_v23  ;;  %v2887_v4 = vrot.slane %v2873_v45, %v7634_v23 }
 0x3cd   : > { %v5317_v36 = vcombine.low %v5293_v26, %v5309_v53  ;;  %v5318_v31 = vcombine.high %v5293_v26, %v5309_v53  ;;  %v5319_v63 = vcombine.low %v5300_v13, %v5316_v39  ;;  %v5320_v50 = vcombine.high %v5300_v13, %v5316_v39 }
 0x3ce   : > { %v5321_v44 = vcombine.low %v2864_v38, %v2871_v1  ;;  %v6593_v62 = vcombine.high %v2864_v38, %v2871_v1  ;;  %v5337_v41 = vcombine.low %v2880_v56, %v2887_v4  ;;  %v6594_v58 = vcombine.high %v2880_v56, %v2887_v4  ;;  %v2145_v56 = vpop.permute.xlu0 %2144 }
 0x3cf   : > { %v6767_v14 = vpack.c.bf16 %v5317_v36, %v5317_v36  ;;  %v6783_v37 = vpack.c.bf16 %v5318_v31, %v5318_v31  ;;  %v6799_v8 = vpack.c.bf16 %v5319_v63, %v5319_v63  ;;  %v6815_v18 = vpack.c.bf16 %v5320_v50, %v5320_v50 }
 0x3d0   : > { %v5328_v43 = vrot.slane %v5321_v44, %v7630_v48  ;;  %v5336_v42 = vrot.slane %v6593_v62, %v7630_v48  ;;  %v5344_v40 = vrot.slane %v5337_v41, %v7630_v48  ;;  %v5352_v30 = vrot.slane %v6594_v58, %v7630_v48 }
 0x3d1   : > { %6061 = vst.msk [vmem:[%s8391_s23 + $0x20] sm:$0xf] %vm4644_vm1, %v6767_v14  ;;  %6077 = vst.msk [vmem:[%s8391_s23 + $0x60] sm:$0xf] %vm4644_vm1, %v6783_v37  ;;  %v3232_v55 = vcombine.low %v8132_v34, %v2115_v57  ;;  %v3233_v15 = vcombine.high %v8132_v34, %v2115_v57  ;;  %v3172_v46 = vrot.slane %v3164_v29, %v7630_v48 }
 0x3d2   : > { %6093 = vst.msk [vmem:[%s8391_s23 + $0xa0] sm:$0xf] %vm4644_vm1, %v6799_v8  ;;  %6109 = vst.msk [vmem:[%s8391_s23 + $0xe0] sm:$0xf] %vm4644_vm1, %v6815_v18  ;;  %v5353_v32 = vcombine.low %v5328_v43, %v5336_v42  ;;  %v5354_v24 = vcombine.high %v5328_v43, %v5336_v42  ;;  %v5369_v54 = vcombine.low %v5344_v40, %v5352_v30 }
 0x3d3   : > { %v5370_v19 = vcombine.high %v5344_v40, %v5352_v30  ;;  %v3179_v52 = vrot.slane %v3165_v0, %v7630_v48  ;;  %v8740_v28 = vrot.slane %v3232_v55, %v7630_v48  ;;  %v8743_v51 = vrot.slane %v3233_v15, %v7630_v48 }
 0x3d4   : > { %v5361_v12 = vrot.slane %v5353_v32, %v7634_v23  ;;  %v5368_v34 = vrot.slane %v5354_v24, %v7634_v23  ;;  %v5377_v3 = vrot.slane %v5369_v54, %v7634_v23  ;;  %v3028_v60 = vcombine.low %v8258_v7, %v2109_v33 }
 0x3d5   : > { %v5384_v35 = vrot.slane %v5370_v19, %v7634_v23  ;;  %v3029_v11 = vcombine.high %v8258_v7, %v2109_v33  ;;  %v3044_v5 = vcombine.low %v8685_v25, %v2141_v16  ;;  %v3045_v61 = vcombine.high %v8685_v25, %v2141_v16  ;;  %v2111_v33 = vpop.permute.xlu1 %2110 }
 0x3d6   : > { %v5385_v45 = vcombine.low %v5361_v12, %v5377_v3  ;;  %v5386_v26 = vcombine.high %v5361_v12, %v5377_v3  ;;  %v3036_v39 = vrot.slane %v3028_v60, %v7630_v48  ;;  %v3096_v62 = vcombine.low %v8290_v6, %v2111_v33 }
 0x3d7   : > { %v5387_v13 = vcombine.low %v5368_v34, %v5384_v35  ;;  %v5388_v53 = vcombine.high %v5368_v34, %v5384_v35  ;;  %v3043_v38 = vrot.slane %v3029_v11, %v7630_v48  ;;  %v3052_v1 = vrot.slane %v3044_v5, %v7630_v48 }
 0x3d8   : > { %v3059_v7 = vrot.slane %v3045_v61, %v7630_v48  ;;  %v6768_v4 = vpack.c.bf16 %v5385_v45, %v5385_v45  ;;  %v6784_v25 = vpack.c.bf16 %v5386_v26, %v5386_v26  ;;  %v3097_v41 = vcombine.high %v8290_v6, %v2111_v33 }
 0x3d9   : > { %v6800_v36 = vpack.c.bf16 %v5387_v13, %v5387_v13  ;;  %v6816_v31 = vpack.c.bf16 %v5388_v53, %v5388_v53  ;;  %v3060_v63 = vcombine.low %v3036_v39, %v3052_v1  ;;  %v3061_v50 = vcombine.high %v3036_v39, %v3052_v1  ;;  %v2143_v5 = vpop.permute.xlu1 %2142 }
 0x3da   : > { %v3076_v57 = vcombine.low %v3043_v38, %v3059_v7  ;;  %v3077_v44 = vcombine.high %v3043_v38, %v3059_v7  ;;  %6062 = vst.msk [vmem:[%s8391_s23 + $0x24] sm:$0xf] %vm4644_vm1, %v6768_v4  ;;  %6078 = vst.msk [vmem:[%s8391_s23 + $0x64] sm:$0xf] %vm4644_vm1, %v6784_v25  ;;  %v3180_v58 = vcombine.low %v8651_v2, %v2145_v56 }
 0x3db   : > { %6094 = vst.msk [vmem:[%s8391_s23 + $0xa4] sm:$0xf] %vm4644_vm1, %v6800_v36  ;;  %6110 = vst.msk [vmem:[%s8391_s23 + $0xe4] sm:$0xf] %vm4644_vm1, %v6816_v31  ;;  %v3181_v14 = vcombine.high %v8651_v2, %v2145_v56  ;;  %v3068_v37 = vrot.slane %v3060_v63, %v7634_v23  ;;  %v3075_v8 = vrot.slane %v3061_v50, %v7634_v23 }
 0x3dc   : > { %v3084_v18 = vrot.slane %v3076_v57, %v7634_v23  ;;  %v3091_v43 = vrot.slane %v3077_v44, %v7634_v23  ;;  %v8774_v42 = vrot.slane %v3096_v62, %v7630_v48  ;;  %v8777_v40 = vrot.slane %v3097_v41, %v7630_v48 }
 0x3dd   : > { %v3188_v6 = vrot.slane %v3180_v58, %v7630_v48  ;;  %v3195_v30 = vrot.slane %v3181_v14, %v7630_v48  ;;  %v5525_v29 = vcombine.low %v3068_v37, %v3075_v8  ;;  %v6599_v2 = vcombine.high %v3068_v37, %v3075_v8  ;;  %v2147_v14 = vpop.permute.xlu1 %2146 }
 0x3de   : > { %v5541_v0 = vcombine.low %v3084_v18, %v3091_v43  ;;  %v6600_v55 = vcombine.high %v3084_v18, %v3091_v43 }
 0x3df   : > { %v3196_v15 = vcombine.low %v3172_v46, %v3188_v6  ;;  %v3197_v16 = vcombine.high %v3172_v46, %v3188_v6  ;;  %v3212_v32 = vcombine.low %v3179_v52, %v3195_v30  ;;  %v3213_v24 = vcombine.high %v3179_v52, %v3195_v30 }
 0x3e0   : > { %v5532_v54 = vrot.slane %v5525_v29, %v7630_v48  ;;  %v5540_v19 = vrot.slane %v6599_v2, %v7630_v48  ;;  %v5548_v12 = vrot.slane %v5541_v0, %v7630_v48  ;;  %v5556_v34 = vrot.slane %v6600_v55, %v7630_v48 }
 0x3e1   : > { %v3204_v3 = vrot.slane %v3196_v15, %v7634_v23  ;;  %v3211_v35 = vrot.slane %v3197_v16, %v7634_v23  ;;  %v3220_v60 = vrot.slane %v3212_v32, %v7634_v23  ;;  %v3227_v11 = vrot.slane %v3213_v24, %v7634_v23 }
 0x3e2   : > { %v5557_v46 = vcombine.low %v5532_v54, %v5540_v19  ;;  %v5558_v61 = vcombine.high %v5532_v54, %v5540_v19  ;;  %v5573_v52 = vcombine.low %v5548_v12, %v5556_v34  ;;  %v5574_v45 = vcombine.high %v5548_v12, %v5556_v34 }
 0x3e3   : > { %v5661_v26 = vcombine.low %v3204_v3, %v3211_v35  ;;  %v6603_v13 = vcombine.high %v3204_v3, %v3211_v35  ;;  %v5677_v53 = vcombine.low %v3220_v60, %v3227_v11  ;;  %v6604_v39 = vcombine.high %v3220_v60, %v3227_v11 }
 0x3e4   : > { %v5565_v38 = vrot.slane %v5557_v46, %v7634_v23  ;;  %v5572_v1 = vrot.slane %v5558_v61, %v7634_v23  ;;  %v5581_v7 = vrot.slane %v5573_v52, %v7634_v23  ;;  %v5588_v33 = vrot.slane %v5574_v45, %v7634_v23 }
 0x3e5   : > { %v5668_v56 = vrot.slane %v5661_v26, %v7630_v48  ;;  %v5676_v4 = vrot.slane %v6603_v13, %v7630_v48  ;;  %v5684_v25 = vrot.slane %v5677_v53, %v7630_v48  ;;  %v5692_v36 = vrot.slane %v6604_v39, %v7630_v48 }
 0x3e6   : > { %v5589_v31 = vcombine.low %v5565_v38, %v5581_v7  ;;  %v5590_v63 = vcombine.high %v5565_v38, %v5581_v7  ;;  %v5591_v50 = vcombine.low %v5572_v1, %v5588_v33  ;;  %v5592_v57 = vcombine.high %v5572_v1, %v5588_v33 }
 0x3e7   : > { %v5693_v44 = vcombine.low %v5668_v56, %v5676_v4  ;;  %v5694_v62 = vcombine.high %v5668_v56, %v5676_v4  ;;  %v5709_v41 = vcombine.low %v5684_v25, %v5692_v36  ;;  %v5710_v58 = vcombine.high %v5684_v25, %v5692_v36 }
 0x3e8   : > { %v6771_v37 = vpack.c.bf16 %v5589_v31, %v5589_v31  ;;  %v6787_v8 = vpack.c.bf16 %v5590_v63, %v5590_v63  ;;  %v6803_v18 = vpack.c.bf16 %v5591_v50, %v5591_v50  ;;  %v6819_v43 = vpack.c.bf16 %v5592_v57, %v5592_v57 }
 0x3e9   : > { %v5701_v6 = vrot.slane %v5693_v44, %v7634_v23  ;;  %v5708_v30 = vrot.slane %v5694_v62, %v7634_v23  ;;  %v5717_v29 = vrot.slane %v5709_v41, %v7634_v23  ;;  %v5724_v2 = vrot.slane %v5710_v58, %v7634_v23 }
 0x3ea   : > { %6065 = vst.msk [vmem:[%s8391_s23 + $0x30] sm:$0xf] %vm4644_vm1, %v6771_v37  ;;  %6081 = vst.msk [vmem:[%s8391_s23 + $0x70] sm:$0xf] %vm4644_vm1, %v6787_v8  ;;  %v3112_v0 = vcombine.low %v8735_v9, %v2143_v5  ;;  %v3113_v55 = vcombine.high %v8735_v9, %v2143_v5  ;;  %v3248_v15 = vcombine.low %v8703_v20, %v2147_v14 }
 0x3eb   : > { %6097 = vst.msk [vmem:[%s8391_s23 + $0xb0] sm:$0xf] %vm4644_vm1, %v6803_v18  ;;  %6113 = vst.msk [vmem:[%s8391_s23 + $0xf0] sm:$0xf] %vm4644_vm1, %v6819_v43  ;;  %v3249_v16 = vcombine.high %v8703_v20, %v2147_v14  ;;  %v5725_v32 = vcombine.low %v5701_v6, %v5717_v29  ;;  %v5726_v24 = vcombine.high %v5701_v6, %v5717_v29 }
 0x3ec   : > { %v5727_v54 = vcombine.low %v5708_v30, %v5724_v2  ;;  %v5728_v19 = vcombine.high %v5708_v30, %v5724_v2  ;;  %v3120_v12 = vrot.slane %v3112_v0, %v7630_v48  ;;  %v3127_v34 = vrot.slane %v3113_v55, %v7630_v48 }
 0x3ed   : > { %v3256_v3 = vrot.slane %v3248_v15, %v7630_v48  ;;  %v3263_v9 = vrot.slane %v3249_v16, %v7630_v48  ;;  %v6773_v35 = vpack.c.bf16 %v5725_v32, %v5725_v32  ;;  %v6789_v60 = vpack.c.bf16 %v5726_v24, %v5726_v24 }
 0x3ee   : > { %v6805_v11 = vpack.c.bf16 %v5727_v54, %v5727_v54  ;;  %v6821_v20 = vpack.c.bf16 %v5728_v19, %v5728_v19  ;;  %v3128_v5 = vcombine.low %v8774_v42, %v3120_v12  ;;  %v3129_v46 = vcombine.high %v8774_v42, %v3120_v12 }
 0x3ef   : > { %v3144_v61 = vcombine.low %v8777_v40, %v3127_v34  ;;  %v3145_v52 = vcombine.high %v8777_v40, %v3127_v34  ;;  %6067 = vst.msk [vmem:[%s8391_s23 + $0x38] sm:$0xf] %vm4644_vm1, %v6773_v35  ;;  %6083 = vst.msk [vmem:[%s8391_s23 + $0x78] sm:$0xf] %vm4644_vm1, %v6789_v60  ;;  %v3264_v45 = vcombine.low %v8740_v28, %v3256_v3 }
 0x3f0   : > { %6099 = vst.msk [vmem:[%s8391_s23 + $0xb8] sm:$0xf] %vm4644_vm1, %v6805_v11  ;;  %6115 = vst.msk [vmem:[%s8391_s23 + $0xf8] sm:$0xf] %vm4644_vm1, %v6821_v20  ;;  %v3265_v26 = vcombine.high %v8740_v28, %v3256_v3  ;;  %v3280_v13 = vcombine.low %v8743_v51, %v3263_v9  ;;  %v3281_v42 = vcombine.high %v8743_v51, %v3263_v9 }
 0x3f1   : > { %v3136_v53 = vrot.slane %v3128_v5, %v7634_v23  ;;  %v3143_v40 = vrot.slane %v3129_v46, %v7634_v23  ;;  %v3152_v39 = vrot.slane %v3144_v61, %v7634_v23  ;;  %v3159_v38 = vrot.slane %v3145_v52, %v7634_v23 }
 0x3f2   : > { %v3272_v1 = vrot.slane %v3264_v45, %v7634_v23  ;;  %v3279_v7 = vrot.slane %v3265_v26, %v7634_v23  ;;  %v3288_v33 = vrot.slane %v3280_v13, %v7634_v23  ;;  %v3295_v28 = vrot.slane %v3281_v42, %v7634_v23 }
 0x3f3   : > { %v5593_v56 = vcombine.low %v3136_v53, %v3143_v40  ;;  %v6601_v4 = vcombine.high %v3136_v53, %v3143_v40  ;;  %v5609_v51 = vcombine.low %v3152_v39, %v3159_v38  ;;  %v6602_v25 = vcombine.high %v3152_v39, %v3159_v38 }
 0x3f4   : > { %v5729_v36 = vcombine.low %v3272_v1, %v3279_v7  ;;  %v6605_v31 = vcombine.high %v3272_v1, %v3279_v7  ;;  %v5745_v63 = vcombine.low %v3288_v33, %v3295_v28  ;;  %v6606_v50 = vcombine.high %v3288_v33, %v3295_v28 }
 0x3f5   : > { %v5600_v57 = vrot.slane %v5593_v56, %v7630_v48  ;;  %v5608_v44 = vrot.slane %v6601_v4, %v7630_v48  ;;  %v5616_v62 = vrot.slane %v5609_v51, %v7630_v48  ;;  %v5624_v41 = vrot.slane %v6602_v25, %v7630_v48 }
 0x3f6   : > { %v5736_v58 = vrot.slane %v5729_v36, %v7630_v48  ;;  %v5744_v14 = vrot.slane %v6605_v31, %v7630_v48  ;;  %v5752_v37 = vrot.slane %v5745_v63, %v7630_v48  ;;  %v5760_v8 = vrot.slane %v6606_v50, %v7630_v48 }
 0x3f7   : > { %v5625_v18 = vcombine.low %v5600_v57, %v5608_v44  ;;  %v5626_v43 = vcombine.high %v5600_v57, %v5608_v44  ;;  %v5641_v6 = vcombine.low %v5616_v62, %v5624_v41  ;;  %v5642_v30 = vcombine.high %v5616_v62, %v5624_v41 }
 0x3f8   : > { %v5761_v29 = vcombine.low %v5736_v58, %v5744_v14  ;;  %v5762_v2 = vcombine.high %v5736_v58, %v5744_v14  ;;  %v5777_v0 = vcombine.low %v5752_v37, %v5760_v8  ;;  %v5778_v55 = vcombine.high %v5752_v37, %v5760_v8 }
 0x3f9   : > { %v5633_v15 = vrot.slane %v5625_v18, %v7634_v23  ;;  %v5640_v16 = vrot.slane %v5626_v43, %v7634_v23  ;;  %v5649_v32 = vrot.slane %v5641_v6, %v7634_v23  ;;  %v5656_v24 = vrot.slane %v5642_v30, %v7634_v23 }
 0x3fa   : > { %v5769_v48 = vrot.slane %v5761_v29, %v7634_v23  ;;  %v5776_v54 = vrot.slane %v5762_v2, %v7634_v23  ;;  %v5785_v19 = vrot.slane %v5777_v0, %v7634_v23  ;;  %v5792_v12 = vrot.slane %v5778_v55, %v7634_v23 }
 0x3fb   : > { %v5657_v34 = vcombine.low %v5633_v15, %v5649_v32  ;;  %v5658_v3 = vcombine.high %v5633_v15, %v5649_v32  ;;  %v5659_v9 = vcombine.low %v5640_v16, %v5656_v24  ;;  %v5660_v35 = vcombine.high %v5640_v16, %v5656_v24 }
 0x3fc   : > { %v5793_v60 = vcombine.low %v5769_v48, %v5785_v19  ;;  %v5794_v11 = vcombine.high %v5769_v48, %v5785_v19  ;;  %v5795_v20 = vcombine.low %v5776_v54, %v5792_v12  ;;  %v5796_v5 = vcombine.high %v5776_v54, %v5792_v12 }
 0x3fd   : > { %v6772_v46 = vpack.c.bf16 %v5657_v34, %v5657_v34  ;;  %v6788_v61 = vpack.c.bf16 %v5658_v3, %v5658_v3  ;;  %v6804_v23 = vpack.c.bf16 %v5659_v9, %v5659_v9  ;;  %v6820_v52 = vpack.c.bf16 %v5660_v35, %v5660_v35 }
 0x3fe   : > { %v6774_v45 = vpack.c.bf16 %v5793_v60, %v5793_v60  ;;  %v6790_v26 = vpack.c.bf16 %v5794_v11, %v5794_v11  ;;  %v6806_v13 = vpack.c.bf16 %v5795_v20, %v5795_v20  ;;  %v6822_v42 = vpack.c.bf16 %v5796_v5, %v5796_v5 }
 0x3ff   : > { %6066 = vst.msk [vmem:[%s8391_s23 + $0x34] sm:$0xf] %vm4644_vm1, %v6772_v46  ;;  %6082 = vst.msk [vmem:[%s8391_s23 + $0x74] sm:$0xf] %vm4644_vm1, %v6788_v61  ;;  %v6840_v53 = vpack.c.bf16 %v8427_v49, %v8423_v27  ;;  %v6835_v40 = vpack.c.bf16 %v8459_v21, %v8425_v10  ;;  %v6850_v39 = vpack.c.bf16 %v8481_v22, %v8461_v47 }
 0x400   : > { %6098 = vst.msk [vmem:[%s8391_s23 + $0xb4] sm:$0xf] %vm4644_vm1, %v6804_v23  ;;  %6114 = vst.msk [vmem:[%s8391_s23 + $0xf4] sm:$0xf] %vm4644_vm1, %v6820_v52  ;;  %v6845_v38 = vpack.c.bf16 %v8483_v17, %v8467_v59 }
 0x401   : > { %6068 = vst.msk [vmem:[%s8391_s23 + $0x3c] sm:$0xf] %vm4644_vm1, %v6774_v45  ;;  %6084 = vst.msk [vmem:[%s8391_s23 + $0x7c] sm:$0xf] %vm4644_vm1, %v6790_v26 }
 0x402   : > { %6100 = vst.msk [vmem:[%s8391_s23 + $0xbc] sm:$0xf] %vm4644_vm1, %v6806_v13  ;;  %6116 = vst.msk [vmem:[%s8391_s23 + $0xfc] sm:$0xf] %vm4644_vm1, %v6822_v42 }
 0x403   : > { %6852 = vst [vmem:[%s8860_s8 + $0x8] sm:$0xff] %v6840_v53   ;;  %6836 = vst [vmem:[%s8860_s8] sm:$0xff] %v6835_v40  }
 0x404   : > { %6854 = vst [vmem:[%s8860_s8 + $0x18] sm:$0xff] %v6850_v39   ;;  %6853 = vst [vmem:[%s8860_s8 + $0x10] sm:$0xff] %v6845_v38  }
 0x405   : > { %7042 = shalt.err (!%p7039_p5)
}
 0x406   : > { %s7043_s23 = scalar_lea.hbm %s8885_s17, 512  ;;  %s7047_s12 = scalar_lea.hbm %s8955_s6, 1024 }
 0x407   : > { %p7044_p6 = scmp.ne.s32.totalorder %s8885_s17, %s7043_s23  ;;  %p7048_p10 = scmp.lt.u32.totalorder %s8885_s17, %s8955_s6 }
 0x408   : > { %p7049_p11 = scmp.lt.u32.totalorder %s7047_s12, %s7043_s23  ;;  %p7051_p13 = scmp.lt.u32.totalorder %s7043_s23, %s8885_s17 }
 0x409   : > { %p7045_p7 = pnand %p7044_p6, %p7197_p4 }
 0x40a   : > { %p7050_p12 = por %p7049_p11, %p7048_p10 }
 0x40b   : > { %p7046_p9 = pneg %p7045_p7 }
 0x40c   : > { %p7052_p0 = por %p7051_p13, %p7050_p12 }
 0x40e   : > { %p7053_p1 = pnand %p7052_p0, %p7046_p9 }
 0x410   : > { %7056 = shalt.err (!%p7053_p1)
}
 0x411   : > { %s7116_s20 = smov 4  }
 0x412   : > { %6929 = dma.vmem_to_hbm [thread:$0]  (%p7197_p4), %s8864_s10, 512, %s8885_s17, %s8901_s18, %s7112_s19, %s7112_s19, %s7116_s20  }
 0x413 PF: > { %p6935_p2 = scmp.ge.s32.totalorder %s7107_s29, 2  ;;  %s6330_s21 = sand.u32 1, %s7087_s24  }
 0x414   : > { %s6331_s22 = scalar_lea.sflag [#allocation3], %s6330_s21 }
 0x415   : > { %p6932_p3 = pnand %p6935_p2, %p7204_p8 }
 0x417   : > { %7082 = dma.done.wait (!%p6932_p3), %s6331_s22, 512  }
 0x418   : > { %7084 = vsyncadd (!%p6932_p3), %s6331_s22, 4294966784  ;;  %s21_s29 = sadd.s32 1, %s7107_s29   ;;  %s8959_s24 = smov %s7091_s25 }
 0x419   : > { %p18_p5 = scmp.ge.s32.totalorder %s21_s29, 4   ;;  %s8960_s25 = smov %s7095_s26 }
 0x41a   : > { %s8961_s26 = smov %s7210_s14  ;;  %s8962_s27 = smov %s7103_s28 }
 0x41b   : > { %s8963_s28 = smov %s8965_s9  ;;  %20 = sbr.rel (!%p18_p5) target bundleno = 4 (0x4), region = 99 }
 0x422   :  { %6348 = vsyncpa [#allocation3], 1 }
 0x423   :  { %6350 = vsyncpa [#allocation3 + $0x1], 1 }

</bundles_post_ra>
